<compile_context>
chip_gen: v7x
topology: tpu7x:2x2x1
jax: 0.10.0
libtpu: 0.0.40
codegen_flags: <defaults>
</compile_context>

<pallas_src>
import functools

import jax
import jax.numpy as jnp
from jax.experimental import pallas as pl
from jax.experimental.pallas import tpu as pltpu

_BN_EPS = 1e-5


# ----------------------------------------------------------------------------
# Parameters
# ----------------------------------------------------------------------------
def _init_conv_bn(key, cin, cout):
    """Conv2d(cin, cout, 1, bias=False) + BatchNorm folded (eval, default stats).

    Returns (W, b) with W stored as (cin, cout) so matmuls compute x @ W + b.
    """
    w = jax.random.normal(key, (cin, cout), jnp.float32) * (1.0 / jnp.sqrt(cin))
    bn_scale = 1.0 / jnp.sqrt(1.0 + _BN_EPS)       # gamma=1, running_var=1
    w = w * bn_scale
    b = jnp.zeros((1, cout), jnp.float32)           # beta=0, running_mean=0
    return w, b


def init_params(key, ocr_ch, ocr_qkv_ch):
    """Synthetic per-conv parameters mirroring the PyTorch module layout."""
    keys = jax.random.split(key, 9)
    psi_w1, psi_b1 = _init_conv_bn(keys[0], ocr_ch, ocr_qkv_ch)
    psi_w2, psi_b2 = _init_conv_bn(keys[1], ocr_qkv_ch, ocr_qkv_ch)
    phi_w1, phi_b1 = _init_conv_bn(keys[2], ocr_ch, ocr_qkv_ch)
    phi_w2, phi_b2 = _init_conv_bn(keys[3], ocr_qkv_ch, ocr_qkv_ch)
    del_w1, del_b1 = _init_conv_bn(keys[4], ocr_ch, ocr_qkv_ch)
    del_w2, del_b2 = _init_conv_bn(keys[5], ocr_qkv_ch, ocr_qkv_ch)
    rho_w, rho_b = _init_conv_bn(keys[6], ocr_qkv_ch, ocr_ch)
    g_w_obj, g_b = _init_conv_bn(keys[7], ocr_ch, ocr_ch)   # obj-context half of g
    g_w_bb, _ = _init_conv_bn(keys[8], ocr_ch, ocr_ch)      # bb-feats half of g
    return (psi_w1, psi_b1, psi_w2, psi_b2,
            phi_w1, phi_b1, phi_w2, phi_b2,
            del_w1, del_b1, del_w2, del_b2,
            rho_w, rho_b, g_w_obj, g_w_bb, g_b)


def prepare_params(raw, ocr_qkv_ch):
    """Fold/stack module params into kernel-ready form.

    * phi/delta stacked: layer 1 -> (C, 2Q); layer 2 -> block-diagonal (2Q, 2Q).
    * g's two channel halves kept separate (two accumulating dots in-kernel).
    * Weights cast to bf16 (MXU operands); biases stay f32 (added to the f32
      accumulator).  The sqrt(Q) logit scale is NOT folded into weights; it is
      applied in-kernel on the f32 logits (matches the spec module exactly).
    """
    (psi_w1, psi_b1, psi_w2, psi_b2,
     phi_w1, phi_b1, phi_w2, phi_b2,
     del_w1, del_b1, del_w2, del_b2,
     rho_w, rho_b, g_w_obj, g_w_bb, g_b) = raw
    Q = ocr_qkv_ch
    zeros = jnp.zeros((Q, Q), jnp.float32)
    pd_w2 = jnp.block([[phi_w2, zeros], [zeros, del_w2]])    # block-diag (2Q, 2Q)
    bf = lambda a: a.astype(jnp.bfloat16)
    return {
        "psi_w1": bf(psi_w1), "psi_b1": psi_b1,
        "psi_w2": bf(psi_w2), "psi_b2": psi_b2,
        "pd_w1": bf(jnp.concatenate([phi_w1, del_w1], axis=1)),
        "pd_b1": jnp.concatenate([phi_b1, del_b1], axis=1),
        "pd_w2": bf(pd_w2),
        "pd_b2": jnp.concatenate([phi_b2, del_b2], axis=1),
        "rho_w": bf(rho_w), "rho_b": rho_b,
        "g_w_obj": bf(g_w_obj), "g_w_bb": bf(g_w_bb), "g_b": g_b,
    }


# ----------------------------------------------------------------------------
# Kernels
# ----------------------------------------------------------------------------
def _kv_kernel(ctx_ref, pd_w1, pd_b1, pd_w2, pd_b2, rho_w, k_ref, vr_ref):
    """phi & delta (fused twiceConvBNReLU stacks) + rho fold, once per batch."""
    qc = k_ref.shape[-1]
    c = ctx_ref[0]                                                  # (M, C) bf16
    h = jnp.dot(c, pd_w1[...], preferred_element_type=jnp.float32) + pd_b1[...]
    h = jnp.maximum(h, 0.0)                                         # (M, 2Q) f32
    kv = jnp.dot(h.astype(jnp.bfloat16), pd_w2[...],
                 preferred_element_type=jnp.float32) + pd_b2[...]
    kv = jnp.maximum(kv, 0.0)                                       # (M, 2Q) f32
    k_ref[0] = kv[:, :qc].astype(k_ref.dtype)                       # key  (M, Q)
    v = kv[:, qc:].astype(jnp.bfloat16)                             # value (M, Q)
    # rho folded through the attention: (soft @ v) @ rho_w == soft @ (v @ rho_w)
    vr = jnp.dot(v, rho_w[...], preferred_element_type=jnp.float32)  # (M, C) f32
    vr_ref[0] = vr.astype(vr_ref.dtype)


def _ocr_kernel(bb_ref, kT_ref, vr_ref,
                psi_w1, psi_b1, psi_w2, psi_b2,
                rho_b, g_w_obj, g_w_bb, g_b,
                out_ref, *, scale):
    """psi + attention + (rho-folded) aggregation + g for one pixel tile."""
    x = bb_ref[0]                                                   # (TN, C) bf16
    kT = kT_ref[0]                                                  # (Q, M)  bf16
    vr = vr_ref[0]                                                  # (M, C)  bf16

    # psi: two ConvBNReLU (1x1).
    h = jnp.maximum(
        jnp.dot(x, psi_w1[...], preferred_element_type=jnp.float32) + psi_b1[...],
        0.0)
    q = jnp.maximum(
        jnp.dot(h.astype(jnp.bfloat16), psi_w2[...],
                preferred_element_type=jnp.float32) + psi_b2[...],
        0.0)                                                        # (TN, Q) f32

    # Attention logits (scaled by sqrt(Q), as in the spec module) + softmax
    # over the M context pixels (M stays whole).
    prr = jnp.dot(q.astype(jnp.bfloat16), kT,
                  preferred_element_type=jnp.float32) * scale       # (TN, M) f32
    prr = prr - jnp.max(prr, axis=-1, keepdims=True)
    e = jnp.exp(prr)
    soft = e * pl.reciprocal(jnp.sum(e, axis=-1, keepdims=True), approx=True)

    # rho-folded aggregation: relu(soft @ (v @ rho_w) + rho_b).
    r = jnp.maximum(
        jnp.dot(soft.astype(jnp.bfloat16), vr,
                preferred_element_type=jnp.float32) + rho_b[...],
        0.0)                                                        # (TN, C) f32

    # g on cat([obj_context, bb_feats], channel) without materializing the
    # concat: two accumulating dots into one f32 result.
    aug = jnp.maximum(
        jnp.dot(r.astype(jnp.bfloat16), g_w_obj[...],
                preferred_element_type=jnp.float32)
        + jnp.dot(x, g_w_bb[...], preferred_element_type=jnp.float32)
        + g_b[...],
        0.0)
    out_ref[0] = aug.astype(out_ref.dtype)                          # bf16 out


# ----------------------------------------------------------------------------
# Tiling / VMEM planning
# ----------------------------------------------------------------------------
def _gen_scoped_cap():
    """Max scoped-VMEM we are willing to request, per TPU generation."""
    try:
        phys = pltpu.get_tpu_info().vmem_capacity_bytes
    except Exception:
        phys = 64 * 1024 * 1024
    if phys >= 96 * 1024 * 1024:            # v5e / v6e: 128 MiB physical
        return 96 * 1024 * 1024
    return 48 * 1024 * 1024                 # v7x: 64 MiB physical


def _vmem_estimate(tn, c, q, m, weight_bytes):
    """Rough per-core VMEM footprint of the main kernel at pixel tile `tn`."""
    io = 2 * (tn * c * 2) * 2                     # bb in + bf16 out, 2 buffers each
    kv = 2 * (q * m * 2 + m * c * 2)              # kT + vr, 2 buffers each
    temps = 8 * tn * max(c, q) * 4                # f32 intermediates (compiler scratch)
    est = io + kv + 2 * weight_bytes + temps
    return int(est * 1.5) + (4 << 20)             # headroom for Mosaic internals


def _plan_tile(n, b, c, q, m, weight_bytes, tile_cap):
    """Pick the pixel tile TN and the scoped-VMEM limit from the footprint."""
    scoped_cap = _gen_scoped_cap()
    cands = [t for t in (2048, 1024, 512, 256, 128, 64, 32, 16, 8)
             if t <= min(tile_cap, n) and n % t == 0]
    if not cands:
        cands = [n]
    fitting = [t for t in cands if _vmem_estimate(t, c, q, m, weight_bytes) <= scoped_cap]
    if not fitting:
        fitting = [cands[-1]]
    tn = fitting[0]
    for t in fitting:                 # largest tile that still yields >= 2 grid
        if b * (n // t) >= 2:         # points, so both v7x TensorCores get work
            tn = t
            break
    vlim = min(scoped_cap, max(32 << 20, _vmem_estimate(tn, c, q, m, weight_bytes)))
    return tn, vlim


# ----------------------------------------------------------------------------
# Forward
# ----------------------------------------------------------------------------
@functools.partial(jax.jit, static_argnames=("tile_n", "vmem_limit_bytes"))
def _forward_impl(bb, ctx, params, *, tile_n, vmem_limit_bytes):
    """bb: (B, N, C) channels-last, ctx: (B, M, C) channels-last."""
    B, N, C = bb.shape
    _, M, _ = ctx.shape
    Q = params["psi_w2"].shape[0]
    TN = tile_n
    NT = N // TN
    scale = float(Q) ** 0.5                       # multiplicative, as in the spec

    bb = bb.astype(jnp.bfloat16)
    ctx = ctx.astype(jnp.bfloat16)

    # --- k / vr: computed once per batch element (context is tiny: M = classes).
    kv_weights = (params["pd_w1"], params["pd_b1"], params["pd_w2"],
                  params["pd_b2"], params["rho_w"])
    k, vr = pl.pallas_call(
        _kv_kernel,
        out_shape=(jax.ShapeDtypeStruct((B, M, Q), jnp.bfloat16),
                   jax.ShapeDtypeStruct((B, M, C), jnp.bfloat16)),
        grid_spec=pltpu.PrefetchScalarGridSpec(
            num_scalar_prefetch=0,
            grid=(B,),
            in_specs=[pl.BlockSpec((1, M, C), lambda b: (b, 0, 0))]
                    + [pl.BlockSpec(w.shape, lambda b: (0, 0)) for w in kv_weights],
            out_specs=[pl.BlockSpec((1, M, Q), lambda b: (b, 0, 0)),
                       pl.BlockSpec((1, M, C), lambda b: (b, 0, 0))]),
        compiler_params=pltpu.CompilerParams(
            dimension_semantics=("parallel",)),
    )(ctx, *kv_weights)

    # Pre-transpose k to (B, Q, M) once (tiny), so the hot loop never transposes.
    kT = jnp.swapaxes(k, 1, 2)

    # --- main attention + g kernel, tiled over the pixel axis.
    main_weights = (params["psi_w1"], params["psi_b1"],
                    params["psi_w2"], params["psi_b2"],
                    params["rho_b"],
                    params["g_w_obj"], params["g_w_bb"], params["g_b"])
    flops = 2 * B * N * (C * Q + Q * Q + Q * M + M * C + 2 * C * C)
    param_bytes = sum(int(w.size) * w.dtype.itemsize for w in main_weights)
    bytes_accessed = int(B * N * C * 2 + B * N * C * 2
                         + B * (Q * M + M * C) * 2 + param_bytes)

    kernel = functools.partial(_ocr_kernel, scale=scale)
    out_cl = pl.pallas_call(
        kernel,
        out_shape=jax.ShapeDtypeStruct((B, N, C), jnp.bfloat16),
        grid_spec=pltpu.PrefetchScalarGridSpec(
            num_scalar_prefetch=0,
            grid=(B, NT),
            in_specs=[pl.BlockSpec((1, TN, C), lambda b, n: (b, n, 0)),
                      pl.BlockSpec((1, Q, M), lambda b, n: (b, 0, 0)),
                      pl.BlockSpec((1, M, C), lambda b, n: (b, 0, 0))]
                    + [pl.BlockSpec(w.shape, lambda b, n: (0, 0)) for w in main_weights],
            out_specs=pl.BlockSpec((1, TN, C), lambda b, n: (b, n, 0))),
        compiler_params=pltpu.CompilerParams(
            dimension_semantics=("parallel", "parallel"),
            vmem_limit_bytes=vmem_limit_bytes),
        cost_estimate=pl.CostEstimate(flops=int(flops),
                                      transcendentals=int(B * N * (M + 1)),
                                      bytes_accessed=bytes_accessed),
    )(bb, kT, vr, *main_weights)
    return out_cl


def spatial_ocr_forward_cl(bb_cl, ctx_cl, params, tile_n=None):
    """Fast path: channels-last bf16 in, channels-last bf16 out (no transposes).

    bb_cl: (B, H, W, C) or (B, N, C); ctx_cl: (B, Hc, Wc, C) or (B, M, C).
    """
    B, C = bb_cl.shape[0], bb_cl.shape[-1]
    n = 1
    for d in bb_cl.shape[1:-1]:
        n *= d
    m = 1
    for d in ctx_cl.shape[1:-1]:
        m *= d
    Q = params["psi_w2"].shape[0]
    weight_bytes = sum(int(params[k].size) * params[k].dtype.itemsize
                       for k in ("psi_w1", "psi_b1", "psi_w2", "psi_b2",
                                 "rho_b", "g_w_obj", "g_w_bb", "g_b"))
    tn, vlim = _plan_tile(n, B, C, Q, m, weight_bytes,
                          tile_n if tile_n is not None else 2048)
    out = _forward_impl(bb_cl.reshape(B, n, C), ctx_cl.reshape(B, m, C), params,
                        tile_n=tn, vmem_limit_bytes=vlim)
    return out.reshape(bb_cl.shape)


def spatial_ocr_forward(bb_feats, context, params, tile_n=None,
                        out_dtype=jnp.float32):
    """NCHW module-faithful wrapper: bb_feats (B,C,H,W), context (B,C,Hc,Wc).

    Casts to bf16 BEFORE the layout transposes to halve their HBM traffic.
    Prefer `spatial_ocr_forward_cl` to skip the transposes entirely.
    """
    bb_cl = jnp.transpose(bb_feats.astype(jnp.bfloat16), (0, 2, 3, 1))
    ctx_cl = jnp.transpose(context.astype(jnp.bfloat16), (0, 2, 3, 1))
    out_cl = spatial_ocr_forward_cl(bb_cl, ctx_cl, params, tile_n=tile_n)
    return jnp.transpose(out_cl, (0, 3, 1, 2)).astype(out_dtype)


# ----------------------------------------------------------------------------
# Independent reference: mirrors the PyTorch module structure directly from the
# per-conv (unfused) params — validates phi/delta stacking, the rho fold, the
# multiplicative sqrt(Q) logit scale of the spec, and the g channel split.
# ----------------------------------------------------------------------------
def spatial_ocr_reference(bb_feats, context, raw, ocr_qkv_ch):
    (psi_w1, psi_b1, psi_w2, psi_b2,
     phi_w1, phi_b1, phi_w2, phi_b2,
     del_w1, del_b1, del_w2, del_b2,
     rho_w, rho_b, g_w_obj, g_w_bb, g_b) = raw
    Q = ocr_qkv_ch
    B, C, H, W = bb_feats.shape
    _, _, Hc, Wc = context.shape
    N, M = H * W, Hc * Wc
    bf16 = jnp.bfloat16

    x = jnp.transpose(bb_feats, (0, 2, 3, 1)).reshape(B, N, C).astype(bf16)
    c = jnp.transpose(context, (0, 2, 3, 1)).reshape(B, M, C).astype(bf16)

    def cbr(a, w, b):
        y = jnp.dot(a.astype(bf16), w.astype(bf16),
                    preferred_element_type=jnp.float32) + b
        return jnp.maximum(y, 0.0)

    q = cbr(cbr(x, psi_w1, psi_b1), psi_w2, psi_b2)           # (B, N, Q)
    k = cbr(cbr(c, phi_w1, phi_b1), phi_w2, phi_b2)           # (B, M, Q)
    v = cbr(cbr(c, del_w1, del_b1), del_w2, del_b2)           # (B, M, Q)

    prr = jnp.einsum("bnq,bmq->bnm", q.astype(bf16), k.astype(bf16),
                     preferred_element_type=jnp.float32)
    prr = (float(Q) ** 0.5) * prr                             # spec: multiply
    soft = jax.nn.softmax(prr, axis=-1)
    obj = jnp.einsum("bnm,bmq->bnq", soft.astype(bf16), v.astype(bf16),
                     preferred_element_type=jnp.float32)

    r = cbr(obj, rho_w, rho_b)
    xo = jnp.concatenate([r.astype(bf16), x], axis=-1)
    g_w = jnp.concatenate([g_w_obj, g_w_bb], axis=0)
    aug = jnp.maximum(
        jnp.dot(xo, g_w.astype(bf16), preferred_element_type=jnp.float32) + g_b,
        0.0)
    return jnp.transpose(aug.reshape(B, H, W, C), (0, 3, 1, 2))


if __name__ == "__main__":
    # Small shapes consistent with the module (1x1 convs => any spatial size);
    # C = Q = 128 keeps every block lane-dense on TPU.
    num_classes = 16
    ocr_ch = 128
    ocr_qkv_ch = 128
    B, H, W = 2, 32, 32

    key = jax.random.PRNGKey(0)
    k_bb, k_ctx, k_params = jax.random.split(key, 3)
    bb_feats = jax.random.normal(k_bb, (B, ocr_ch, H, W), jnp.float32)
    # context: object-region features (one "pixel" per class region), NCHW.
    context = jax.random.normal(k_ctx, (B, ocr_ch, num_classes, 1), jnp.float32)

    raw = init_params(k_params, ocr_ch, ocr_qkv_ch)
    params = prepare_params(raw, ocr_qkv_ch)

    # Module-faithful NCHW path; tile_n=256 -> grid (B, 4) exercises tiling.
    out = spatial_ocr_forward(bb_feats, context, params, tile_n=256)
    out = jax.block_until_ready(out)
    assert out.shape == (B, ocr_ch, H, W), out.shape

    # Channels-last fast path (no wrapper transposes), default tiling.
    bb_cl = jnp.transpose(bb_feats.astype(jnp.bfloat16), (0, 2, 3, 1))
    ctx_cl = jnp.transpose(context.astype(jnp.bfloat16), (0, 2, 3, 1))
    out_cl = jax.block_until_ready(spatial_ocr_forward_cl(bb_cl, ctx_cl, params))
    assert out_cl.shape == (B, H, W, ocr_ch), out_cl.shape

    # Independent reference from the raw (unfused) per-conv params.
    ref = spatial_ocr_reference(bb_feats, context, raw, ocr_qkv_ch)
    err = float(jnp.max(jnp.abs(out.astype(jnp.float32) - ref)))
    assert jnp.allclose(out.astype(jnp.float32), ref, atol=3e-2, rtol=3e-2), err
    assert jnp.allclose(
        jnp.transpose(out_cl, (0, 3, 1, 2)).astype(jnp.float32), ref,
        atol=3e-2, rtol=3e-2)

    print("KERNEL_OK")
</pallas_src>

<mosaic_0001>
module attributes {stable_mosaic.version = 11 : i64} {
  func.func @_ocr_kernel(%arg0: i32, %arg1: i32, %arg2: memref<1x256x128xbf16, #tpu.memory_space<vmem>>, %arg3: memref<1x128x16xbf16, #tpu.memory_space<vmem>>, %arg4: memref<1x16x128xbf16, #tpu.memory_space<vmem>>, %arg5: memref<128x128xbf16, #tpu.memory_space<vmem>>, %arg6: memref<1x128xf32, #tpu.memory_space<vmem>>, %arg7: memref<128x128xbf16, #tpu.memory_space<vmem>>, %arg8: memref<1x128xf32, #tpu.memory_space<vmem>>, %arg9: memref<1x128xf32, #tpu.memory_space<vmem>>, %arg10: memref<128x128xbf16, #tpu.memory_space<vmem>>, %arg11: memref<128x128xbf16, #tpu.memory_space<vmem>>, %arg12: memref<1x128xf32, #tpu.memory_space<vmem>>, %arg13: memref<1x256x128xbf16, #tpu.memory_space<vmem>>) attributes {dimension_semantics = [#tpu.dimension_semantics<parallel>, #tpu.dimension_semantics<parallel>], iteration_bounds = array<i64: 2, 4>, scalar_prefetch = 0 : i64, scratch_operands = 0 : i64, tpu.core_type = #tpu.core_type<tc>, window_params = [{transform_indices = @transform_0, window_bounds = array<i64: 1, 256, 128>}, {transform_indices = @transform_1, window_bounds = array<i64: 1, 128, 16>}, {transform_indices = @transform_2, window_bounds = array<i64: 1, 16, 128>}, {pipeline_mode = #tpu.pipeline_mode<synchronous>, transform_indices = @transform_3, window_bounds = array<i64: 128, 128>}, {pipeline_mode = #tpu.pipeline_mode<synchronous>, transform_indices = @transform_4, window_bounds = array<i64: 1, 128>}, {pipeline_mode = #tpu.pipeline_mode<synchronous>, transform_indices = @transform_5, window_bounds = array<i64: 128, 128>}, {pipeline_mode = #tpu.pipeline_mode<synchronous>, transform_indices = @transform_6, window_bounds = array<i64: 1, 128>}, {pipeline_mode = #tpu.pipeline_mode<synchronous>, transform_indices = @transform_7, window_bounds = array<i64: 1, 128>}, {pipeline_mode = #tpu.pipeline_mode<synchronous>, transform_indices = @transform_8, window_bounds = array<i64: 128, 128>}, {pipeline_mode = #tpu.pipeline_mode<synchronous>, transform_indices = @transform_9, window_bounds = array<i64: 128, 128>}, {pipeline_mode = #tpu.pipeline_mode<synchronous>, transform_indices = @transform_10, window_bounds = array<i64: 1, 128>}, {transform_indices = @transform_11, window_bounds = array<i64: 1, 256, 128>}]} {
    %c0 = arith.constant 0 : index
    %c0_0 = arith.constant 0 : index
    %c0_1 = arith.constant 0 : index
    %0 = vector.load %arg2[%c0, %c0_0, %c0_1] : memref<1x256x128xbf16, #tpu.memory_space<vmem>>, vector<1x256x128xbf16>
    %1 = vector.shape_cast %0 : vector<1x256x128xbf16> to vector<256x128xbf16>
    %c0_2 = arith.constant 0 : index
    %c0_3 = arith.constant 0 : index
    %c0_4 = arith.constant 0 : index
    %2 = vector.load %arg3[%c0_2, %c0_3, %c0_4] : memref<1x128x16xbf16, #tpu.memory_space<vmem>>, vector<1x128x16xbf16>
    %3 = vector.shape_cast %2 : vector<1x128x16xbf16> to vector<128x16xbf16>
    %c0_5 = arith.constant 0 : index
    %c0_6 = arith.constant 0 : index
    %c0_7 = arith.constant 0 : index
    %4 = vector.load %arg4[%c0_5, %c0_6, %c0_7] : memref<1x16x128xbf16, #tpu.memory_space<vmem>>, vector<1x16x128xbf16>
    %5 = vector.shape_cast %4 : vector<1x16x128xbf16> to vector<16x128xbf16>
    %c0_8 = arith.constant 0 : index
    %c0_9 = arith.constant 0 : index
    %6 = vector.load %arg5[%c0_8, %c0_9] : memref<128x128xbf16, #tpu.memory_space<vmem>>, vector<128x128xbf16>
    %cst = arith.constant dense<0.000000e+00> : vector<256x128xf32>
    %7 = tpu.matmul %1, %6, %cst {dimension_numbers = #tpu.dot_dimension_numbers<[1], [0], [0], [1], [0, 0, 1, 1], [], []>} : vector<256x128xbf16>, vector<128x128xbf16>, vector<256x128xf32> -> vector<256x128xf32>
    %c0_10 = arith.constant 0 : index
    %c0_11 = arith.constant 0 : index
    %8 = vector.load %arg6[%c0_10, %c0_11] : memref<1x128xf32, #tpu.memory_space<vmem>>, vector<1x128xf32>
    %9 = vector.broadcast %8 : vector<1x128xf32> to vector<256x128xf32>
    %10 = arith.addf %7, %9 : vector<256x128xf32>
    %cst_12 = arith.constant 0.000000e+00 : f32
    %11 = vector.broadcast %cst_12 : f32 to vector<256x128xf32>
    %12 = arith.maximumf %10, %11 : vector<256x128xf32>
    %13 = arith.truncf %12 : vector<256x128xf32> to vector<256x128xbf16>
    %c0_13 = arith.constant 0 : index
    %c0_14 = arith.constant 0 : index
    %14 = vector.load %arg7[%c0_13, %c0_14] : memref<128x128xbf16, #tpu.memory_space<vmem>>, vector<128x128xbf16>
    %cst_15 = arith.constant dense<0.000000e+00> : vector<256x128xf32>
    %15 = tpu.matmul %13, %14, %cst_15 {dimension_numbers = #tpu.dot_dimension_numbers<[1], [0], [0], [1], [0, 0, 1, 1], [], []>} : vector<256x128xbf16>, vector<128x128xbf16>, vector<256x128xf32> -> vector<256x128xf32>
    %c0_16 = arith.constant 0 : index
    %c0_17 = arith.constant 0 : index
    %16 = vector.load %arg8[%c0_16, %c0_17] : memref<1x128xf32, #tpu.memory_space<vmem>>, vector<1x128xf32>
    %17 = vector.broadcast %16 : vector<1x128xf32> to vector<256x128xf32>
    %18 = arith.addf %15, %17 : vector<256x128xf32>
    %cst_18 = arith.constant 0.000000e+00 : f32
    %19 = vector.broadcast %cst_18 : f32 to vector<256x128xf32>
    %20 = arith.maximumf %18, %19 : vector<256x128xf32>
    %21 = arith.truncf %20 : vector<256x128xf32> to vector<256x128xbf16>
    %cst_19 = arith.constant dense<0.000000e+00> : vector<256x16xf32>
    %22 = tpu.matmul %21, %3, %cst_19 {dimension_numbers = #tpu.dot_dimension_numbers<[1], [0], [0], [1], [0, 0, 1, 1], [], []>} : vector<256x128xbf16>, vector<128x16xbf16>, vector<256x16xf32> -> vector<256x16xf32>
    %cst_20 = arith.constant 11.3137083 : f32
    %23 = vector.broadcast %cst_20 : f32 to vector<256x16xf32>
    %24 = arith.mulf %22, %23 : vector<256x16xf32>
    %cst_21 = arith.constant dense<0xFF800000> : vector<256xf32>
    %25 = vector.multi_reduction <maximumf>, %24, %cst_21 [1] : vector<256x16xf32> to vector<256xf32>
    %26 = vector.shape_cast %25 : vector<256xf32> to vector<256x1xf32>
    %27 = vector.broadcast %26 : vector<256x1xf32> to vector<256x16xf32>
    %28 = arith.subf %24, %27 : vector<256x16xf32>
    %29 = math.exp %28 : vector<256x16xf32>
    %cst_22 = arith.constant dense<0.000000e+00> : vector<256xf32>
    %30 = vector.multi_reduction <add>, %29, %cst_22 [1] : vector<256x16xf32> to vector<256xf32>
    %31 = vector.shape_cast %30 : vector<256xf32> to vector<256x1xf32>
    %32 = tpu.reciprocal %31 {approx = true} : vector<256x1xf32> -> vector<256x1xf32>
    %33 = vector.broadcast %32 : vector<256x1xf32> to vector<256x16xf32>
    %34 = arith.mulf %29, %33 : vector<256x16xf32>
    %35 = arith.truncf %34 : vector<256x16xf32> to vector<256x16xbf16>
    %cst_23 = arith.constant dense<0.000000e+00> : vector<256x128xf32>
    %36 = tpu.matmul %35, %5, %cst_23 {dimension_numbers = #tpu.dot_dimension_numbers<[1], [0], [0], [1], [0, 0, 1, 1], [], []>} : vector<256x16xbf16>, vector<16x128xbf16>, vector<256x128xf32> -> vector<256x128xf32>
    %c0_24 = arith.constant 0 : index
    %c0_25 = arith.constant 0 : index
    %37 = vector.load %arg9[%c0_24, %c0_25] : memref<1x128xf32, #tpu.memory_space<vmem>>, vector<1x128xf32>
    %38 = vector.broadcast %37 : vector<1x128xf32> to vector<256x128xf32>
    %39 = arith.addf %36, %38 : vector<256x128xf32>
    %cst_26 = arith.constant 0.000000e+00 : f32
    %40 = vector.broadcast %cst_26 : f32 to vector<256x128xf32>
    %41 = arith.maximumf %39, %40 : vector<256x128xf32>
    %42 = arith.truncf %41 : vector<256x128xf32> to vector<256x128xbf16>
    %c0_27 = arith.constant 0 : index
    %c0_28 = arith.constant 0 : index
    %43 = vector.load %arg10[%c0_27, %c0_28] : memref<128x128xbf16, #tpu.memory_space<vmem>>, vector<128x128xbf16>
    %cst_29 = arith.constant dense<0.000000e+00> : vector<256x128xf32>
    %44 = tpu.matmul %42, %43, %cst_29 {dimension_numbers = #tpu.dot_dimension_numbers<[1], [0], [0], [1], [0, 0, 1, 1], [], []>} : vector<256x128xbf16>, vector<128x128xbf16>, vector<256x128xf32> -> vector<256x128xf32>
    %c0_30 = arith.constant 0 : index
    %c0_31 = arith.constant 0 : index
    %45 = vector.load %arg11[%c0_30, %c0_31] : memref<128x128xbf16, #tpu.memory_space<vmem>>, vector<128x128xbf16>
    %cst_32 = arith.constant dense<0.000000e+00> : vector<256x128xf32>
    %46 = tpu.matmul %1, %45, %cst_32 {dimension_numbers = #tpu.dot_dimension_numbers<[1], [0], [0], [1], [0, 0, 1, 1], [], []>} : vector<256x128xbf16>, vector<128x128xbf16>, vector<256x128xf32> -> vector<256x128xf32>
    %47 = arith.addf %44, %46 : vector<256x128xf32>
    %c0_33 = arith.constant 0 : index
    %c0_34 = arith.constant 0 : index
    %48 = vector.load %arg12[%c0_33, %c0_34] : memref<1x128xf32, #tpu.memory_space<vmem>>, vector<1x128xf32>
    %49 = vector.broadcast %48 : vector<1x128xf32> to vector<256x128xf32>
    %50 = arith.addf %47, %49 : vector<256x128xf32>
    %cst_35 = arith.constant 0.000000e+00 : f32
    %51 = vector.broadcast %cst_35 : f32 to vector<256x128xf32>
    %52 = arith.maximumf %50, %51 : vector<256x128xf32>
    %53 = arith.truncf %52 : vector<256x128xf32> to vector<256x128xbf16>
    %c0_36 = arith.constant 0 : index
    %c0_37 = arith.constant 0 : index
    %c0_38 = arith.constant 0 : index
    %54 = vector.load %arg13[%c0_36, %c0_37, %c0_38] : memref<1x256x128xbf16, #tpu.memory_space<vmem>>, vector<1x256x128xbf16>
    %55 = vector.shape_cast %54 : vector<1x256x128xbf16> to vector<256x128xbf16>
    %56 = vector.shape_cast %53 : vector<256x128xbf16> to vector<1x256x128xbf16>
    tpu.vector_store %arg13[%c0_36, %c0_37, %c0_38], %56 {strides = array<i32>} : memref<1x256x128xbf16, #tpu.memory_space<vmem>>, vector<1x256x128xbf16>,
    return
  }
  func.func @transform_0(%arg0: i32, %arg1: i32) -> (i32, i32, i32) {
    %c0_i32 = arith.constant 0 : i32
    %c0_i32_0 = arith.constant 0 : i32
    return %arg0, %arg1, %c0_i32 : i32, i32, i32
  }
  func.func @transform_1(%arg0: i32, %arg1: i32) -> (i32, i32, i32) {
    %c0_i32 = arith.constant 0 : i32
    %c0_i32_0 = arith.constant 0 : i32
    %c0_i32_1 = arith.constant 0 : i32
    return %arg0, %c0_i32, %c0_i32_0 : i32, i32, i32
  }
  func.func @transform_2(%arg0: i32, %arg1: i32) -> (i32, i32, i32) {
    %c0_i32 = arith.constant 0 : i32
    %c0_i32_0 = arith.constant 0 : i32
    %c0_i32_1 = arith.constant 0 : i32
    return %arg0, %c0_i32, %c0_i32_0 : i32, i32, i32
  }
  func.func @transform_3(%arg0: i32, %arg1: i32) -> (i32, i32) {
    %c0_i32 = arith.constant 0 : i32
    %c0_i32_0 = arith.constant 0 : i32
    %c0_i32_1 = arith.constant 0 : i32
    return %c0_i32, %c0_i32_0 : i32, i32
  }
  func.func @transform_4(%arg0: i32, %arg1: i32) -> (i32, i32) {
    %c0_i32 = arith.constant 0 : i32
    %c0_i32_0 = arith.constant 0 : i32
    %c0_i32_1 = arith.constant 0 : i32
    return %c0_i32, %c0_i32_0 : i32, i32
  }
  func.func @transform_5(%arg0: i32, %arg1: i32) -> (i32, i32) {
    %c0_i32 = arith.constant 0 : i32
    %c0_i32_0 = arith.constant 0 : i32
    %c0_i32_1 = arith.constant 0 : i32
    return %c0_i32, %c0_i32_0 : i32, i32
  }
  func.func @transform_6(%arg0: i32, %arg1: i32) -> (i32, i32) {
    %c0_i32 = arith.constant 0 : i32
    %c0_i32_0 = arith.constant 0 : i32
    %c0_i32_1 = arith.constant 0 : i32
    return %c0_i32, %c0_i32_0 : i32, i32
  }
  func.func @transform_7(%arg0: i32, %arg1: i32) -> (i32, i32) {
    %c0_i32 = arith.constant 0 : i32
    %c0_i32_0 = arith.constant 0 : i32
    %c0_i32_1 = arith.constant 0 : i32
    return %c0_i32, %c0_i32_0 : i32, i32
  }
  func.func @transform_8(%arg0: i32, %arg1: i32) -> (i32, i32) {
    %c0_i32 = arith.constant 0 : i32
    %c0_i32_0 = arith.constant 0 : i32
    %c0_i32_1 = arith.constant 0 : i32
    return %c0_i32, %c0_i32_0 : i32, i32
  }
  func.func @transform_9(%arg0: i32, %arg1: i32) -> (i32, i32) {
    %c0_i32 = arith.constant 0 : i32
    %c0_i32_0 = arith.constant 0 : i32
    %c0_i32_1 = arith.constant 0 : i32
    return %c0_i32, %c0_i32_0 : i32, i32
  }
  func.func @transform_10(%arg0: i32, %arg1: i32) -> (i32, i32) {
    %c0_i32 = arith.constant 0 : i32
    %c0_i32_0 = arith.constant 0 : i32
    %c0_i32_1 = arith.constant 0 : i32
    return %c0_i32, %c0_i32_0 : i32, i32
  }
  func.func @transform_11(%arg0: i32, %arg1: i32) -> (i32, i32, i32) {
    %c0_i32 = arith.constant 0 : i32
    %c0_i32_0 = arith.constant 0 : i32
    return %arg0, %arg1, %c0_i32 : i32, i32, i32
  }
}

module attributes {stable_mosaic.version = 11 : i64} {
  func.func @_kv_kernel(%arg0: i32, %arg1: memref<1x16x128xbf16, #tpu.memory_space<vmem>>, %arg2: memref<128x256xbf16, #tpu.memory_space<vmem>>, %arg3: memref<1x256xf32, #tpu.memory_space<vmem>>, %arg4: memref<256x256xbf16, #tpu.memory_space<vmem>>, %arg5: memref<1x256xf32, #tpu.memory_space<vmem>>, %arg6: memref<128x128xbf16, #tpu.memory_space<vmem>>, %arg7: memref<1x16x128xbf16, #tpu.memory_space<vmem>>, %arg8: memref<1x16x128xbf16, #tpu.memory_space<vmem>>) attributes {dimension_semantics = [#tpu.dimension_semantics<parallel>], iteration_bounds = array<i64: 2>, scalar_prefetch = 0 : i64, scratch_operands = 0 : i64, tpu.core_type = #tpu.core_type<tc>, window_params = [{transform_indices = @transform_0, window_bounds = array<i64: 1, 16, 128>}, {pipeline_mode = #tpu.pipeline_mode<synchronous>, transform_indices = @transform_1, window_bounds = array<i64: 128, 256>}, {pipeline_mode = #tpu.pipeline_mode<synchronous>, transform_indices = @transform_2, window_bounds = array<i64: 1, 256>}, {pipeline_mode = #tpu.pipeline_mode<synchronous>, transform_indices = @transform_3, window_bounds = array<i64: 256, 256>}, {pipeline_mode = #tpu.pipeline_mode<synchronous>, transform_indices = @transform_4, window_bounds = array<i64: 1, 256>}, {pipeline_mode = #tpu.pipeline_mode<synchronous>, transform_indices = @transform_5, window_bounds = array<i64: 128, 128>}, {transform_indices = @transform_6, window_bounds = array<i64: 1, 16, 128>}, {transform_indices = @transform_7, window_bounds = array<i64: 1, 16, 128>}]} {
    %c0 = arith.constant 0 : index
    %c0_0 = arith.constant 0 : index
    %c0_1 = arith.constant 0 : index
    %0 = vector.load %arg1[%c0, %c0_0, %c0_1] : memref<1x16x128xbf16, #tpu.memory_space<vmem>>, vector<1x16x128xbf16>
    %1 = vector.shape_cast %0 : vector<1x16x128xbf16> to vector<16x128xbf16>
    %c0_2 = arith.constant 0 : index
    %c0_3 = arith.constant 0 : index
    %2 = vector.load %arg2[%c0_2, %c0_3] : memref<128x256xbf16, #tpu.memory_space<vmem>>, vector<128x256xbf16>
    %cst = arith.constant dense<0.000000e+00> : vector<16x256xf32>
    %3 = tpu.matmul %1, %2, %cst {dimension_numbers = #tpu.dot_dimension_numbers<[1], [0], [0], [1], [0, 0, 1, 1], [], []>} : vector<16x128xbf16>, vector<128x256xbf16>, vector<16x256xf32> -> vector<16x256xf32>
    %c0_4 = arith.constant 0 : index
    %c0_5 = arith.constant 0 : index
    %4 = vector.load %arg3[%c0_4, %c0_5] : memref<1x256xf32, #tpu.memory_space<vmem>>, vector<1x256xf32>
    %5 = vector.broadcast %4 : vector<1x256xf32> to vector<16x256xf32>
    %6 = arith.addf %3, %5 : vector<16x256xf32>
    %cst_6 = arith.constant 0.000000e+00 : f32
    %7 = vector.broadcast %cst_6 : f32 to vector<16x256xf32>
    %8 = arith.maximumf %6, %7 : vector<16x256xf32>
    %9 = arith.truncf %8 : vector<16x256xf32> to vector<16x256xbf16>
    %c0_7 = arith.constant 0 : index
    %c0_8 = arith.constant 0 : index
    %10 = vector.load %arg4[%c0_7, %c0_8] : memref<256x256xbf16, #tpu.memory_space<vmem>>, vector<256x256xbf16>
    %cst_9 = arith.constant dense<0.000000e+00> : vector<16x256xf32>
    %11 = tpu.matmul %9, %10, %cst_9 {dimension_numbers = #tpu.dot_dimension_numbers<[1], [0], [0], [1], [0, 0, 1, 1], [], []>} : vector<16x256xbf16>, vector<256x256xbf16>, vector<16x256xf32> -> vector<16x256xf32>
    %c0_10 = arith.constant 0 : index
    %c0_11 = arith.constant 0 : index
    %12 = vector.load %arg5[%c0_10, %c0_11] : memref<1x256xf32, #tpu.memory_space<vmem>>, vector<1x256xf32>
    %13 = vector.broadcast %12 : vector<1x256xf32> to vector<16x256xf32>
    %14 = arith.addf %11, %13 : vector<16x256xf32>
    %cst_12 = arith.constant 0.000000e+00 : f32
    %15 = vector.broadcast %cst_12 : f32 to vector<16x256xf32>
    %16 = arith.maximumf %14, %15 : vector<16x256xf32>
    %17 = vector.extract_strided_slice %16 {offsets = [0, 0], sizes = [16, 128], strides = [1, 1]} : vector<16x256xf32> to vector<16x128xf32>
    %18 = arith.truncf %17 : vector<16x128xf32> to vector<16x128xbf16>
    %c0_13 = arith.constant 0 : index
    %c0_14 = arith.constant 0 : index
    %c0_15 = arith.constant 0 : index
    %19 = vector.load %arg7[%c0_13, %c0_14, %c0_15] : memref<1x16x128xbf16, #tpu.memory_space<vmem>>, vector<1x16x128xbf16>
    %20 = vector.shape_cast %19 : vector<1x16x128xbf16> to vector<16x128xbf16>
    %21 = vector.shape_cast %18 : vector<16x128xbf16> to vector<1x16x128xbf16>
    tpu.vector_store %arg7[%c0_13, %c0_14, %c0_15], %21 {strides = array<i32>} : memref<1x16x128xbf16, #tpu.memory_space<vmem>>, vector<1x16x128xbf16>,
    %22 = vector.extract_strided_slice %16 {offsets = [0, 128], sizes = [16, 128], strides = [1, 1]} : vector<16x256xf32> to vector<16x128xf32>
    %23 = arith.truncf %22 : vector<16x128xf32> to vector<16x128xbf16>
    %c0_16 = arith.constant 0 : index
    %c0_17 = arith.constant 0 : index
    %24 = vector.load %arg6[%c0_16, %c0_17] : memref<128x128xbf16, #tpu.memory_space<vmem>>, vector<128x128xbf16>
    %cst_18 = arith.constant dense<0.000000e+00> : vector<16x128xf32>
    %25 = tpu.matmul %23, %24, %cst_18 {dimension_numbers = #tpu.dot_dimension_numbers<[1], [0], [0], [1], [0, 0, 1, 1], [], []>} : vector<16x128xbf16>, vector<128x128xbf16>, vector<16x128xf32> -> vector<16x128xf32>
    %26 = arith.truncf %25 : vector<16x128xf32> to vector<16x128xbf16>
    %c0_19 = arith.constant 0 : index
    %c0_20 = arith.constant 0 : index
    %c0_21 = arith.constant 0 : index
    %27 = vector.load %arg8[%c0_19, %c0_20, %c0_21] : memref<1x16x128xbf16, #tpu.memory_space<vmem>>, vector<1x16x128xbf16>
    %28 = vector.shape_cast %27 : vector<1x16x128xbf16> to vector<16x128xbf16>
    %29 = vector.shape_cast %26 : vector<16x128xbf16> to vector<1x16x128xbf16>
    tpu.vector_store %arg8[%c0_19, %c0_20, %c0_21], %29 {strides = array<i32>} : memref<1x16x128xbf16, #tpu.memory_space<vmem>>, vector<1x16x128xbf16>,
    return
  }
  func.func @transform_0(%arg0: i32) -> (i32, i32, i32) {
    %c0_i32 = arith.constant 0 : i32
    %c0_i32_0 = arith.constant 0 : i32
    %c0_i32_1 = arith.constant 0 : i32
    return %arg0, %c0_i32, %c0_i32_0 : i32, i32, i32
  }
  func.func @transform_1(%arg0: i32) -> (i32, i32) {
    %c0_i32 = arith.constant 0 : i32
    %c0_i32_0 = arith.constant 0 : i32
    %c0_i32_1 = arith.constant 0 : i32
    return %c0_i32, %c0_i32_0 : i32, i32
  }
  func.func @transform_2(%arg0: i32) -> (i32, i32) {
    %c0_i32 = arith.constant 0 : i32
    %c0_i32_0 = arith.constant 0 : i32
    %c0_i32_1 = arith.constant 0 : i32
    return %c0_i32, %c0_i32_0 : i32, i32
  }
  func.func @transform_3(%arg0: i32) -> (i32, i32) {
    %c0_i32 = arith.constant 0 : i32
    %c0_i32_0 = arith.constant 0 : i32
    %c0_i32_1 = arith.constant 0 : i32
    return %c0_i32, %c0_i32_0 : i32, i32
  }
  func.func @transform_4(%arg0: i32) -> (i32, i32) {
    %c0_i32 = arith.constant 0 : i32
    %c0_i32_0 = arith.constant 0 : i32
    %c0_i32_1 = arith.constant 0 : i32
    return %c0_i32, %c0_i32_0 : i32, i32
  }
  func.func @transform_5(%arg0: i32) -> (i32, i32) {
    %c0_i32 = arith.constant 0 : i32
    %c0_i32_0 = arith.constant 0 : i32
    %c0_i32_1 = arith.constant 0 : i32
    return %c0_i32, %c0_i32_0 : i32, i32
  }
  func.func @transform_6(%arg0: i32) -> (i32, i32, i32) {
    %c0_i32 = arith.constant 0 : i32
    %c0_i32_0 = arith.constant 0 : i32
    %c0_i32_1 = arith.constant 0 : i32
    return %arg0, %c0_i32, %c0_i32_0 : i32, i32, i32
  }
  func.func @transform_7(%arg0: i32) -> (i32, i32, i32) {
    %c0_i32 = arith.constant 0 : i32
    %c0_i32_0 = arith.constant 0 : i32
    %c0_i32_1 = arith.constant 0 : i32
    return %arg0, %c0_i32, %c0_i32_0 : i32, i32, i32
  }
}

</mosaic_0001>

<bundles_post_ra>
// kernel: _forward_impl.2
= control target key start
LH: loop header
LB: loop body
LE: loop exit
PB: predicated region body
PF: predicated region fallthrough
CT: control target
= control target key end

     0   :  { %13 = vsyncpa [#allocation3], 0  ;;  %s1749_s0 = inlined_call_operand.hbm [shape: bf16[2,16,128], index: 0, kind: input, shape index: {}]   ;;  %s1750_s1 = inlined_call_operand.hbm [shape: bf16[128,256], index: 1, kind: input, shape index: {}]   ;;  %s1751_s2 = inlined_call_operand.vmem [shape: f32[1,256], index: 2, kind: input, shape index: {}]   ;;  %s1752_s3 = inlined_call_operand.hbm [shape: bf16[256,256], index: 3, kind: input, shape index: {}]   ;;  %s1753_s4 = inlined_call_operand.vmem [shape: f32[1,256], index: 4, kind: input, shape index: {}]   ;;  %s1754_s5 = inlined_call_operand.hbm [shape: bf16[128,128], index: 5, kind: input, shape index: {}]   ;;  %s1755_s6 = inlined_call_operand.vmem [shape: bf16[2,16,128], index: 6, kind: output, shape index: {0}]   ;;  %s1756_s7 = inlined_call_operand.vmem [shape: bf16[2,16,128], index: 7, kind: output, shape index: {1}]  }
   0x1   :  { %15 = vsyncpa [#allocation3 + $0x1], 0 }
   0x2   :  { %16 = vsyncpa [#allocation5], 0 }
   0x3   :  { %17 = vsyncpa [#allocation8], 0  ;;  %s1522_s24 = smov 0   ;;  %s1524_s25 = smov 0  }
   0x4   :  { %s1526_s26 = smov 0   ;;  %s1528_s27 = smov 0  }
   0x5 LB: > { %s1541_s28 = sadd.s32 4294967295, %s1469_s27   ;;  %p43_p0 = scmp.ne.s32.totalorder %s1461_s25, %s1457_s24  ;;  %s1469_s27 = sphi %s1528_s27, %s1774_s27   ;;  %s1465_s26 = sphi %s1526_s26, %s1773_s26   ;;  %s1461_s25 = sphi %s1524_s25, %s1772_s25   ;;  %s1457_s24 = sphi %s1522_s24, %s1771_s24  }
   0x6   : > { %p1757_p1 = scmp.eq.s32.totalorder %s1541_s28, 0  ;;  %p1029_p2 = scmp.ge.s32.totalorder %s1469_s27, 1 }
   0x7   : > { %p211_p3 = scmp.lt.s32.totalorder %s1469_s27, 3  ;;  %s1471_s8 = smov [#allocation4]  }
   0x8   : > { %p1549_p4 = por %p1757_p1, %p43_p0  ;;  %s223_s9 = sshll.u32 %s1471_s8, 4  ;;  %s1557_s9 = int_to_ptr.vmem [resolvable:$true] %s223_s9 }
   0x9   : > { %p1553_p5 = pnand %p1029_p2, %p211_p3  ;;  %s1472_s11 = smov [#allocation6]  }
   0xa   : > { %s1760_s29 = scalar_select %p1549_p4, 1, 0 }
   0xb   : > { %s1761_s30 = scalar_select %p1553_p5, 1, 0 }
   0xc   : > { %p1169_p6 = pneg %p1553_p5  ;;  %s239_s12 = sshll.u32 %s1472_s11, 4  ;;  %s1567_s12 = int_to_ptr.vmem [resolvable:$true] %s239_s12 }
   0xd   : > { %s1473_s13 = smov [#allocation7]   ;;  %s1313_s17 = scalar_lea.hbm %s1750_s1, 2048 }
   0xe   : > { %p1563_p7 = pnand %p1169_p6, %p1757_p1  ;;  %s1569_s14 = sshll.u32 %s1473_s13, 4  ;;  %s256_s14 = int_to_ptr.vmem [resolvable:$true] %s1569_s14 }
   0xf   : > { %p1314_p8 = scmp.ne.s32.totalorder %s1750_s1, %s1313_s17  ;;  %p1320_p12 = scmp.lt.u32.totalorder %s1313_s17, %s1750_s1 }
  0x10   : > { %p1579_p9 = pneg %p1563_p7 }
  0x12   : > { %p1316_p10 = pnand %p1579_p9, %p1314_p8 }
  0x14   : > { %p1317_p11 = pneg %p1316_p10 }
  0x16   : > { %p1322_p13 = pnand %p1320_p12, %p1317_p11 }
  0x18   : > { %1325 = shalt.err (!%p1322_p13)
}
  0x19   : > { %s1326_s23 = scalar_lea.vmem %s1557_s9, 2048  ;;  %p1334_p6 = scmp.lt.s32.totalorder %s1557_s9, %s1557_s9 }
  0x1a   : > { %p1327_p0 = scmp.ne.s32.totalorder %s1557_s9, %s1326_s23  ;;  %p1335_p1 = scmp.lt.s32.totalorder %s1326_s23, %s1326_s23 }
  0x1c   : > { %p1329_p2 = pnand %p1327_p0, %p1579_p9  ;;  %p1336_p8 = por %p1335_p1, %p1334_p6 }
  0x1e   : > { %p1330_p3 = pneg %p1329_p2 }
  0x20   : > { %p1337_p10 = pnand %p1336_p8, %p1330_p3 }
  0x22   : > { %1340 = shalt.err (!%p1337_p10)
}
  0x23   : > { %s1474_s24 = smov 128   ;;  %s1475_s8 = smov 8  }
  0x24   : > { %1172 = dma.hbm_to_vmem [thread:$0]  (!%p1563_p7), %s1750_s1, 2048, %s1557_s9, [#allocation5], %s1474_s24, %s1474_s24, %s1475_s8  }
  0x25   : > { %s1341_s17 = scalar_lea.hbm %s1752_s3, 4096 }
  0x26   : > { %p1342_p1 = scmp.ne.s32.totalorder %s1752_s3, %s1341_s17  ;;  %p1348_p13 = scmp.lt.u32.totalorder %s1341_s17, %s1752_s3 }
  0x28   : > { %p1344_p11 = pnand %p1342_p1, %p1579_p9 }
  0x2a   : > { %p1345_p12 = pneg %p1344_p11 }
  0x2c   : > { %p1350_p0 = pnand %p1348_p13, %p1345_p12 }
  0x2e   : > { %1353 = shalt.err (!%p1350_p0)
}
  0x2f   : > { %s1354_s9 = scalar_lea.vmem %s1567_s12, 4096  ;;  %p1362_p8 = scmp.lt.s32.totalorder %s1567_s12, %s1567_s12 }
  0x30   : > { %p1355_p2 = scmp.ne.s32.totalorder %s1567_s12, %s1354_s9  ;;  %p1363_p10 = scmp.lt.s32.totalorder %s1354_s9, %s1354_s9 }
  0x32   : > { %p1357_p3 = pnand %p1355_p2, %p1579_p9  ;;  %p1364_p1 = por %p1363_p10, %p1362_p8 }
  0x34   : > { %p1358_p6 = pneg %p1357_p3 }
  0x36   : > { %p1365_p11 = pnand %p1364_p1, %p1358_p6 }
  0x38   : > { %1368 = shalt.err (!%p1365_p11)
}
  0x39   : > { %1175 = dma.hbm_to_vmem [thread:$0]  (!%p1563_p7), %s1752_s3, 4096, %s1567_s12, [#allocation5], %s1474_s24, %s1474_s24, %s1475_s8  }
  0x3a   : > { %s1369_s16 = scalar_lea.hbm %s1754_s5, 1024 }
  0x3b   : > { %p1370_p12 = scmp.ne.s32.totalorder %s1754_s5, %s1369_s16  ;;  %p1376_p2 = scmp.lt.u32.totalorder %s1369_s16, %s1754_s5 }
  0x3d   : > { %p1372_p13 = pnand %p1370_p12, %p1579_p9 }
  0x3f   : > { %p1373_p0 = pneg %p1372_p13 }
  0x41   : > { %p1378_p3 = pnand %p1376_p2, %p1373_p0 }
  0x43   : > { %1381 = shalt.err (!%p1378_p3)
}
  0x44   : > { %s1382_s22 = scalar_lea.vmem %s256_s14, 1024  ;;  %p1390_p1 = scmp.lt.s32.totalorder %s256_s14, %s256_s14 }
  0x45   : > { %p1383_p6 = scmp.ne.s32.totalorder %s256_s14, %s1382_s22  ;;  %p1391_p11 = scmp.lt.s32.totalorder %s1382_s22, %s1382_s22 }
  0x47   : > { %p1385_p8 = pnand %p1383_p6, %p1579_p9  ;;  %p1392_p4 = por %p1391_p11, %p1390_p1 }
  0x49   : > { %p1386_p10 = pneg %p1385_p8 }
  0x4b   : > { %p1393_p5 = pnand %p1392_p4, %p1386_p10 }
  0x4d   : > { %1396 = shalt.err (!%p1393_p5)
}
  0x4e   : > { %s1476_s12 = smov 64   ;;  %s1477_s20 = smov 4  }
  0x4f   : > { %1178 = dma.hbm_to_vmem [thread:$0]  (!%p1563_p7), %s1754_s5, 1024, %s256_s14, [#allocation8], %s1476_s12, %s1476_s12, %s1477_s20  }
  0x50   : > { %s1646_s9 = sadd.s32 1, %s1469_s27   ;;  %s30_s11 = sadd.s32 1, %s1465_s26 }
  0x51   : > { %s27_s23 = ssub.s32 %s1469_s27, %s1646_s9  ;;  %p37_p5 = scmp.ne.s32.totalorder %s1465_s26, %s1461_s25 }
  0x52   : > { %p28_p4 = scmp.eq.s32.totalorder %s27_s23, 0  ;;  %p38_p9 = scmp.eq.s32.totalorder %s1469_s27, 0 }
  0x53   : > { %p1186_p12 = scmp.lt.s32.totalorder %s1469_s27, 2  ;;  %s269_s10 = sand.u32 1, %s1465_s26  }
  0x54   : > { %s1656_s13 = scalar_select %p28_p4, %s1465_s26, %s30_s11  }
  0x55   : > { %p39_p13 = por %p38_p9, %p37_p5  ;;  %s1034_s15 = sshll.u32 %s269_s10, 3 }
  0x56   : > { %s1109_s16 = sshll.u32 %s1469_s27, 7  ;;  %s273_s14 = scalar_lea.vmem [#allocation2], %s1034_s15 }
  0x57   : > { %s1663_s19 = scalar_lea.hbm %s1749_s0, %s1109_s16  ;;  %s280_s21 = sshll.u32 %s273_s14, 4  ;;  %s1665_s21 = int_to_ptr.vmem [resolvable:$true] %s280_s21 }
  0x58   : > { %p1667_p7 = pnand %p1186_p12, %p39_p13  ;;  %s1671_s27 = scalar_lea.sflag [#allocation3], %s269_s10 }
  0x59   : > { %s1397_s24 = scalar_lea.hbm %s1663_s19, 128  ;;  %s1402_s11 = scalar_lea.hbm %s1749_s0, 256 }
  0x5a   : > { %p1398_p0 = scmp.ne.s32.totalorder %s1663_s19, %s1397_s24  ;;  %p1399_p2 = pneg %p1667_p7 }
  0x5b   : > { %p1403_p8 = scmp.lt.u32.totalorder %s1663_s19, %s1749_s0  ;;  %p1404_p10 = scmp.lt.u32.totalorder %s1402_s11, %s1397_s24 }
  0x5c   : > { %p1400_p3 = pnand %p1399_p2, %p1398_p0  ;;  %p1406_p11 = scmp.lt.u32.totalorder %s1397_s24, %s1663_s19 }
  0x5d   : > { %p1405_p1 = por %p1404_p10, %p1403_p8 }
  0x5e   : > { %p1401_p6 = pneg %p1400_p3 }
  0x5f   : > { %p1407_p4 = por %p1406_p11, %p1405_p1 }
  0x61   : > { %p1408_p5 = pnand %p1407_p4, %p1401_p6 }
  0x63   : > { %1411 = shalt.err (!%p1408_p5)
}
  0x64   : > { %s1412_s10 = scalar_lea.vmem %s1665_s21, 128  ;;  %s1478_s17 = smov [#allocation2]  }
  0x65   : > { %p1413_p9 = scmp.ne.s32.totalorder %s1665_s21, %s1412_s10  ;;  %s1417_s18 = sshll.u32 %s1478_s17, 4  ;;  %s1418_s18 = int_to_ptr.vmem [resolvable:$false] %s1417_s18 }
  0x66   : > { %s1419_s14 = scalar_lea.vmem %s1418_s18, 256  ;;  %p1420_p0 = scmp.lt.s32.totalorder %s1665_s21, %s1418_s18 }
  0x67   : > { %p1415_p12 = pnand %p1413_p9, %p1399_p2  ;;  %p1421_p3 = scmp.lt.s32.totalorder %s1419_s14, %s1412_s10 }
  0x69   : > { %p1416_p13 = pneg %p1415_p12  ;;  %p1422_p8 = por %p1421_p3, %p1420_p0 }
  0x6b   : > { %p1423_p10 = pnand %p1422_p8, %p1416_p13 }
  0x6d   : > { %1426 = shalt.err (!%p1423_p10)
}
  0x6e   : > { %1182 = dma.hbm_to_vmem [thread:$0]  (!%p1667_p7), %s1663_s19, 128, %s1665_s21, %s1671_s27, %s1476_s12, %s1476_s12, %s1477_s20  }
  0x6f   : > { %p1765_p2 = scmp.ne.s32.totalorder %s1761_s30, 0 }
  0x70   : > { %s294_s24 = sand.u32 (!%p1765_p2), 1, %s1461_s25   ;;  %p1766_p6 = scmp.ne.s32.totalorder (!%p1765_p2), %s1760_s29, 0 }
  0x71   : > { %292 = sbr.rel (%p1765_p2) target bundleno = 820 (0x334), region = 44  ;;  %s1705_s8 = sshll.u32 (!%p1765_p2), %s294_s24, 3 }
  0x72   : > { %s295_s23 = scalar_lea.sflag (!%p1765_p2), [#allocation3], %s294_s24  ;;  %s298_s11 = scalar_lea.vmem (!%p1765_p2), [#allocation2], %s1705_s8 }
  0x78   : > { %1444 = dma.done.wait (%p1766_p6), %s295_s23, 128  }
  0x79   : > { %1446 = vsyncadd (%p1766_p6), %s295_s23, 4294967168  ;;  %p1767_p1 = scmp.eq.s32.totalorder %s1541_s28, 0 }
  0x7b   : > { %1448 = dma.done.wait (%p1767_p1), [#allocation5], 6144   ;;  %p1768_p7 = pmov %p1767_p1 }
  0x7c   : > { %p1769_p11 = pmov %p1767_p1 }
  0x7d   : > { %1450 = vsyncadd (%p1768_p7), [#allocation5], 4294961152 }
  0x7e   : > { %1452 = dma.done.wait (%p1769_p11), [#allocation8], 1024   ;;  %p1770_p4 = pmov %p1767_p1 }
  0x7f   : > { %v1479_v0 = vmov 0   ;;  %v1232_v1 = vld [vmem:[#allocation4 + $0x4] ss:$8 sps:$4 sm:$0xff]   ;;  %v1234_v2 = vld [vmem:[#allocation4] ss:$8 sps:$4 sm:$0xff]   ;;  %v1256_v27 = vld [vmem:[%s298_s11] sm:$0xff]   ;;  %v377_v57 = vlaneseq }
  0x80   : > { %1454 = vsyncadd (%p1770_p4), [#allocation8], 4294966272  ;;  %505 = vmatprep.mubr.bf16.mxu0 %v1479_v0  ;;  %473 = vmatprep.subr.bf16.mxu0 %v1232_v1  ;;  %v1235_v3 = vld [vmem:[#allocation4 + $0x14] ss:$8 sps:$4 sm:$0xff]   ;;  %v1237_v4 = vld [vmem:[#allocation4 + $0x10] ss:$8 sps:$4 sm:$0xff]  }
  0x81   : > { %474 = vmatpush1.bf16.msra.mxu0 %v1234_v2  ;;  %v1238_v5 = vld [vmem:[#allocation4 + $0x24] ss:$8 sps:$4 sm:$0xff]   ;;  %v1240_v6 = vld [vmem:[#allocation4 + $0x20] ss:$8 sps:$4 sm:$0xff]   ;;  %v1241_v7 = vld [vmem:[#allocation4 + $0x34] ss:$8 sps:$4 sm:$0xff]  }
  0x82   : > { %475 = vmatprep.subr.bf16.mxu0 %v1235_v3  ;;  %v1243_v8 = vld [vmem:[#allocation4 + $0x30] ss:$8 sps:$4 sm:$0xff]   ;;  %v1244_v9 = vld [vmem:[#allocation4 + $0x44] ss:$8 sps:$4 sm:$0xff]   ;;  %v1259_v11 = vld [vmem:[#allocation6] ss:$8 sps:$4 sm:$0xff]  }
  0x83   : > { %v1257_v10 = vld [vmem:[#allocation6 + $0x4] ss:$8 sps:$4 sm:$0xff]   ;;  %v1260_v12 = vld [vmem:[#allocation6 + $0x14] ss:$8 sps:$4 sm:$0xff]   ;;  %v1246_v13 = vld [vmem:[#allocation4 + $0x40] ss:$8 sps:$4 sm:$0xff]  }
  0x84   : > { %726 = vmatprep.subr.bf16.mxu1 %v1257_v10  ;;  %v1262_v14 = vld [vmem:[#allocation6 + $0x10] ss:$8 sps:$4 sm:$0xff]   ;;  %v1247_v15 = vld [vmem:[#allocation4 + $0x54] ss:$8 sps:$4 sm:$0xff]   ;;  %v1263_v16 = vld [vmem:[#allocation6 + $0x24] ss:$8 sps:$4 sm:$0xff]  }
  0x85   : > { %476 = vmatpush1.bf16.msra.mxu0 %v1237_v4  ;;  %727 = vmatpush1.bf16.msra.mxu1 %v1259_v11  ;;  %v1249_v17 = vld [vmem:[#allocation4 + $0x50] ss:$8 sps:$4 sm:$0xff]   ;;  %v1265_v18 = vld [vmem:[#allocation6 + $0x20] ss:$8 sps:$4 sm:$0xff]   ;;  %v1250_v19 = vld [vmem:[#allocation4 + $0x64] ss:$8 sps:$4 sm:$0xff]  }
  0x86   : > { %477 = vmatprep.subr.bf16.mxu0 %v1238_v5  ;;  %728 = vmatprep.subr.bf16.mxu1 %v1260_v12  ;;  %v1266_v20 = vld [vmem:[#allocation6 + $0x34] ss:$8 sps:$4 sm:$0xff]   ;;  %v1252_v21 = vld [vmem:[#allocation4 + $0x60] ss:$8 sps:$4 sm:$0xff]   ;;  %v1268_v22 = vld [vmem:[#allocation6 + $0x30] ss:$8 sps:$4 sm:$0xff]  }
  0x87   : > { %v1253_v23 = vld [vmem:[#allocation4 + $0x74] ss:$8 sps:$4 sm:$0xff]   ;;  %v1269_v24 = vld [vmem:[#allocation6 + $0x44] ss:$8 sps:$4 sm:$0xff]   ;;  %v1255_v25 = vld [vmem:[#allocation4 + $0x70] ss:$8 sps:$4 sm:$0xff]  }
  0x88   : > { %v1271_v26 = vld [vmem:[#allocation6 + $0x40] ss:$8 sps:$4 sm:$0xff]   ;;  %v1272_v28 = vld [vmem:[#allocation6 + $0x54] ss:$8 sps:$4 sm:$0xff]   ;;  %v1274_v29 = vld [vmem:[#allocation6 + $0x50] ss:$8 sps:$4 sm:$0xff]  }
  0x89   : > { %478 = vmatpush1.bf16.msra.mxu0 %v1240_v6  ;;  %729 = vmatpush1.bf16.msra.mxu1 %v1262_v14  ;;  %v1275_v30 = vld [vmem:[#allocation6 + $0x64] ss:$8 sps:$4 sm:$0xff]   ;;  %v1277_v31 = vld [vmem:[#allocation6 + $0x60] ss:$8 sps:$4 sm:$0xff]   ;;  %v1278_v32 = vld [vmem:[#allocation6 + $0x74] ss:$8 sps:$4 sm:$0xff]  }
  0x8a   : > { %479 = vmatprep.subr.bf16.mxu0 %v1241_v7  ;;  %730 = vmatprep.subr.bf16.mxu1 %v1263_v16  ;;  %v1280_v33 = vld [vmem:[#allocation6 + $0x70] ss:$8 sps:$4 sm:$0xff]   ;;  %v1281_v34 = vld [vmem:[#allocation6 + $0x84] ss:$8 sps:$4 sm:$0xff]   ;;  %v1283_v35 = vld [vmem:[#allocation6 + $0x80] ss:$8 sps:$4 sm:$0xff]  }
  0x8b   : > { %v1284_v36 = vld [vmem:[#allocation6 + $0x94] ss:$8 sps:$4 sm:$0xff]   ;;  %v1286_v37 = vld [vmem:[#allocation6 + $0x90] ss:$8 sps:$4 sm:$0xff]   ;;  %v1287_v38 = vld [vmem:[#allocation6 + $0xa4] ss:$8 sps:$4 sm:$0xff]  }
  0x8c   : > { %v1289_v39 = vld [vmem:[#allocation6 + $0xa0] ss:$8 sps:$4 sm:$0xff]   ;;  %v1290_v40 = vld [vmem:[#allocation6 + $0xb4] ss:$8 sps:$4 sm:$0xff]   ;;  %v1292_v41 = vld [vmem:[#allocation6 + $0xb0] ss:$8 sps:$4 sm:$0xff]  }
  0x8d   : > { %480 = vmatpush1.bf16.msra.mxu0 %v1243_v8  ;;  %731 = vmatpush1.bf16.msra.mxu1 %v1265_v18  ;;  %v1293_v42 = vld [vmem:[#allocation6 + $0xc4] ss:$8 sps:$4 sm:$0xff]   ;;  %v1295_v43 = vld [vmem:[#allocation6 + $0xc0] ss:$8 sps:$4 sm:$0xff]   ;;  %v1296_v44 = vld [vmem:[#allocation6 + $0xd4] ss:$8 sps:$4 sm:$0xff]  }
  0x8e   : > { %481 = vmatprep.subr.bf16.mxu0 %v1244_v9  ;;  %732 = vmatprep.subr.bf16.mxu1 %v1266_v20  ;;  %v1298_v45 = vld [vmem:[#allocation6 + $0xd0] ss:$8 sps:$4 sm:$0xff]   ;;  %v1299_v46 = vld [vmem:[#allocation6 + $0xe4] ss:$8 sps:$4 sm:$0xff]   ;;  %v1301_v47 = vld [vmem:[#allocation6 + $0xe0] ss:$8 sps:$4 sm:$0xff]  }
  0x8f   : > { %v1302_v48 = vld [vmem:[#allocation6 + $0xf4] ss:$8 sps:$4 sm:$0xff]   ;;  %v1304_v49 = vld [vmem:[#allocation6 + $0xf0] ss:$8 sps:$4 sm:$0xff]   ;;  %v1305_v50 = vld [vmem:[#allocation7] sm:$0xff]   ;;  %v1480_v51 = vmov 0.0  }
  0x90   : > { %v1306_v52 = vld [vmem:[#allocation7 + $0x8] sm:$0xff]   ;;  %v1307_v53 = vld [vmem:[#allocation7 + $0x10] sm:$0xff]   ;;  %v1308_v54 = vld [vmem:[#allocation7 + $0x18] sm:$0xff]   ;;  %v378_v58 = vshrl.u32 %v377_v57, 7  ;;  %vm1481_vm0 = vmmov 0   ;;  %p346_p5 = scmp.lt.s32.totalorder %s1541_s28, 1 }
  0x91   : > { %482 = vmatpush1.bf16.msra.mxu0 %v1246_v13  ;;  %733 = vmatpush1.bf16.msra.mxu1 %v1268_v22  ;;  %v1309_v55 = vld [vmem:[#allocation7 + $0x20] sm:$0xff]   ;;  %v1310_v56 = vld [vmem:[#allocation7 + $0x28] sm:$0xff]   ;;  %v375_v60 = vld [vmem:[%s1751_s2] sm:$0x3] }
  0x92   : > { %483 = vmatprep.subr.bf16.mxu0 %v1247_v15  ;;  %734 = vmatprep.subr.bf16.mxu1 %v1269_v24  ;;  %v379_v59 = vsub.s32 0, %v378_v58  ;;  %v383_v61 = vsub.s32 1, %v378_v58  ;;  %v1311_v14 = vld [vmem:[#allocation7 + $0x30] sm:$0xff]   ;;  %v1312_v15 = vld [vmem:[#allocation7 + $0x38] sm:$0xff]   ;;  %s1776_s28 = smov (!%p346_p5, %s1541_s28), 1 }
  0x93   : > { %v554_v16 = vld [vmem:[%s1753_s4] sm:$0x3]  ;;  %s1110_s19 = sshll.u32 %s1776_s28, 3 }
  0x94   : > { %v380_v62 = vrot.slane %v375_v60, %v379_v59  ;;  %v384_v63 = vrot.slane %v375_v60, %v383_v61  ;;  %v563_v18 = vrot.slane %v554_v16, %v383_v61  ;;  %s350_s27 = scalar_lea.vmem %s1755_s6, %s1110_s19  ;;  %s355_s28 = scalar_lea.vmem %s1756_s7, %s1110_s19 }
  0x95   : > { %484 = vmatpush1.bf16.msra.mxu0 %v1249_v17  ;;  %735 = vmatpush1.bf16.msra.mxu1 %v1271_v26  ;;  %v559_v17 = vrot.slane %v554_v16, %v379_v59 }
  0x96   : > { %485 = vmatprep.subr.bf16.mxu0 %v1250_v19  ;;  %736 = vmatprep.subr.bf16.mxu1 %v1272_v28 }
  0x99   : > { %486 = vmatpush1.bf16.msra.mxu0 %v1252_v21  ;;  %737 = vmatpush1.bf16.msra.mxu1 %v1274_v29 }
  0x9a   : > { %487 = vmatprep.subr.bf16.mxu0 %v1253_v23  ;;  %738 = vmatprep.subr.bf16.mxu1 %v1275_v30 }
  0x9d   : > { %488 = vmatpush1.bf16.msra.mxu0 %v1255_v25  ;;  %739 = vmatpush1.bf16.msra.mxu1 %v1277_v31 }
  0x9e   : > { %740 = vmatprep.subr.bf16.mxu1 %v1278_v32  ;;  %1135 = vmatprep.subr.bf16.mxu0 %v1480_v51 }
  0xa0   : > { %506 = vmatmul.mubr.bf16.vlgmr.msra.gmra.mrb[0].mxu0 %v1256_v27 }
  0xa1   : > { %741 = vmatpush1.bf16.msra.mxu1 %v1280_v33  ;;  %1136 = vmatpush3.bf16.msra.mxu0 %v1305_v50 }
  0xa2   : > { %742 = vmatprep.subr.bf16.mxu1 %v1281_v34  ;;  %1137 = vmatprep.subr.bf16.mxu0 %v1480_v51 }
  0xa3   : > { %1151 = vmatprep.mubr.msk.bf16.mxu0 %vm1481_vm0, %v1480_v51 }
  0xa5   : > { %743 = vmatpush1.bf16.msra.mxu1 %v1283_v35  ;;  %1138 = vmatpush3.bf16.msra.mxu0 %v1306_v52 }
  0xa6   : > { %744 = vmatprep.subr.bf16.mxu1 %v1284_v36  ;;  %1139 = vmatprep.subr.bf16.mxu0 %v1480_v51 }
  0xa9   : > { %745 = vmatpush1.bf16.msra.mxu1 %v1286_v37  ;;  %1140 = vmatpush3.bf16.msra.mxu0 %v1307_v53 }
  0xaa   : > { %746 = vmatprep.subr.bf16.mxu1 %v1287_v38  ;;  %1141 = vmatprep.subr.bf16.mxu0 %v1480_v51 }
  0xad   : > { %747 = vmatpush1.bf16.msra.mxu1 %v1289_v39  ;;  %1142 = vmatpush3.bf16.msra.mxu0 %v1308_v54 }
  0xae   : > { %748 = vmatprep.subr.bf16.mxu1 %v1290_v40  ;;  %1143 = vmatprep.subr.bf16.mxu0 %v1480_v51 }
  0xb1   : > { %749 = vmatpush1.bf16.msra.mxu1 %v1292_v41  ;;  %1144 = vmatpush3.bf16.msra.mxu0 %v1309_v55 }
  0xb2   : > { %750 = vmatprep.subr.bf16.mxu1 %v1293_v42  ;;  %1145 = vmatprep.subr.bf16.mxu0 %v1480_v51 }
  0xb5   : > { %751 = vmatpush1.bf16.msra.mxu1 %v1295_v43  ;;  %1146 = vmatpush3.bf16.msra.mxu0 %v1310_v56 }
  0xb6   : > { %752 = vmatprep.subr.bf16.mxu1 %v1296_v44  ;;  %1147 = vmatprep.subr.bf16.mxu0 %v1480_v51 }
  0xb9   : > { %753 = vmatpush1.bf16.msra.mxu1 %v1298_v45  ;;  %1148 = vmatpush3.bf16.msra.mxu0 %v1311_v14 }
  0xba   : > { %754 = vmatprep.subr.bf16.mxu1 %v1299_v46  ;;  %1149 = vmatprep.subr.bf16.mxu0 %v1480_v51 }
  0xbd   : > { %755 = vmatpush1.bf16.msra.mxu1 %v1301_v47  ;;  %1150 = vmatpush3.bf16.msra.mxu0 %v1312_v15 }
  0xbe   : > { %756 = vmatprep.subr.bf16.mxu1 %v1302_v48 }
  0xc1   : > { %757 = vmatpush1.bf16.msra.mxu1 %v1304_v49 }
 0x173   : > { %v507_v0 = vpop.f32.mrb[0].mxu0 }
 0x174   : > { %v508_v1 = vadd.f32 %v507_v0, %v380_v62  ;;  %v509_v2 = vpop.f32.mrb[1].mxu0 }
 0x175   : > { %v510_v3 = vadd.f32 %v509_v2, %v384_v63  ;;  %v511_v4 = vpop.f32.mrb[2].mxu0 }
 0x176   : > { %v512_v5 = vadd.f32 %v511_v4, %v380_v62  ;;  %v513_v6 = vpop.f32.mrb[3].mxu0  ;;  %v516_v8 = vmax.f32 %v508_v1, 0.0 }
 0x177   : > { %v514_v7 = vadd.f32 %v513_v6, %v384_v63  ;;  %v517_v10 = vmax.f32 %v510_v3, 0.0 }
 0x178   : > { %v518_v9 = vmax.f32 %v512_v5, 0.0 }
 0x179   : > { %v519_v11 = vmax.f32 %v514_v7, 0.0 }
 0x17a   : > { %v520_v12 = vpack.c.bf16 %v518_v9, %v516_v8 }
 0x17b   : > { %v521_v13 = vpack.c.bf16 %v519_v11, %v517_v10 }
 0x17d   : > { %758 = vmatprep.mubr.bf16.mxu1 %v521_v13 }
 0x17e   : > { %759 = vmatmul.mubr.bf16.vlgmr.msra.gmra.mrb[0].mxu1 %v520_v12 }
 0x251   : > { %v760_v19 = vpop.f32.mrb[0].mxu1 }
 0x252   : > { %v761_v20 = vadd.f32 %v760_v19, %v559_v17  ;;  %v762_v21 = vpop.f32.mrb[1].mxu1 }
 0x253   : > { %v763_v22 = vadd.f32 %v762_v21, %v563_v18  ;;  %v764_v23 = vpop.f32.mrb[2].mxu1 }
 0x254   : > { %v765_v24 = vadd.f32 %v764_v23, %v559_v17  ;;  %v766_v25 = vpop.f32.mrb[3].mxu1  ;;  %v769_v27 = vmax.f32 %v761_v20, 0.0 }
 0x255   : > { %v767_v26 = vadd.f32 %v766_v25, %v563_v18  ;;  %v770_v29 = vmax.f32 %v763_v22, 0.0 }
 0x256   : > { %v771_v28 = vmax.f32 %v765_v24, 0.0 }
 0x257   : > { %v772_v30 = vmax.f32 %v767_v26, 0.0 }
 0x258   : > { %v1119_v31 = vpack.c.bf16 %v771_v28, %v769_v27 }
 0x259   : > { %v783_v32 = vpack.c.bf16 %v772_v30, %v770_v29 }
 0x25a   : > { %1120 = vst [vmem:[%s350_s27] sm:$0xff] %v1119_v31  }
 0x25b   : > { %1152 = vmatmul.mubr.bf16.vlgmr.msra.gmra.mrb[4].mxu0 %v783_v32 }
 0x32e   : > { %v882_v33 = vpop.f32.mrb[4].mxu0 }
 0x32f   : > { %v1153_v34 = vpop.f32.mrb[5].mxu0 }
 0x330   : > { %v885_v35 = vpop.f32.mrb[6].mxu0 }
 0x331   : > { %v1124_v36 = vpack.c.bf16 %v885_v35, %v882_v33  ;;  %v1154_v37 = vpop.f32.mrb[7].mxu0 }
 0x333   : > { %1125 = vst [vmem:[%s355_s28] sm:$0xff] %v1124_v36  }
 0x334 PF: > { %p20_p9 = scmp.ge.s32.totalorder %s1646_s9, 4   ;;  %s1771_s24 = smov %s1461_s25 }
 0x335   : > { %s1772_s25 = smov %s1465_s26  ;;  %s1773_s26 = smov %s1656_s13 }
 0x336   : > { %s1774_s27 = smov %s1646_s9  ;;  %22 = sbr.rel (!%p20_p9) target bundleno = 5 (0x5), region = 108 }
 0x33d   :  { %936 = vsyncpa [#allocation3], 1 }
 0x33e   :  { %938 = vsyncpa [#allocation3 + $0x1], 1 }
 0x33f   :  { %939 = vsyncpa [#allocation5], 1 }
 0x340   :  { %940 = vsyncpa [#allocation8], 1 }

// kernel: _forward_impl.3
= control target key start
LH: loop header
LB: loop body
LE: loop exit
PB: predicated region body
PF: predicated region fallthrough
CT: control target
= control target key end

     0   :  { %s4900_s0 = inlined_call_operand.hbm [shape: bf16[2,1024,128], index: 0, kind: input, shape index: {}]   ;;  %s4901_s1 = inlined_call_operand.vmem [shape: bf16[2,128,16], index: 1, kind: input, shape index: {}]   ;;  %s4902_s2 = inlined_call_operand.vmem [shape: bf16[2,16,128], index: 2, kind: input, shape index: {}]   ;;  %s4903_s3 = inlined_call_operand.vmem [shape: bf16[128,128], index: 3, kind: input, shape index: {}]   ;;  %s4904_s4 = inlined_call_operand.vmem [shape: f32[1,128], index: 4, kind: input, shape index: {}]   ;;  %s4905_s5 = inlined_call_operand.vmem [shape: bf16[128,128], index: 5, kind: input, shape index: {}]   ;;  %s4906_s6 = inlined_call_operand.vmem [shape: f32[1,128], index: 6, kind: input, shape index: {}]   ;;  %s4907_s7 = inlined_call_operand.vmem [shape: f32[1,128], index: 7, kind: input, shape index: {}]   ;;  %s4908_s8 = inlined_call_operand.vmem [shape: bf16[128,128], index: 8, kind: input, shape index: {}]   ;;  %s4909_s9 = inlined_call_operand.vmem [shape: bf16[128,128], index: 9, kind: input, shape index: {}]   ;;  %s4910_s10 = inlined_call_operand.vmem [shape: f32[1,128], index: 10, kind: input, shape index: {}]   ;;  %s4911_s11 = inlined_call_operand.hbm [shape: bf16[2,1024,128], index: 11, kind: output, shape index: {}]  }
   0x1   :  { %4919 = sst [smem:[#allocation12_spill]] %s4907_s7 }
   0x2   :  { %4920 = sst [smem:[#allocation13_spill]] %s4908_s8 }
   0x3   :  { %4921 = sst [smem:[#allocation14_spill]] %s4909_s9 }
   0x4   :  { %4922 = sst [smem:[#allocation15_spill]] %s4910_s10 }
   0x5   :  { %4923 = sst [smem:[#allocation16_spill]] %s4911_s11 }
   0x6   :  { %16 = vsyncpa [#allocation3], 0 }
   0x7   :  { %18 = vsyncpa [#allocation3 + $0x1], 0 }
   0x8   :  { %19 = vsyncpa [#allocation4], 0 }
   0x9   :  { %21 = vsyncpa [#allocation4 + $0x1], 0  ;;  %s4043_s17 = smov 0   ;;  %s4045_s18 = smov 0  }
   0xa   :  { %s4047_s19 = smov 0   ;;  %s4049_s20 = smov 0  }
   0xb   :  { %s4051_s21 = smov 0   ;;  %s4053_s22 = smov 0  }
   0xc   :  { %s4055_s23 = smov 0   ;;  %s4057_s24 = smov 0  }
   0xd LB: > { %4924 = sst [smem:[#allocation8_spill]] %s3947_s17  ;;  %s2863_s25 = sadd.s32 4294967295, %s3975_s24   ;;  %s3975_s24 = sphi %s4057_s24, %s27_s24   ;;  %s3971_s23 = sphi %s4055_s23, %s4951_s23   ;;  %s3967_s22 = sphi %s4053_s22, %s4950_s22   ;;  %s3963_s21 = sphi %s4051_s21, %s4949_s21   ;;  %s3959_s20 = sphi %s4049_s20, %s4948_s20   ;;  %s3955_s19 = sphi %s4047_s19, %s4947_s19   ;;  %s3951_s18 = sphi %s4045_s18, %s4946_s18   ;;  %s3947_s17 = sphi %s4043_s17, %s4945_s17  }
   0xe   : > { %4925 = sst [smem:[#allocation9_spill]] %s3959_s20  ;;  %s2864_s26 = sadd.s32 4294967294, %s3975_s24  }
   0xf   : > { %s36_s27 = sadd.s32 1, %s3967_s22  ;;  %s39_s28 = sadd.s32 1, %s3971_s23 }
  0x10   : > { %p37_p0 = scmp.ge.s32.totalorder %s36_s27, 4  ;;  %s48_s29 = sadd.s32 1, %s3955_s19 }
  0x11   : > { %p55_p1 = scmp.ne.s32.totalorder %s3955_s19, %s3951_s18  ;;  %p56_p2 = scmp.eq.s32.totalorder %s3975_s24, 0 }
  0x12   : > { %s4953_s27 = smov (%p37_p0, %s36_s27), 0  ;;  %s4955_s28 = smov (!%p37_p0, %s39_s28), %s3971_s23 }
  0x13   : > { %4926 = sst [smem:[#allocation10_spill]] %s4953_s27  ;;  %s44_s30 = ssub.s32 %s3967_s22, %s4953_s27 }
  0x14   : > { %p4096_p3 = por %p56_p2, %p55_p1  ;;  %p41_p4 = scmp.ge.s32.totalorder %s4955_s28, 2 }
  0x15   : > { %p61_p5 = scmp.ne.s32.totalorder %s3951_s18, %s3947_s17  ;;  %p62_p6 = scmp.eq.s32.totalorder %s2863_s25, 0 }
  0x16   : > { %p307_p7 = scmp.eq.s32.totalorder %s2863_s25, 7  ;;  %s4957_s28 = smov (%p41_p4, %s4955_s28), 0 }
  0x17   : > { %4928 = sst [smem:[#allocation11_spill]] %s4957_s28  ;;  %p4104_p8 = por %p62_p6, %p61_p5 }
  0x18   : > { %p4108_p9 = por %p307_p7, %p55_p1  ;;  %s43_s15 = ssub.s32 %s3971_s23, %s4957_s28 }
  0x19   : > { %p313_p10 = scmp.eq.s32.totalorder %s2864_s26, 7  ;;  %s45_s16 = sor.u32 %s44_s30, %s43_s15 }
  0x1a   : > { %s4930_s14 = scalar_select %p4108_p9, 1, 0 }
  0x1b   : > { %p46_p11 = scmp.eq.s32.totalorder %s45_s16, 0  ;;  %p4114_p12 = por %p313_p10, %p61_p5 }
  0x1c   : > { %p3577_p13 = scmp.lt.s32.totalorder %s3975_s24, 8  ;;  %s357_s25 = sand.u32 1, %s3955_s19  }
  0x1d   : > { %s4931_s27 = scalar_select %p4114_p12, 1, 0 }
  0x1e   : > { %s4121_s17 = scalar_select %p46_p11, %s3955_s19, %s48_s29  }
  0x1f   : > { %s2867_s11 = sshll.u32 %s357_s25, 7  ;;  %s2868_s20 = sshll.u32 %s3967_s22, 5 }
  0x20   : > { %s2869_s10 = sshll.u32 %s3971_s23, 7  ;;  %s361_s7 = scalar_lea.vmem [#allocation2], %s2867_s11 }
  0x21   : > { %s370_s8 = sshll.u32 %s361_s7, 4  ;;  %s367_s9 = sadd.s32 %s2869_s10, %s2868_s20  ;;  %s4125_s8 = int_to_ptr.vmem [resolvable:$true] %s370_s8 }
  0x22   : > { %s2870_s28 = sshll.u32 %s367_s9, 6  ;;  %p4129_p0 = pnand %p3577_p13, %p4096_p3 }
  0x23   : > { %s4136_s29 = scalar_lea.hbm %s4900_s0, %s2870_s28  ;;  %s4138_s7 = scalar_lea.sflag [#allocation3], %s357_s25 }
  0x24   : > { %s3847_s10 = scalar_lea.hbm %s4136_s29, 2048  ;;  %p3849_p2 = pneg %p4129_p0 }
  0x25   : > { %p3848_p1 = scmp.ne.s32.totalorder %s4136_s29, %s3847_s10  ;;  %s3852_s20 = scalar_lea.hbm %s4900_s0, 16384 }
  0x26   : > { %p3853_p5 = scmp.lt.u32.totalorder %s4136_s29, %s4900_s0  ;;  %p3854_p6 = scmp.lt.u32.totalorder %s3852_s20, %s3847_s10 }
  0x27   : > { %p3850_p3 = pnand %p3849_p2, %p3848_p1  ;;  %p3856_p10 = scmp.lt.u32.totalorder %s3847_s10, %s4136_s29 }
  0x28   : > { %p3855_p7 = por %p3854_p6, %p3853_p5 }
  0x29   : > { %p3851_p4 = pneg %p3850_p3 }
  0x2a   : > { %p3857_p11 = por %p3856_p10, %p3855_p7 }
  0x2c   : > { %p3858_p13 = pnand %p3857_p11, %p3851_p4 }
  0x2e   : > { %3861 = shalt.err (!%p3858_p13)
}
  0x2f   : > { %s3862_s16 = scalar_lea.vmem %s4125_s8, 2048  ;;  %s3977_s25 = smov [#allocation2]  }
  0x30   : > { %p3863_p1 = scmp.ne.s32.totalorder %s4125_s8, %s3862_s16  ;;  %s3867_s30 = sshll.u32 %s3977_s25, 4  ;;  %s3868_s30 = int_to_ptr.vmem [resolvable:$false] %s3867_s30 }
  0x31   : > { %s3869_s15 = scalar_lea.vmem %s3868_s30, 4096  ;;  %p3870_p9 = scmp.lt.s32.totalorder %s4125_s8, %s3868_s30 }
  0x32   : > { %p3865_p3 = pnand %p3863_p1, %p3849_p2  ;;  %p3871_p5 = scmp.lt.s32.totalorder %s3869_s15, %s3862_s16 }
  0x34   : > { %p3866_p12 = pneg %p3865_p3  ;;  %p3872_p6 = por %p3871_p5, %p3870_p9 }
  0x36   : > { %p3873_p7 = pnand %p3872_p6, %p3866_p12 }
  0x38   : > { %3876 = shalt.err (!%p3873_p7)
}
  0x39   : > { %s3978_s10 = smov 64   ;;  %s3979_s9 = smov 4  }
  0x3a   : > { %3572 = dma.hbm_to_vmem [thread:$0]  (!%p4129_p0), %s4136_s29, 2048, %s4125_s8, %s4138_s7, %s3978_s10, %s3978_s10, %s3979_s9  }
  0x3b   : > { %p2871_p2 = scmp.ge.s32.totalorder %s3975_s24, 1  ;;  %p394_p4 = scmp.lt.s32.totalorder %s3975_s24, 9 }
  0x3d   : > { %p395_p10 = pnand %p2871_p2, %p394_p4 }
  0x3e   : > { %s4169_s11 = sand.u32 (!%p395_p10), 1, %s3951_s18  }
  0x3f   : > { %398 = sbr.rel (%p395_p10) target bundleno = 1601 (0x641), region = 64  ;;  %s2872_s20 = sshll.u32 (!%p395_p10), %s4169_s11, 7 }
  0x40   : > { %s401_s28 = scalar_lea.sflag (!%p395_p10), [#allocation3], %s4169_s11  ;;  %s4175_s12 = scalar_lea.vmem (!%p395_p10), [#allocation2], %s2872_s20 }
  0x46   : > { %3938 = dma.done.wait (%p4104_p8), %s401_s28, 2048  }
  0x47   : > { %3940 = vsyncadd (%p4104_p8), %s401_s28, 4294965248  ;;  %v3647_v0 = vld [vmem:[%s4903_s3] sm:$0xff]   ;;  %v3648_v1 = vld [vmem:[%s4903_s3 + $0x8] sm:$0xff]   ;;  %p454_p8 = scmp.lt.s32.totalorder %s3963_s21, 1  ;;  %vm1413_vm0 = vcmask 130048   ;;  %s4933_s28 = sld [smem:[#allocation14_spill]] }
  0x48   : > { %3259 = vmatprep.subr.bf16.mxu1 %v3647_v0  ;;  %v3649_v2 = vld [vmem:[%s4903_s3 + $0x10] sm:$0xff]   ;;  %v3650_v3 = vld [vmem:[%s4903_s3 + $0x18] sm:$0xff]   ;;  %v4194_v4 = vld [vmem:[%s4175_s12] sm:$0xff]   ;;  %s4936_s7 = sld [smem:[#allocation15_spill]]  ;;  %s4792_s16 = scalar_lea.vmem [#allocation5], %s2872_s20 }
  0x49   : > { %3260 = vmatpush3.bf16.msra.mxu1 %v3647_v0  ;;  %3275 = vmatprep.mubr.bf16.mxu1 %v4194_v4  ;;  %v3651_v5 = vld [vmem:[%s4903_s3 + $0x20] sm:$0xff]   ;;  %v3652_v6 = vld [vmem:[%s4903_s3 + $0x28] sm:$0xff]   ;;  %v3653_v7 = vld [vmem:[%s4903_s3 + $0x30] sm:$0xff]   ;;  %s4250_s15 = scalar_select %p454_p8, %s3963_s21, 1 }
  0x4a   : > { %3261 = vmatprep.subr.bf16.mxu1 %v3648_v1  ;;  %v3654_v8 = vld [vmem:[%s4903_s3 + $0x38] sm:$0xff]   ;;  %v3656_v9 = vld [vmem:[%s4175_s12 + $0x8] sm:$0xff]   ;;  %v3671_v10 = vld [vmem:[%s4905_s5] sm:$0xff]   ;;  %s4937_s20 = sld [smem:[#allocation9_spill]]  ;;  %s2989_s13 = sshll.u32 %s3963_s21, 7 }
  0x4b   : > { %v3657_v11 = vld [vmem:[%s4175_s12 + $0x10] sm:$0xff]   ;;  %v3672_v12 = vld [vmem:[%s4905_s5 + $0x8] sm:$0xff]   ;;  %v3658_v14 = vld [vmem:[%s4175_s12 + $0x18] sm:$0xff]   ;;  %s2993_s10 = sshll.u32 %s4250_s15, 6  ;;  %s2994_s25 = sshll.u32 %s4250_s15, 3 }
  0x4c   : > { %v3673_v13 = vld [vmem:[%s4905_s5 + $0x10] sm:$0xff]   ;;  %v3659_v15 = vld [vmem:[%s4175_s12 + $0x20] sm:$0xff]   ;;  %v3674_v16 = vld [vmem:[%s4905_s5 + $0x18] sm:$0xff]   ;;  %s4256_s8 = scalar_lea.vmem %s4901_s1, %s2993_s10  ;;  %s463_s10 = scalar_lea.vmem %s4902_s2, %s2994_s25 }
  0x4d   : > { %3262 = vmatpush3.bf16.msra.mxu1 %v3648_v1  ;;  %v3675_v17 = vld [vmem:[%s4905_s5 + $0x20] sm:$0xff]   ;;  %v3660_v18 = vld [vmem:[%s4175_s12 + $0x28] sm:$0xff]   ;;  %v3661_v19 = vld [vmem:[%s4175_s12 + $0x30] sm:$0xff]   ;;  %s4934_s25 = sld [smem:[#allocation13_spill]]  ;;  %s2734_s29 = scalar_lea.sflag [#allocation4], %s4169_s11 }
  0x4e   : > { %3263 = vmatprep.subr.bf16.mxu1 %v3649_v2  ;;  %v3676_v20 = vld [vmem:[%s4905_s5 + $0x28] sm:$0xff]   ;;  %v3677_v21 = vld [vmem:[%s4905_s5 + $0x30] sm:$0xff]   ;;  %v3662_v22 = vld [vmem:[%s4175_s12 + $0x38] sm:$0xff]   ;;  %p4939_p12 = scmp.ne.s32.totalorder %s4930_s14, 0 }
  0x4f   : > { %v3663_v23 = vld [vmem:[%s4175_s12 + $0x40] sm:$0xff]   ;;  %v3664_v24 = vld [vmem:[%s4175_s12 + $0x48] sm:$0xff]   ;;  %v3665_v25 = vld [vmem:[%s4175_s12 + $0x50] sm:$0xff]  }
  0x50   : > { %v3666_v26 = vld [vmem:[%s4175_s12 + $0x58] sm:$0xff]   ;;  %v3667_v27 = vld [vmem:[%s4175_s12 + $0x60] sm:$0xff]   ;;  %v3668_v28 = vld [vmem:[%s4175_s12 + $0x68] sm:$0xff]   ;;  %s2988_s30 = sshll.u32 %s4937_s20, 5  ;;  %s3980_s20 = smov [#allocation5]  }
  0x51   : > { %3264 = vmatpush3.bf16.msra.mxu1 %v3649_v2  ;;  %v3669_v29 = vld [vmem:[%s4175_s12 + $0x70] sm:$0xff]   ;;  %v3670_v30 = vld [vmem:[%s4175_s12 + $0x78] sm:$0xff]   ;;  %v3679_v32 = vld [vmem:[%s4256_s8] sm:$0xff]  }
  0x52   : > { %3265 = vmatprep.subr.bf16.mxu1 %v3650_v3  ;;  %v3678_v31 = vld [vmem:[%s4905_s5 + $0x38] sm:$0xff]   ;;  %v3680_v33 = vld [vmem:[%s4256_s8 + $0x8] sm:$0xff]   ;;  %3355 = vmatprep.subr.bf16.mxu0 %v3679_v32  ;;  %v3681_v34 = vld [vmem:[%s4256_s8 + $0x10] sm:$0xff]  }
  0x53   : > { %3356 = vmatpush3.bf16.msra.mxu0 %v3679_v32  ;;  %v3682_v35 = vld [vmem:[%s4256_s8 + $0x18] sm:$0xff]   ;;  %v3683_v36 = vld [vmem:[%s4256_s8 + $0x20] sm:$0xff]   ;;  %v3684_v37 = vld [vmem:[%s4256_s8 + $0x28] sm:$0xff]  }
  0x54   : > { %3357 = vmatprep.subr.bf16.mxu0 %v3680_v33  ;;  %v4267_v38 = vld [vmem:[%s4904_s4] ss:$0 sm:$0xff] }
  0x55   : > { %3266 = vmatpush3.bf16.msra.mxu1 %v3650_v3 }
  0x56   : > { %3267 = vmatprep.subr.bf16.mxu1 %v3651_v5 }
  0x57   : > { %3358 = vmatpush3.bf16.msra.mxu0 %v3680_v33 }
  0x58   : > { %3359 = vmatprep.subr.bf16.mxu0 %v3681_v34 }
  0x59   : > { %3268 = vmatpush3.bf16.msra.mxu1 %v3651_v5 }
  0x5a   : > { %3269 = vmatprep.subr.bf16.mxu1 %v3652_v6 }
  0x5b   : > { %3360 = vmatpush3.bf16.msra.mxu0 %v3681_v34 }
  0x5c   : > { %3361 = vmatprep.subr.bf16.mxu0 %v3682_v35 }
  0x5d   : > { %3270 = vmatpush3.bf16.msra.mxu1 %v3652_v6 }
  0x5e   : > { %3271 = vmatprep.subr.bf16.mxu1 %v3653_v7 }
  0x5f   : > { %3362 = vmatpush3.bf16.msra.mxu0 %v3682_v35 }
  0x60   : > { %3363 = vmatprep.subr.bf16.mxu0 %v3683_v36 }
  0x61   : > { %3272 = vmatpush3.bf16.msra.mxu1 %v3653_v7 }
  0x62   : > { %3273 = vmatprep.subr.bf16.mxu1 %v3654_v8 }
  0x63   : > { %3364 = vmatpush3.bf16.msra.mxu0 %v3683_v36 }
  0x64   : > { %3365 = vmatprep.subr.bf16.mxu0 %v3684_v37 }
  0x65   : > { %3274 = vmatpush3.bf16.msra.mxu1 %v3654_v8 }
  0x66   : > { %3307 = vmatprep.subr.bf16.mxu1 %v3671_v10 }
  0x67   : > { %3366 = vmatpush3.bf16.msra.mxu0 %v3684_v37 }
  0x68   : > { %3276 = vmatmul.mubr.bf16.vlgmr.msra.gmra.mrb[0].mxu1 %v3656_v9 }
  0x69   : > { %3279 = vmatprep.mubr.bf16.mxu1 %v3657_v11  ;;  %3308 = vmatpush3.bf16.msra.mxu1 %v3671_v10 }
  0x6a   : > { %3309 = vmatprep.subr.bf16.mxu1 %v3672_v12 }
  0x6d   : > { %3310 = vmatpush3.bf16.msra.mxu1 %v3672_v12 }
  0x6e   : > { %3311 = vmatprep.subr.bf16.mxu1 %v3673_v13 }
  0x70   : > { %3280 = vmatmul.mubr.bf16.gmra.mrb[4].mxu1 %v3658_v14 }
  0x71   : > { %3283 = vmatprep.mubr.bf16.mxu1 %v3659_v15  ;;  %3312 = vmatpush3.bf16.msra.mxu1 %v3673_v13 }
  0x72   : > { %3313 = vmatprep.subr.bf16.mxu1 %v3674_v16 }
  0x75   : > { %3314 = vmatpush3.bf16.msra.mxu1 %v3674_v16 }
  0x76   : > { %3315 = vmatprep.subr.bf16.mxu1 %v3675_v17 }
  0x78   : > { %3284 = vmatmul.mubr.bf16.gmra.mrb[8].mxu1 %v3660_v18 }
  0x79   : > { %3287 = vmatprep.mubr.bf16.mxu1 %v3661_v19  ;;  %3316 = vmatpush3.bf16.msra.mxu1 %v3675_v17 }
  0x7a   : > { %3317 = vmatprep.subr.bf16.mxu1 %v3676_v20 }
  0x7d   : > { %3318 = vmatpush3.bf16.msra.mxu1 %v3676_v20 }
  0x7e   : > { %3319 = vmatprep.subr.bf16.mxu1 %v3677_v21 }
  0x80   : > { %3288 = vmatmul.mubr.bf16.gmra.mrb[12].mxu1 %v3662_v22 }
  0x81   : > { %3291 = vmatprep.mubr.bf16.mxu1 %v3663_v23  ;;  %3320 = vmatpush3.bf16.msra.mxu1 %v3677_v21 }
  0x82   : > { %3321 = vmatprep.subr.bf16.mxu1 %v3678_v31 }
  0x85   : > { %3322 = vmatpush3.bf16.msra.mxu1 %v3678_v31 }
  0x88   : > { %3292 = vmatmul.mubr.bf16.gmra.mrb[16].mxu1 %v3664_v24 }
  0x89   : > { %3295 = vmatprep.mubr.bf16.mxu1 %v3665_v25 }
  0x90   : > { %3296 = vmatmul.mubr.bf16.gmra.mrb[20].mxu1 %v3666_v26 }
  0x91   : > { %3299 = vmatprep.mubr.bf16.mxu1 %v3667_v27 }
  0x98   : > { %3300 = vmatmul.mubr.bf16.gmra.mrb[24].mxu1 %v3668_v28 }
  0x99   : > { %3303 = vmatprep.mubr.bf16.mxu1 %v3669_v29 }
  0xa0   : > { %3304 = vmatmul.mubr.bf16.gmra.mrb[28].mxu1 %v3670_v30 }
 0x13b   : > { %v3277_v39 = vpop.f32.mrb[0].mxu1 }
 0x13c   : > { %v726_v40 = vadd.f32 %v3277_v39, %v4267_v38  ;;  %v717_v41 = vpop.f32.mrb[1].mxu1 }
 0x13d   : > { %v718_v42 = vadd.f32 %v4267_v38, %v717_v41  ;;  %v3278_v43 = vpop.f32.mrb[2].mxu1 }
 0x13e   : > { %v729_v44 = vadd.f32 %v3278_v43, %v4267_v38  ;;  %v720_v45 = vpop.f32.mrb[3].mxu1  ;;  %v846_v47 = vmax.f32 %v726_v40, 0.0 }
 0x13f   : > { %v721_v46 = vadd.f32 %v4267_v38, %v720_v45  ;;  %v844_v49 = vmax.f32 %v718_v42, 0.0 }
 0x140   : > { %v847_v48 = vmax.f32 %v729_v44, 0.0 }
 0x141   : > { %v845_v50 = vmax.f32 %v721_v46, 0.0 }
 0x142   : > { %v877_v51 = vpack.c.bf16 %v847_v48, %v846_v47 }
 0x143   : > { %v876_v52 = vpack.c.bf16 %v845_v50, %v844_v49  ;;  %v3281_v53 = vpop.f32.mrb[4].mxu1 }
 0x144   : > { %v742_v54 = vadd.f32 %v3281_v53, %v4267_v38  ;;  %v733_v55 = vpop.f32.mrb[5].mxu1 }
 0x145   : > { %v734_v56 = vadd.f32 %v4267_v38, %v733_v55  ;;  %v3282_v57 = vpop.f32.mrb[6].mxu1  ;;  %3323 = vmatprep.mubr.bf16.mxu1 %v876_v52 }
 0x146   : > { %v850_v58 = vmax.f32 %v742_v54, 0.0  ;;  %v745_v59 = vadd.f32 %v3282_v57, %v4267_v38  ;;  %v736_v60 = vpop.f32.mrb[7].mxu1  ;;  %3324 = vmatmul.mubr.bf16.vlgmr.msra.gmra.mrb[32].mxu1 %v877_v51 }
 0x147   : > { %v848_v61 = vmax.f32 %v734_v56, 0.0  ;;  %v737_v62 = vadd.f32 %v4267_v38, %v736_v60 }
 0x148   : > { %v851_v63 = vmax.f32 %v745_v59, 0.0 }
 0x149   : > { %v849_v0 = vmax.f32 %v737_v62, 0.0 }
 0x14a   : > { %v879_v1 = vpack.c.bf16 %v851_v63, %v850_v58 }
 0x14b   : > { %v878_v2 = vpack.c.bf16 %v849_v0, %v848_v61  ;;  %v3285_v3 = vpop.f32.mrb[8].mxu1 }
 0x14c   : > { %v758_v5 = vadd.f32 %v3285_v3, %v4267_v38  ;;  %v749_v6 = vpop.f32.mrb[9].mxu1 }
 0x14d   : > { %v750_v7 = vadd.f32 %v4267_v38, %v749_v6  ;;  %v3286_v8 = vpop.f32.mrb[10].mxu1  ;;  %3327 = vmatprep.mubr.bf16.mxu1 %v878_v2 }
 0x14e   : > { %v854_v9 = vmax.f32 %v758_v5, 0.0  ;;  %v761_v10 = vadd.f32 %v3286_v8, %v4267_v38  ;;  %v752_v11 = vpop.f32.mrb[11].mxu1  ;;  %3328 = vmatmul.mubr.bf16.gmra.mrb[36].mxu1 %v879_v1 }
 0x14f   : > { %v852_v12 = vmax.f32 %v750_v7, 0.0  ;;  %v753_v13 = vadd.f32 %v4267_v38, %v752_v11 }
 0x150   : > { %v855_v14 = vmax.f32 %v761_v10, 0.0 }
 0x151   : > { %v853_v15 = vmax.f32 %v753_v13, 0.0 }
 0x152   : > { %v881_v16 = vpack.c.bf16 %v855_v14, %v854_v9 }
 0x153   : > { %v880_v17 = vpack.c.bf16 %v853_v15, %v852_v12  ;;  %v3289_v18 = vpop.f32.mrb[12].mxu1 }
 0x154   : > { %v774_v19 = vadd.f32 %v3289_v18, %v4267_v38  ;;  %v765_v20 = vpop.f32.mrb[13].mxu1 }
 0x155   : > { %v766_v21 = vadd.f32 %v4267_v38, %v765_v20  ;;  %v3290_v22 = vpop.f32.mrb[14].mxu1  ;;  %3331 = vmatprep.mubr.bf16.mxu1 %v880_v17 }
 0x156   : > { %v858_v23 = vmax.f32 %v774_v19, 0.0  ;;  %v777_v24 = vadd.f32 %v3290_v22, %v4267_v38  ;;  %v768_v25 = vpop.f32.mrb[15].mxu1  ;;  %3332 = vmatmul.mubr.bf16.gmra.mrb[40].mxu1 %v881_v16 }
 0x157   : > { %v856_v26 = vmax.f32 %v766_v21, 0.0  ;;  %v769_v27 = vadd.f32 %v4267_v38, %v768_v25 }
 0x158   : > { %v859_v28 = vmax.f32 %v777_v24, 0.0 }
 0x159   : > { %v857_v29 = vmax.f32 %v769_v27, 0.0  ;;  %v3686_v27 = vld [vmem:[%s4256_s8 + $0x38] sm:$0xff]  }
 0x15a   : > { %v883_v30 = vpack.c.bf16 %v859_v28, %v858_v23  ;;  %v4306_v28 = vld [vmem:[%s4906_s6] ss:$0 sm:$0xff] }
 0x15b   : > { %v882_v31 = vpack.c.bf16 %v857_v29, %v856_v26  ;;  %v3293_v32 = vpop.f32.mrb[16].mxu1  ;;  %v3685_v26 = vld [vmem:[%s4256_s8 + $0x30] sm:$0xff]   ;;  %s4935_s8 = sld [smem:[#allocation12_spill]] }
 0x15c   : > { %v790_v33 = vadd.f32 %v3293_v32, %v4267_v38  ;;  %v781_v34 = vpop.f32.mrb[17].mxu1  ;;  %3367 = vmatprep.subr.bf16.mxu0 %v3685_v26 }
 0x15d   : > { %v782_v35 = vadd.f32 %v4267_v38, %v781_v34  ;;  %v3294_v36 = vpop.f32.mrb[18].mxu1  ;;  %3335 = vmatprep.mubr.bf16.mxu1 %v882_v31  ;;  %3368 = vmatpush3.bf16.msra.mxu0 %v3685_v26 }
 0x15e   : > { %v862_v37 = vmax.f32 %v790_v33, 0.0  ;;  %v793_v39 = vadd.f32 %v3294_v36, %v4267_v38  ;;  %v784_v40 = vpop.f32.mrb[19].mxu1  ;;  %3336 = vmatmul.mubr.bf16.gmra.mrb[44].mxu1 %v883_v30  ;;  %3369 = vmatprep.subr.bf16.mxu0 %v3686_v27 }
 0x15f   : > { %v860_v41 = vmax.f32 %v782_v35, 0.0  ;;  %v785_v42 = vadd.f32 %v4267_v38, %v784_v40 }
 0x160   : > { %v863_v43 = vmax.f32 %v793_v39, 0.0 }
 0x161   : > { %v861_v44 = vmax.f32 %v785_v42, 0.0  ;;  %3370 = vmatpush3.bf16.msra.mxu0 %v3686_v27 }
 0x162   : > { %v885_v45 = vpack.c.bf16 %v863_v43, %v862_v37 }
 0x163   : > { %v884_v46 = vpack.c.bf16 %v861_v44, %v860_v41  ;;  %v3297_v47 = vpop.f32.mrb[20].mxu1 }
 0x164   : > { %v806_v48 = vadd.f32 %v3297_v47, %v4267_v38  ;;  %v797_v49 = vpop.f32.mrb[21].mxu1 }
 0x165   : > { %v798_v50 = vadd.f32 %v4267_v38, %v797_v49  ;;  %v3298_v51 = vpop.f32.mrb[22].mxu1  ;;  %3339 = vmatprep.mubr.bf16.mxu1 %v884_v46 }
 0x166   : > { %v866_v52 = vmax.f32 %v806_v48, 0.0  ;;  %v809_v53 = vadd.f32 %v3298_v51, %v4267_v38  ;;  %v800_v54 = vpop.f32.mrb[23].mxu1  ;;  %3340 = vmatmul.mubr.bf16.gmra.mrb[48].mxu1 %v885_v45 }
 0x167   : > { %v864_v55 = vmax.f32 %v798_v50, 0.0  ;;  %v801_v56 = vadd.f32 %v4267_v38, %v800_v54 }
 0x168   : > { %v867_v57 = vmax.f32 %v809_v53, 0.0 }
 0x169   : > { %v865_v58 = vmax.f32 %v801_v56, 0.0 }
 0x16a   : > { %v887_v59 = vpack.c.bf16 %v867_v57, %v866_v52 }
 0x16b   : > { %v886_v60 = vpack.c.bf16 %v865_v58, %v864_v55  ;;  %v3301_v61 = vpop.f32.mrb[24].mxu1 }
 0x16c   : > { %v822_v62 = vadd.f32 %v3301_v61, %v4267_v38  ;;  %v813_v63 = vpop.f32.mrb[25].mxu1 }
 0x16d   : > { %v814_v0 = vadd.f32 %v4267_v38, %v813_v63  ;;  %v3302_v1 = vpop.f32.mrb[26].mxu1  ;;  %3343 = vmatprep.mubr.bf16.mxu1 %v886_v60 }
 0x16e   : > { %v870_v2 = vmax.f32 %v822_v62, 0.0  ;;  %v825_v3 = vadd.f32 %v3302_v1, %v4267_v38  ;;  %v816_v5 = vpop.f32.mrb[27].mxu1  ;;  %3344 = vmatmul.mubr.bf16.gmra.mrb[52].mxu1 %v887_v59 }
 0x16f   : > { %v868_v6 = vmax.f32 %v814_v0, 0.0  ;;  %v817_v7 = vadd.f32 %v4267_v38, %v816_v5 }
 0x170   : > { %v871_v8 = vmax.f32 %v825_v3, 0.0 }
 0x171   : > { %v869_v9 = vmax.f32 %v817_v7, 0.0 }
 0x172   : > { %v889_v10 = vpack.c.bf16 %v871_v8, %v870_v2 }
 0x173   : > { %v888_v11 = vpack.c.bf16 %v869_v9, %v868_v6  ;;  %v3305_v12 = vpop.f32.mrb[28].mxu1 }
 0x174   : > { %v838_v13 = vadd.f32 %v3305_v12, %v4267_v38  ;;  %v829_v14 = vpop.f32.mrb[29].mxu1 }
 0x175   : > { %v830_v15 = vadd.f32 %v4267_v38, %v829_v14  ;;  %v3306_v16 = vpop.f32.mrb[30].mxu1  ;;  %3347 = vmatprep.mubr.bf16.mxu1 %v888_v11 }
 0x176   : > { %v874_v17 = vmax.f32 %v838_v13, 0.0  ;;  %v841_v18 = vadd.f32 %v3306_v16, %v4267_v38  ;;  %v832_v19 = vpop.f32.mrb[31].mxu1  ;;  %3348 = vmatmul.mubr.bf16.gmra.mrb[56].mxu1 %v889_v10 }
 0x177   : > { %v872_v20 = vmax.f32 %v830_v15, 0.0  ;;  %v833_v21 = vadd.f32 %v4267_v38, %v832_v19 }
 0x178   : > { %v875_v22 = vmax.f32 %v841_v18, 0.0 }
 0x179   : > { %v873_v23 = vmax.f32 %v833_v21, 0.0 }
 0x17a   : > { %v891_v24 = vpack.c.bf16 %v875_v22, %v874_v17 }
 0x17b   : > { %v890_v25 = vpack.c.bf16 %v873_v23, %v872_v20 }
 0x17d   : > { %3351 = vmatprep.mubr.bf16.mxu1 %v890_v25 }
 0x17e   : > { %3352 = vmatmul.mubr.bf16.gmra.mrb[60].mxu1 %v891_v24 }
 0x219   : > { %v3325_v29 = vpop.f32.mrb[32].mxu1 }
 0x21a   : > { %v1006_v38 = vadd.f32 %v3325_v29, %v4306_v28  ;;  %v997_v30 = vpop.f32.mrb[33].mxu1 }
 0x21b   : > { %v998_v31 = vadd.f32 %v4306_v28, %v997_v30  ;;  %v3326_v32 = vpop.f32.mrb[34].mxu1 }
 0x21c   : > { %v1009_v33 = vadd.f32 %v3326_v32, %v4306_v28  ;;  %v1000_v34 = vpop.f32.mrb[35].mxu1  ;;  %v1126_v36 = vmax.f32 %v1006_v38, 0.0 }
 0x21d   : > { %v1001_v35 = vadd.f32 %v4306_v28, %v1000_v34  ;;  %v1124_v39 = vmax.f32 %v998_v31, 0.0 }
 0x21e   : > { %v1127_v37 = vmax.f32 %v1009_v33, 0.0 }
 0x21f   : > { %v1125_v40 = vmax.f32 %v1001_v35, 0.0 }
 0x220   : > { %v1157_v41 = vpack.c.bf16 %v1127_v37, %v1126_v36 }
 0x221   : > { %v3329_v42 = vpop.f32.mrb[36].mxu1  ;;  %v1156_v43 = vpack.c.bf16 %v1125_v40, %v1124_v39 }
 0x222   : > { %v1022_v44 = vadd.f32 %v3329_v42, %v4306_v28  ;;  %v1013_v45 = vpop.f32.mrb[37].mxu1 }
 0x223   : > { %v1014_v46 = vadd.f32 %v4306_v28, %v1013_v45  ;;  %v3330_v47 = vpop.f32.mrb[38].mxu1  ;;  %3371 = vmatprep.mubr.bf16.mxu0 %v1156_v43 }
 0x224   : > { %v1025_v48 = vadd.f32 %v3330_v47, %v4306_v28  ;;  %v1016_v49 = vpop.f32.mrb[39].mxu1  ;;  %3372 = vmatmul.mubr.bf16.vlgmr.msra.gmra.mrb[0].mxu0 %v1157_v41  ;;  %v1130_v51 = vmax.f32 %v1022_v44, 0.0 }
 0x225   : > { %v1017_v50 = vadd.f32 %v4306_v28, %v1016_v49  ;;  %v1128_v53 = vmax.f32 %v1014_v46, 0.0 }
 0x226   : > { %v1131_v52 = vmax.f32 %v1025_v48, 0.0 }
 0x227   : > { %v1129_v54 = vmax.f32 %v1017_v50, 0.0 }
 0x228   : > { %v1159_v55 = vpack.c.bf16 %v1131_v52, %v1130_v51 }
 0x229   : > { %v1158_v56 = vpack.c.bf16 %v1129_v54, %v1128_v53  ;;  %v3333_v57 = vpop.f32.mrb[40].mxu1 }
 0x22a   : > { %v1038_v58 = vadd.f32 %v3333_v57, %v4306_v28  ;;  %v1029_v59 = vpop.f32.mrb[41].mxu1 }
 0x22b   : > { %v1030_v60 = vadd.f32 %v4306_v28, %v1029_v59  ;;  %v3334_v61 = vpop.f32.mrb[42].mxu1  ;;  %3375 = vmatprep.mubr.bf16.mxu0 %v1158_v56 }
 0x22c   : > { %v1041_v62 = vadd.f32 %v3334_v61, %v4306_v28  ;;  %v1032_v63 = vpop.f32.mrb[43].mxu1  ;;  %3376 = vmatmul.mubr.bf16.gmra.mrb[4].mxu0 %v1159_v55  ;;  %v1134_v1 = vmax.f32 %v1038_v58, 0.0 }
 0x22d   : > { %v1033_v0 = vadd.f32 %v4306_v28, %v1032_v63  ;;  %v1132_v3 = vmax.f32 %v1030_v60, 0.0 }
 0x22e   : > { %v1135_v2 = vmax.f32 %v1041_v62, 0.0 }
 0x22f   : > { %v1133_v5 = vmax.f32 %v1033_v0, 0.0 }
 0x230   : > { %v1161_v6 = vpack.c.bf16 %v1135_v2, %v1134_v1 }
 0x231   : > { %v1160_v7 = vpack.c.bf16 %v1133_v5, %v1132_v3  ;;  %v3337_v8 = vpop.f32.mrb[44].mxu1 }
 0x232   : > { %v1054_v9 = vadd.f32 %v3337_v8, %v4306_v28  ;;  %v1045_v10 = vpop.f32.mrb[45].mxu1 }
 0x233   : > { %v1046_v11 = vadd.f32 %v4306_v28, %v1045_v10  ;;  %v3338_v12 = vpop.f32.mrb[46].mxu1  ;;  %3379 = vmatprep.mubr.bf16.mxu0 %v1160_v7 }
 0x234   : > { %v1057_v13 = vadd.f32 %v3338_v12, %v4306_v28  ;;  %v1048_v14 = vpop.f32.mrb[47].mxu1  ;;  %3380 = vmatmul.mubr.bf16.gmra.mrb[8].mxu0 %v1161_v6  ;;  %v1138_v16 = vmax.f32 %v1054_v9, 0.0 }
 0x235   : > { %v1049_v15 = vadd.f32 %v4306_v28, %v1048_v14  ;;  %v1136_v18 = vmax.f32 %v1046_v11, 0.0 }
 0x236   : > { %v1139_v17 = vmax.f32 %v1057_v13, 0.0 }
 0x237   : > { %v1137_v19 = vmax.f32 %v1049_v15, 0.0 }
 0x238   : > { %v1163_v20 = vpack.c.bf16 %v1139_v17, %v1138_v16 }
 0x239   : > { %v1162_v21 = vpack.c.bf16 %v1137_v19, %v1136_v18  ;;  %v3341_v22 = vpop.f32.mrb[48].mxu1 }
 0x23a   : > { %v1070_v23 = vadd.f32 %v3341_v22, %v4306_v28  ;;  %v1061_v24 = vpop.f32.mrb[49].mxu1 }
 0x23b   : > { %v1062_v25 = vadd.f32 %v4306_v28, %v1061_v24  ;;  %v3342_v26 = vpop.f32.mrb[50].mxu1  ;;  %3383 = vmatprep.mubr.bf16.mxu0 %v1162_v21 }
 0x23c   : > { %v1073_v27 = vadd.f32 %v3342_v26, %v4306_v28  ;;  %v1064_v29 = vpop.f32.mrb[51].mxu1  ;;  %3384 = vmatmul.mubr.bf16.gmra.mrb[12].mxu0 %v1163_v20  ;;  %v1142_v30 = vmax.f32 %v1070_v23, 0.0 }
 0x23d   : > { %v1065_v38 = vadd.f32 %v4306_v28, %v1064_v29  ;;  %v1140_v32 = vmax.f32 %v1062_v25, 0.0 }
 0x23e   : > { %v1143_v31 = vmax.f32 %v1073_v27, 0.0 }
 0x23f   : > { %v1141_v33 = vmax.f32 %v1065_v38, 0.0 }
 0x240   : > { %v1165_v34 = vpack.c.bf16 %v1143_v31, %v1142_v30 }
 0x241   : > { %v1164_v35 = vpack.c.bf16 %v1141_v33, %v1140_v32  ;;  %v3345_v36 = vpop.f32.mrb[52].mxu1 }
 0x242   : > { %v1086_v37 = vadd.f32 %v3345_v36, %v4306_v28  ;;  %v1077_v39 = vpop.f32.mrb[53].mxu1 }
 0x243   : > { %v1078_v40 = vadd.f32 %v4306_v28, %v1077_v39  ;;  %v3346_v41 = vpop.f32.mrb[54].mxu1  ;;  %3387 = vmatprep.mubr.bf16.mxu0 %v1164_v35 }
 0x244   : > { %v1089_v42 = vadd.f32 %v3346_v41, %v4306_v28  ;;  %v1080_v43 = vpop.f32.mrb[55].mxu1  ;;  %3388 = vmatmul.mubr.bf16.gmra.mrb[16].mxu0 %v1165_v34  ;;  %v1146_v45 = vmax.f32 %v1086_v37, 0.0 }
 0x245   : > { %v1081_v44 = vadd.f32 %v4306_v28, %v1080_v43  ;;  %v1144_v47 = vmax.f32 %v1078_v40, 0.0 }
 0x246   : > { %v1147_v46 = vmax.f32 %v1089_v42, 0.0 }
 0x247   : > { %v1145_v48 = vmax.f32 %v1081_v44, 0.0 }
 0x248   : > { %v1167_v49 = vpack.c.bf16 %v1147_v46, %v1146_v45 }
 0x249   : > { %v1166_v50 = vpack.c.bf16 %v1145_v48, %v1144_v47  ;;  %v3349_v51 = vpop.f32.mrb[56].mxu1 }
 0x24a   : > { %v1102_v52 = vadd.f32 %v3349_v51, %v4306_v28  ;;  %v1093_v53 = vpop.f32.mrb[57].mxu1 }
 0x24b   : > { %v1094_v54 = vadd.f32 %v4306_v28, %v1093_v53  ;;  %v3350_v55 = vpop.f32.mrb[58].mxu1  ;;  %3391 = vmatprep.mubr.bf16.mxu0 %v1166_v50 }
 0x24c   : > { %v1105_v56 = vadd.f32 %v3350_v55, %v4306_v28  ;;  %v1096_v57 = vpop.f32.mrb[59].mxu1  ;;  %3392 = vmatmul.mubr.bf16.gmra.mrb[20].mxu0 %v1167_v49  ;;  %v1150_v59 = vmax.f32 %v1102_v52, 0.0 }
 0x24d   : > { %v1097_v58 = vadd.f32 %v4306_v28, %v1096_v57  ;;  %v1148_v61 = vmax.f32 %v1094_v54, 0.0 }
 0x24e   : > { %v1151_v60 = vmax.f32 %v1105_v56, 0.0 }
 0x24f   : > { %v1149_v62 = vmax.f32 %v1097_v58, 0.0 }
 0x250   : > { %v1169_v63 = vpack.c.bf16 %v1151_v60, %v1150_v59 }
 0x251   : > { %v1168_v0 = vpack.c.bf16 %v1149_v62, %v1148_v61  ;;  %v3353_v1 = vpop.f32.mrb[60].mxu1 }
 0x252   : > { %v1118_v2 = vadd.f32 %v3353_v1, %v4306_v28  ;;  %v1109_v3 = vpop.f32.mrb[61].mxu1 }
 0x253   : > { %v1110_v5 = vadd.f32 %v4306_v28, %v1109_v3  ;;  %v3354_v6 = vpop.f32.mrb[62].mxu1  ;;  %3395 = vmatprep.mubr.bf16.mxu0 %v1168_v0 }
 0x254   : > { %v1121_v7 = vadd.f32 %v3354_v6, %v4306_v28  ;;  %v1112_v8 = vpop.f32.mrb[63].mxu1  ;;  %3396 = vmatmul.mubr.bf16.gmra.mrb[24].mxu0 %v1169_v63  ;;  %v1154_v10 = vmax.f32 %v1118_v2, 0.0 }
 0x255   : > { %v1113_v9 = vadd.f32 %v4306_v28, %v1112_v8  ;;  %v1152_v12 = vmax.f32 %v1110_v5, 0.0 }
 0x256   : > { %v1155_v11 = vmax.f32 %v1121_v7, 0.0 }
 0x257   : > { %v1153_v13 = vmax.f32 %v1113_v9, 0.0 }
 0x258   : > { %v1171_v14 = vpack.c.bf16 %v1155_v11, %v1154_v10 }
 0x259   : > { %v1170_v15 = vpack.c.bf16 %v1153_v13, %v1152_v12 }
 0x25b   : > { %3399 = vmatprep.mubr.bf16.mxu0 %v1170_v15 }
 0x25c   : > { %3400 = vmatmul.mubr.bf16.gmra.mrb[28].mxu0 %v1171_v14 }
 0x25d   : > { %3453 = vmatprep.mubr.bf16.mxu0 %v4194_v4 }
 0x2f7   : > { %v3373_v16 = vpop.f32.mrb[0].mxu0 }
 0x2f8   : > { %v4341_v17 = vmul.f32 11.313708, %v3373_v16  ;;  %v1254_v18 = vpop.f32.mrb[1].mxu0 }
 0x2f9   : > { %v4343_v19 = vmul.f32 11.313708, %v1254_v18  ;;  %v3374_v20 = vpop.f32.mrb[2].mxu0 }
 0x2fa   : > { %v4345_v21 = vmul.f32 11.313708, %v3374_v20  ;;  %v1257_v28 = vpop.f32.mrb[3].mxu0  ;;  %v1420_v22 = vsel %vm1413_vm0, %v4341_v17, -inf }
 0x2fb   : > { %v4349_v23 = vmul.f32 11.313708, %v1257_v28  ;;  %1421 = vmax.xlane.f32.xlu1 %v1420_v22  ;;  %v1414_v4 = vsel %vm1413_vm0, %v4343_v19, -inf }
 0x2fc   : > { %1415 = vmax.xlane.f32.xlu0 %v1414_v4  ;;  %v1423_v24 = vsel %vm1413_vm0, %v4345_v21, -inf }
 0x2fd   : > { %v1417_v26 = vsel %vm1413_vm0, %v4349_v23, -inf }
 0x2ff   : > { %1424 = vmax.xlane.f32.xlu1 %v1423_v24  ;;  %v3377_v25 = vpop.f32.mrb[4].mxu0 }
 0x300   : > { %1418 = vmax.xlane.f32.xlu0 %v1417_v26  ;;  %v1270_v27 = vpop.f32.mrb[5].mxu0  ;;  %v4359_v31 = vmul.f32 11.313708, %v3377_v25 }
 0x301   : > { %v4357_v29 = vmul.f32 11.313708, %v1270_v27  ;;  %v3378_v38 = vpop.f32.mrb[6].mxu0 }
 0x302   : > { %v1273_v30 = vpop.f32.mrb[7].mxu0  ;;  %v4365_v34 = vmul.f32 11.313708, %v3378_v38  ;;  %v1432_v37 = vsel %vm1413_vm0, %v4359_v31, -inf }
 0x303   : > { %v4361_v32 = vmul.f32 11.313708, %v1273_v30  ;;  %v1426_v33 = vsel %vm1413_vm0, %v4357_v29, -inf }
 0x304   : > { %1427 = vmax.xlane.f32.xlu0 %v1426_v33  ;;  %v1435_v42 = vsel %vm1413_vm0, %v4365_v34, -inf }
 0x305   : > { %v1429_v35 = vsel %vm1413_vm0, %v4361_v32, -inf }
 0x306   : > { %1430 = vmax.xlane.f32.xlu1 %v1429_v35 }
 0x307   : > { %v3381_v36 = vpop.f32.mrb[8].mxu0 }
 0x308   : > { %1433 = vmax.xlane.f32.xlu0 %v1432_v37  ;;  %v1286_v39 = vpop.f32.mrb[9].mxu0  ;;  %v4375_v44 = vmul.f32 11.313708, %v3381_v36 }
 0x309   : > { %v4371_v40 = vmul.f32 11.313708, %v1286_v39  ;;  %v3382_v41 = vpop.f32.mrb[10].mxu0 }
 0x30a   : > { %1436 = vmax.xlane.f32.xlu1 %v1435_v42  ;;  %v1289_v43 = vpop.f32.mrb[11].mxu0  ;;  %v4381_v47 = vmul.f32 11.313708, %v3382_v41  ;;  %v1444_v50 = vsel %vm1413_vm0, %v4375_v44, -inf }
 0x30b   : > { %v4377_v45 = vmul.f32 11.313708, %v1289_v43  ;;  %v1438_v46 = vsel %vm1413_vm0, %v4371_v40, -inf }
 0x30c   : > { %1439 = vmax.xlane.f32.xlu0 %v1438_v46  ;;  %v1447_v54 = vsel %vm1413_vm0, %v4381_v47, -inf }
 0x30d   : > { %v1441_v48 = vsel %vm1413_vm0, %v4377_v45, -inf }
 0x30e   : > { %1442 = vmax.xlane.f32.xlu1 %v1441_v48 }
 0x30f   : > { %v3385_v49 = vpop.f32.mrb[12].mxu0 }
 0x310   : > { %1445 = vmax.xlane.f32.xlu0 %v1444_v50  ;;  %v1302_v51 = vpop.f32.mrb[13].mxu0  ;;  %v4391_v56 = vmul.f32 11.313708, %v3385_v49 }
 0x311   : > { %v4387_v52 = vmul.f32 11.313708, %v1302_v51  ;;  %v3386_v53 = vpop.f32.mrb[14].mxu0 }
 0x312   : > { %1448 = vmax.xlane.f32.xlu1 %v1447_v54  ;;  %v1305_v55 = vpop.f32.mrb[15].mxu0  ;;  %v4397_v59 = vmul.f32 11.313708, %v3386_v53  ;;  %v1456_v62 = vsel %vm1413_vm0, %v4391_v56, -inf }
 0x313   : > { %v4393_v57 = vmul.f32 11.313708, %v1305_v55  ;;  %v1450_v58 = vsel %vm1413_vm0, %v4387_v52, -inf }
 0x314   : > { %1451 = vmax.xlane.f32.xlu0 %v1450_v58  ;;  %v1459_v2 = vsel %vm1413_vm0, %v4397_v59, -inf }
 0x315   : > { %v1453_v60 = vsel %vm1413_vm0, %v4393_v57, -inf }
 0x316   : > { %1454 = vmax.xlane.f32.xlu1 %v1453_v60 }
 0x317   : > { %v3389_v61 = vpop.f32.mrb[16].mxu0 }
 0x318   : > { %1457 = vmax.xlane.f32.xlu0 %v1456_v62  ;;  %v1318_v63 = vpop.f32.mrb[17].mxu0  ;;  %v4407_v5 = vmul.f32 11.313708, %v3389_v61 }
 0x319   : > { %v4403_v0 = vmul.f32 11.313708, %v1318_v63  ;;  %v3390_v1 = vpop.f32.mrb[18].mxu0  ;;  %v3687_v63 = vld [vmem:[%s463_s10] sm:$0xff]   ;;  %s2749_s10 = sshll.u32 %s4792_s16, 4  ;;  %s4844_s10 = int_to_ptr.vmem [resolvable:$true] %s2749_s10 }
 0x31a   : > { %1460 = vmax.xlane.f32.xlu1 %v1459_v2  ;;  %v1321_v3 = vpop.f32.mrb[19].mxu0  ;;  %v4413_v8 = vmul.f32 11.313708, %v3390_v1  ;;  %v1468_v11 = vsel %vm1413_vm0, %v4407_v5, -inf  ;;  %3403 = vmatprep.subr.bf16.mxu1 %v3687_v63 }
 0x31b   : > { %v4409_v6 = vmul.f32 11.313708, %v1321_v3  ;;  %v1462_v7 = vsel %vm1413_vm0, %v4403_v0, -inf  ;;  %3404 = vmatpush3.bf16.msra.mxu1 %v3687_v63 }
 0x31c   : > { %1463 = vmax.xlane.f32.xlu0 %v1462_v7  ;;  %v1471_v15 = vsel %vm1413_vm0, %v4413_v8, -inf }
 0x31d   : > { %v1465_v9 = vsel %vm1413_vm0, %v4409_v6, -inf }
 0x31e   : > { %1466 = vmax.xlane.f32.xlu1 %v1465_v9 }
 0x31f   : > { %v3393_v10 = vpop.f32.mrb[20].mxu0 }
 0x320   : > { %1469 = vmax.xlane.f32.xlu0 %v1468_v11  ;;  %v1334_v12 = vpop.f32.mrb[21].mxu0  ;;  %v4423_v18 = vmul.f32 11.313708, %v3393_v10 }
 0x321   : > { %v4419_v13 = vmul.f32 11.313708, %v1334_v12  ;;  %v3394_v14 = vpop.f32.mrb[22].mxu0 }
 0x322   : > { %1472 = vmax.xlane.f32.xlu1 %v1471_v15  ;;  %v1337_v16 = vpop.f32.mrb[23].mxu0  ;;  %v4429_v22 = vmul.f32 11.313708, %v3394_v14  ;;  %v1480_v25 = vsel %vm1413_vm0, %v4423_v18, -inf }
 0x323   : > { %v4425_v20 = vmul.f32 11.313708, %v1337_v16  ;;  %v1474_v28 = vsel %vm1413_vm0, %v4419_v13, -inf }
 0x324   : > { %1475 = vmax.xlane.f32.xlu0 %v1474_v28  ;;  %v1483_v30 = vsel %vm1413_vm0, %v4429_v22, -inf }
 0x325   : > { %v1477_v4 = vsel %vm1413_vm0, %v4425_v20, -inf }
 0x326   : > { %1478 = vmax.xlane.f32.xlu1 %v1477_v4 }
 0x327   : > { %v3397_v24 = vpop.f32.mrb[24].mxu0 }
 0x328   : > { %1481 = vmax.xlane.f32.xlu0 %v1480_v25  ;;  %v1350_v26 = vpop.f32.mrb[25].mxu0  ;;  %v4439_v35 = vmul.f32 11.313708, %v3397_v24 }
 0x329   : > { %v4435_v27 = vmul.f32 11.313708, %v1350_v26  ;;  %v3398_v38 = vpop.f32.mrb[26].mxu0 }
 0x32a   : > { %1484 = vmax.xlane.f32.xlu1 %v1483_v30  ;;  %v1353_v33 = vpop.f32.mrb[27].mxu0  ;;  %v4445_v39 = vmul.f32 11.313708, %v3398_v38  ;;  %v1492_v43 = vsel %vm1413_vm0, %v4439_v35, -inf }
 0x32b   : > { %v4441_v36 = vmul.f32 11.313708, %v1353_v33  ;;  %v1486_v37 = vsel %vm1413_vm0, %v4435_v27, -inf }
 0x32c   : > { %1487 = vmax.xlane.f32.xlu0 %v1486_v37  ;;  %v1495_v50 = vsel %vm1413_vm0, %v4445_v39, -inf }
 0x32d   : > { %v1489_v41 = vsel %vm1413_vm0, %v4441_v36, -inf }
 0x32e   : > { %1490 = vmax.xlane.f32.xlu1 %v1489_v41 }
 0x32f   : > { %v3401_v42 = vpop.f32.mrb[28].mxu0 }
 0x330   : > { %1493 = vmax.xlane.f32.xlu0 %v1492_v43  ;;  %v1366_v46 = vpop.f32.mrb[29].mxu0  ;;  %v4455_v53 = vmul.f32 11.313708, %v3401_v42 }
 0x331   : > { %v4451_v48 = vmul.f32 11.313708, %v1366_v46  ;;  %v3402_v49 = vpop.f32.mrb[30].mxu0 }
 0x332   : > { %1496 = vmax.xlane.f32.xlu1 %v1495_v50  ;;  %v1369_v51 = vpop.f32.mrb[31].mxu0  ;;  %v4461_v58 = vmul.f32 11.313708, %v3402_v49  ;;  %v1504_v61 = vsel %vm1413_vm0, %v4455_v53, -inf }
 0x333   : > { %v4457_v54 = vmul.f32 11.313708, %v1369_v51  ;;  %v1498_v55 = vsel %vm1413_vm0, %v4451_v48, -inf }
 0x334   : > { %1499 = vmax.xlane.f32.xlu0 %v1498_v55  ;;  %v1507_v62 = vsel %vm1413_vm0, %v4461_v58, -inf }
 0x335   : > { %v1501_v60 = vsel %vm1413_vm0, %v4457_v54, -inf }
 0x336   : > { %1502 = vmax.xlane.f32.xlu1 %v1501_v60 }
 0x338   : > { %1505 = vmax.xlane.f32.xlu0 %v1504_v61 }
 0x33a   : > { %1508 = vmax.xlane.f32.xlu1 %v1507_v62 }
 0x388   : > { %v1422_v1 = vpop.xlane.xlu1 %1421 }
 0x389   : > { %v1512_v2 = vsub.f32 %v4341_v17, %v1422_v1  ;;  %v1416_v3 = vpop.xlane.xlu0 %1415 }
 0x38a   : > { %v1510_v7 = vsub.f32 %v4343_v19, %v1416_v3 }
 0x38b   : > { %v1546_v9 = vmul.f32 1.442695, %v1512_v2 }
 0x38c   : > { %v1542_v10 = vmul.f32 1.442695, %v1510_v7  ;;  %v1425_v11 = vpop.xlane.xlu1 %1424 }
 0x38d   : > { %v1513_v12 = vsub.f32 %v4345_v21, %v1425_v11  ;;  %v1419_v14 = vpop.xlane.xlu0 %1418 }
 0x38e   : > { %3704 = vpow2.f32 %v1542_v10  ;;  %v1511_v15 = vsub.f32 %v4349_v23, %v1419_v14 }
 0x38f   : > { %3706 = vpow2.f32 %v1546_v9  ;;  %v1548_v16 = vmul.f32 1.442695, %v1513_v12 }
 0x390   : > { %v1544_v28 = vmul.f32 1.442695, %v1511_v15 }
 0x391   : > { %v1428_v4 = vpop.xlane.xlu0 %1427 }
 0x392   : > { %3708 = vpow2.f32 %v1544_v28  ;;  %v1514_v24 = vsub.f32 %v4357_v29, %v1428_v4 }
 0x393   : > { %v1431_v17 = vpop.xlane.xlu1 %1430  ;;  %3710 = vpow2.f32 %v1548_v16 }
 0x394   : > { %v1550_v25 = vmul.f32 1.442695, %v1514_v24  ;;  %v1515_v19 = vsub.f32 %v4361_v32, %v1431_v17 }
 0x395   : > { %v1434_v26 = vpop.xlane.xlu0 %1433 }
 0x396   : > { %3712 = vpow2.f32 %v1550_v25  ;;  %v1552_v38 = vmul.f32 1.442695, %v1515_v19  ;;  %v1516_v21 = vsub.f32 %v4359_v31, %v1434_v26 }
 0x397   : > { %v1437_v30 = vpop.xlane.xlu1 %1436 }
 0x398   : > { %v4480_v33 = vpop.eup %3704  ;;  %3714 = vpow2.f32 %v1552_v38  ;;  %v1554_v23 = vmul.f32 1.442695, %v1516_v21  ;;  %v1517_v37 = vsub.f32 %v4365_v34, %v1437_v30 }
 0x399   : > { %v1440_v41 = vpop.xlane.xlu0 %1439  ;;  %v1606_v29 = vsel %vm1413_vm0, %v4480_v33, 0.0  ;;  %v4485_v42 = vpop.eup %3706 }
 0x39a   : > { %3716 = vpow2.f32 %v1554_v23  ;;  %v1556_v32 = vmul.f32 1.442695, %v1517_v37  ;;  %v1518_v43 = vsub.f32 %v4371_v40, %v1440_v41  ;;  %1607 = vadd.xlane.f32.xlu0 %v1606_v29  ;;  %v1612_v34 = vsel %vm1413_vm0, %v4485_v42, 0.0 }
 0x39b   : > { %v1443_v46 = vpop.xlane.xlu1 %1442 }
 0x39c   : > { %v4488_v31 = vpop.eup %3708  ;;  %3718 = vpow2.f32 %v1556_v32  ;;  %v1558_v49 = vmul.f32 1.442695, %v1518_v43  ;;  %v1519_v50 = vsub.f32 %v4377_v45, %v1443_v46 }
 0x39d   : > { %v1446_v51 = vpop.xlane.xlu0 %1445  ;;  %v1609_v55 = vsel %vm1413_vm0, %v4488_v31, 0.0  ;;  %v4495_v60 = vpop.eup %3710 }
 0x39e   : > { %3720 = vpow2.f32 %v1558_v49  ;;  %v1560_v61 = vmul.f32 1.442695, %v1519_v50  ;;  %v1520_v40 = vsub.f32 %v4375_v44, %v1446_v51  ;;  %1613 = vadd.xlane.f32.xlu0 %v1612_v34  ;;  %1610 = vadd.xlane.f32.xlu1 %v1609_v55  ;;  %v1615_v7 = vsel %vm1413_vm0, %v4495_v60, 0.0 }
 0x39f   : > { %v1449_v62 = vpop.xlane.xlu1 %1448 }
 0x3a0   : > { %v4498_v63 = vpop.eup %3712  ;;  %3722 = vpow2.f32 %v1560_v61  ;;  %v1562_v45 = vmul.f32 1.442695, %v1520_v40  ;;  %v1521_v1 = vsub.f32 %v4381_v47, %v1449_v62 }
 0x3a1   : > { %v1452_v2 = vpop.xlane.xlu0 %1451  ;;  %v1618_v3 = vsel %vm1413_vm0, %v4498_v63, 0.0 }
 0x3a2   : > { %v4505_v9 = vpop.eup %3714  ;;  %3724 = vpow2.f32 %v1562_v45  ;;  %v1564_v44 = vmul.f32 1.442695, %v1521_v1  ;;  %v1522_v10 = vsub.f32 %v4387_v52, %v1452_v2  ;;  %1619 = vadd.xlane.f32.xlu0 %v1618_v3  ;;  %1616 = vadd.xlane.f32.xlu1 %v1615_v7 }
 0x3a3   : > { %v1455_v11 = vpop.xlane.xlu1 %1454  ;;  %v1621_v28 = vsel %vm1413_vm0, %v4505_v9, 0.0 }
 0x3a4   : > { %v4508_v12 = vpop.eup %3716  ;;  %3726 = vpow2.f32 %v1564_v44  ;;  %v1566_v47 = vmul.f32 1.442695, %v1522_v10  ;;  %v1523_v14 = vsub.f32 %v4393_v57, %v1455_v11 }
 0x3a5   : > { %v1458_v15 = vpop.xlane.xlu0 %1457  ;;  %v1624_v16 = vsel %vm1413_vm0, %v4508_v12, 0.0 }
 0x3a6   : > { %v4515_v4 = vpop.eup %3718  ;;  %3728 = vpow2.f32 %v1566_v47  ;;  %v1568_v52 = vmul.f32 1.442695, %v1523_v14  ;;  %v1524_v24 = vsub.f32 %v4391_v56, %v1458_v15  ;;  %1625 = vadd.xlane.f32.xlu0 %v1624_v16  ;;  %1622 = vadd.xlane.f32.xlu1 %v1621_v28 }
 0x3a7   : > { %v1461_v17 = vpop.xlane.xlu1 %1460  ;;  %v1627_v21 = vsel %vm1413_vm0, %v4515_v4, 0.0 }
 0x3a8   : > { %v4518_v25 = vpop.eup %3720  ;;  %3730 = vpow2.f32 %v1568_v52  ;;  %v1570_v57 = vmul.f32 1.442695, %v1524_v24  ;;  %v1525_v19 = vsub.f32 %v4397_v59, %v1461_v17 }
 0x3a9   : > { %v1464_v26 = vpop.xlane.xlu0 %1463  ;;  %v1630_v38 = vsel %vm1413_vm0, %v4518_v25, 0.0 }
 0x3aa   : > { %v4525_v30 = vpop.eup %3722  ;;  %3732 = vpow2.f32 %v1570_v57  ;;  %v1572_v56 = vmul.f32 1.442695, %v1525_v19  ;;  %v1526_v23 = vsub.f32 %v4403_v0, %v1464_v26  ;;  %1631 = vadd.xlane.f32.xlu0 %v1630_v38  ;;  %1628 = vadd.xlane.f32.xlu1 %v1627_v21 }
 0x3ab   : > { %v1467_v37 = vpop.xlane.xlu1 %1466  ;;  %v1633_v46 = vsel %vm1413_vm0, %v4525_v30, 0.0 }
 0x3ac   : > { %v4528_v41 = vpop.eup %3724  ;;  %3734 = vpow2.f32 %v1572_v56  ;;  %v1574_v59 = vmul.f32 1.442695, %v1526_v23  ;;  %v1527_v29 = vsub.f32 %v4409_v6, %v1467_v37 }
 0x3ad   : > { %v1470_v32 = vpop.xlane.xlu0 %1469  ;;  %v1636_v43 = vsel %vm1413_vm0, %v4528_v41, 0.0 }
 0x3ae   : > { %v4535_v49 = vpop.eup %3726  ;;  %3736 = vpow2.f32 %v1574_v59  ;;  %v1576_v0 = vmul.f32 1.442695, %v1527_v29  ;;  %v1528_v50 = vsub.f32 %v4407_v5, %v1470_v32  ;;  %1637 = vadd.xlane.f32.xlu0 %v1636_v43  ;;  %1634 = vadd.xlane.f32.xlu1 %v1633_v46 }
 0x3af   : > { %v1473_v51 = vpop.xlane.xlu1 %1472  ;;  %v1639_v62 = vsel %vm1413_vm0, %v4535_v49, 0.0 }
 0x3b0   : > { %v4538_v34 = vpop.eup %3728  ;;  %3738 = vpow2.f32 %v1576_v0  ;;  %v1578_v6 = vmul.f32 1.442695, %v1528_v50  ;;  %v1529_v55 = vsub.f32 %v4413_v8, %v1473_v51 }
 0x3b1   : > { %v1476_v61 = vpop.xlane.xlu0 %1475  ;;  %v1642_v40 = vsel %vm1413_vm0, %v4538_v34, 0.0 }
 0x3b2   : > { %v4545_v45 = vpop.eup %3730  ;;  %3740 = vpow2.f32 %v1578_v6  ;;  %v1580_v5 = vmul.f32 1.442695, %v1529_v55  ;;  %v1530_v1 = vsub.f32 %v4419_v13, %v1476_v61  ;;  %1643 = vadd.xlane.f32.xlu0 %v1642_v40  ;;  %1640 = vadd.xlane.f32.xlu1 %v1639_v62 }
 0x3b3   : > { %v1479_v2 = vpop.xlane.xlu1 %1478  ;;  %v1645_v11 = vsel %vm1413_vm0, %v4545_v45, 0.0 }
 0x3b4   : > { %v4548_v3 = vpop.eup %3732  ;;  %3742 = vpow2.f32 %v1580_v5  ;;  %v1582_v8 = vmul.f32 1.442695, %v1530_v1  ;;  %v1531_v7 = vsub.f32 %v4425_v20, %v1479_v2 }
 0x3b5   : > { %v1482_v44 = vpop.xlane.xlu0 %1481  ;;  %v1648_v10 = vsel %vm1413_vm0, %v4548_v3, 0.0 }
 0x3b6   : > { %v4555_v47 = vpop.eup %3734  ;;  %3744 = vpow2.f32 %v1582_v8  ;;  %v1584_v13 = vmul.f32 1.442695, %v1531_v7  ;;  %v1532_v14 = vsub.f32 %v4423_v18, %v1482_v44  ;;  %1649 = vadd.xlane.f32.xlu0 %v1648_v10  ;;  %1646 = vadd.xlane.f32.xlu1 %v1645_v11 }
 0x3b7   : > { %v1485_v15 = vpop.xlane.xlu1 %1484  ;;  %v1651_v17 = vsel %vm1413_vm0, %v4555_v47, 0.0 }
 0x3b8   : > { %v4558_v16 = vpop.eup %3736  ;;  %3746 = vpow2.f32 %v1584_v13  ;;  %v1586_v20 = vmul.f32 1.442695, %v1532_v14  ;;  %v1533_v28 = vsub.f32 %v4429_v22, %v1485_v15 }
 0x3b9   : > { %v1488_v52 = vpop.xlane.xlu0 %1487  ;;  %v1654_v24 = vsel %vm1413_vm0, %v4558_v16, 0.0 }
 0x3ba   : > { %v4565_v57 = vpop.eup %3738  ;;  %3748 = vpow2.f32 %v1586_v20  ;;  %v1588_v18 = vmul.f32 1.442695, %v1533_v28  ;;  %v1534_v19 = vsub.f32 %v4435_v27, %v1488_v52  ;;  %1655 = vadd.xlane.f32.xlu0 %v1654_v24  ;;  %1652 = vadd.xlane.f32.xlu1 %v1651_v17 }
 0x3bb   : > { %v1491_v26 = vpop.xlane.xlu1 %1490  ;;  %v1657_v37 = vsel %vm1413_vm0, %v4565_v57, 0.0 }
 0x3bc   : > { %v4568_v38 = vpop.eup %3740  ;;  %3750 = vpow2.f32 %v1588_v18  ;;  %v1590_v22 = vmul.f32 1.442695, %v1534_v19  ;;  %v1535_v21 = vsub.f32 %v4441_v36, %v1491_v26 }
 0x3bd   : > { %v1494_v56 = vpop.xlane.xlu0 %1493  ;;  %v1660_v23 = vsel %vm1413_vm0, %v4568_v38, 0.0 }
 0x3be   : > { %v4575_v59 = vpop.eup %3742  ;;  %3752 = vpow2.f32 %v1590_v22  ;;  %v1592_v27 = vmul.f32 1.442695, %v1535_v21  ;;  %v1536_v29 = vsub.f32 %v4439_v35, %v1494_v56  ;;  %1661 = vadd.xlane.f32.xlu0 %v1660_v23  ;;  %1658 = vadd.xlane.f32.xlu1 %v1657_v37  ;;  %v3688_v37 = vld [vmem:[%s4933_s28] sm:$0xff]  }
 0x3bf   : > { %v1497_v32 = vpop.xlane.xlu1 %1496  ;;  %v1663_v51 = vsel %vm1413_vm0, %v4575_v59, 0.0  ;;  %3437 = vmatprep.subr.bf16.mxu0 %v3688_v37 }
 0x3c0   : > { %v4578_v43 = vpop.eup %3744  ;;  %3754 = vpow2.f32 %v1592_v27  ;;  %v1594_v36 = vmul.f32 1.442695, %v1536_v29  ;;  %v1537_v46 = vsub.f32 %v4445_v39, %v1497_v32  ;;  %v3689_v27 = vld [vmem:[%s4933_s28 + $0x8] sm:$0xff]   ;;  %3438 = vmatpush3.bf16.msra.mxu0 %v3688_v37  ;;  %v3690_v29 = vld [vmem:[%s4933_s28 + $0x10] sm:$0xff]   ;;  %v3691_v32 = vld [vmem:[%s4933_s28 + $0x18] sm:$0xff]  }
 0x3c1   : > { %v1500_v0 = vpop.xlane.xlu0 %1499  ;;  %v1666_v50 = vsel %vm1413_vm0, %v4578_v43, 0.0  ;;  %3439 = vmatprep.subr.bf16.mxu0 %v3689_v27 }
 0x3c2   : > { %v4585_v6 = vpop.eup %3746  ;;  %3756 = vpow2.f32 %v1594_v36  ;;  %v1596_v35 = vmul.f32 1.442695, %v1537_v46  ;;  %v1538_v55 = vsub.f32 %v4451_v48, %v1500_v0  ;;  %1667 = vadd.xlane.f32.xlu0 %v1666_v50  ;;  %1664 = vadd.xlane.f32.xlu1 %v1663_v51  ;;  %v3692_v36 = vld [vmem:[%s4933_s28 + $0x20] sm:$0xff]   ;;  %v3693_v46 = vld [vmem:[%s4933_s28 + $0x28] sm:$0xff]   ;;  %v3694_v0 = vld [vmem:[%s4933_s28 + $0x30] sm:$0xff]  }
 0x3c3   : > { %v1503_v61 = vpop.xlane.xlu1 %1502  ;;  %v1669_v2 = vsel %vm1413_vm0, %v4585_v6, 0.0  ;;  %v3695_v50 = vld [vmem:[%s4933_s28 + $0x38] sm:$0xff]   ;;  %v3696_v51 = vld [vmem:[%s4934_s25] sm:$0xff]  }
 0x3c4   : > { %v4588_v40 = vpop.eup %3748  ;;  %3758 = vpow2.f32 %v1596_v35  ;;  %v1598_v39 = vmul.f32 1.442695, %v1538_v55  ;;  %v1539_v62 = vsub.f32 %v4457_v54, %v1503_v61  ;;  %3440 = vmatpush3.bf16.msra.mxu0 %v3689_v27  ;;  %v3697_v35 = vld [vmem:[%s4934_s25 + $0x8] sm:$0xff]   ;;  %v3833_v61 = vld [vmem:[%s4175_s12 + $0x10] sm:$0xff]  }
 0x3c5   : > { %v1506_v5 = vpop.xlane.xlu0 %1505  ;;  %v1672_v1 = vsel %vm1413_vm0, %v4588_v40, 0.0  ;;  %3441 = vmatprep.subr.bf16.mxu0 %v3690_v29  ;;  %v3832_v55 = vld [vmem:[%s4175_s12 + $0x8] sm:$0xff]  }
 0x3c6   : > { %v4595_v8 = vpop.eup %3750  ;;  %3760 = vpow2.f32 %v1598_v39  ;;  %v1600_v48 = vmul.f32 1.442695, %v1539_v62  ;;  %v1540_v7 = vsub.f32 %v4455_v53, %v1506_v5  ;;  %1673 = vadd.xlane.f32.xlu0 %v1672_v1  ;;  %1670 = vadd.xlane.f32.xlu1 %v1669_v2  ;;  %v3698_v39 = vld [vmem:[%s4934_s25 + $0x10] sm:$0xff]   ;;  %v3699_v62 = vld [vmem:[%s4934_s25 + $0x18] sm:$0xff]   ;;  %v3835_v1 = vld [vmem:[%s4175_s12 + $0x20] sm:$0xff]  }
 0x3c7   : > { %v1509_v44 = vpop.xlane.xlu1 %1508  ;;  %v1675_v14 = vsel %vm1413_vm0, %v4595_v8, 0.0  ;;  %v3834_v5 = vld [vmem:[%s4175_s12 + $0x18] sm:$0xff]   ;;  %v3700_v2 = vld [vmem:[%s4934_s25 + $0x20] sm:$0xff]  }
 0x3c8   : > { %v4598_v10 = vpop.eup %3752  ;;  %3762 = vpow2.f32 %v1600_v48  ;;  %v1602_v54 = vmul.f32 1.442695, %v1540_v7  ;;  %v1541_v11 = vsub.f32 %v4461_v58, %v1509_v44  ;;  %3442 = vmatpush3.bf16.msra.mxu0 %v3690_v29  ;;  %v3701_v7 = vld [vmem:[%s4934_s25 + $0x28] sm:$0xff]  }
 0x3c9   : > { %v1678_v13 = vsel %vm1413_vm0, %v4598_v10, 0.0  ;;  %3443 = vmatprep.subr.bf16.mxu0 %v3691_v32  ;;  %v3836_v44 = vld [vmem:[%s4175_s12 + $0x28] sm:$0xff]  }
 0x3ca   : > { %v4605_v15 = vpop.eup %3754  ;;  %3764 = vpow2.f32 %v1602_v54  ;;  %v1604_v20 = vmul.f32 1.442695, %v1541_v11  ;;  %1679 = vadd.xlane.f32.xlu0 %v1678_v13  ;;  %1676 = vadd.xlane.f32.xlu1 %v1675_v14  ;;  %v3837_v13 = vld [vmem:[%s4175_s12 + $0x30] sm:$0xff]  }
 0x3cb   : > { %v1681_v58 = vsel %vm1413_vm0, %v4605_v15, 0.0  ;;  %v3702_v14 = vld [vmem:[%s4934_s25 + $0x30] sm:$0xff]  }
 0x3cc   : > { %v4607_v53 = vpop.eup %3756  ;;  %3766 = vpow2.f32 %v1604_v20  ;;  %3444 = vmatpush3.bf16.msra.mxu0 %v3691_v32 }
 0x3cd   : > { %v1684_v28 = vsel %vm1413_vm0, %v4607_v53, 0.0  ;;  %3445 = vmatprep.subr.bf16.mxu0 %v3692_v36 }
 0x3ce   : > { %v4613_v52 = vpop.eup %3758  ;;  %1685 = vadd.xlane.f32.xlu0 %v1684_v28  ;;  %1682 = vadd.xlane.f32.xlu1 %v1681_v58  ;;  %v3838_v58 = vld [vmem:[%s4175_s12 + $0x38] sm:$0xff]  }
 0x3cf   : > { %v1687_v18 = vsel %vm1413_vm0, %v4613_v52, 0.0 }
 0x3d0   : > { %v4615_v24 = vpop.eup %3760  ;;  %3446 = vmatpush3.bf16.msra.mxu0 %v3692_v36 }
 0x3d1   : > { %v1690_v17 = vsel %vm1413_vm0, %v4615_v24, 0.0  ;;  %3447 = vmatprep.subr.bf16.mxu0 %v3693_v46 }
 0x3d2   : > { %v4621_v19 = vpop.eup %3762  ;;  %1691 = vadd.xlane.f32.xlu0 %v1690_v17  ;;  %1688 = vadd.xlane.f32.xlu1 %v1687_v18 }
 0x3d3   : > { %v1693_v21 = vsel %vm1413_vm0, %v4621_v19, 0.0 }
 0x3d4   : > { %v4623_v26 = vpop.eup %3764  ;;  %3448 = vmatpush3.bf16.msra.mxu0 %v3693_v46 }
 0x3d5   : > { %v1696_v22 = vsel %vm1413_vm0, %v4623_v26, 0.0  ;;  %3449 = vmatprep.subr.bf16.mxu0 %v3694_v0 }
 0x3d6   : > { %v4629_v56 = vpop.eup %3766  ;;  %1697 = vadd.xlane.f32.xlu0 %v1696_v22  ;;  %1694 = vadd.xlane.f32.xlu1 %v1693_v21  ;;  %v3839_v22 = vld [vmem:[%s4175_s12 + $0x40] sm:$0xff]  }
 0x3d7   : > { %v1699_v23 = vsel %vm1413_vm0, %v4629_v56, 0.0 }
 0x3d8   : > { %3450 = vmatpush3.bf16.msra.mxu0 %v3694_v0  ;;  %v3840_v0 = vld [vmem:[%s4175_s12 + $0x48] sm:$0xff]  }
 0x3d9   : > { %3451 = vmatprep.subr.bf16.mxu0 %v3695_v50 }
 0x3da   : > { %1700 = vadd.xlane.f32.xlu1 %v1699_v23 }
 0x3dc   : > { %3452 = vmatpush3.bf16.msra.mxu0 %v3695_v50 }
 0x3dd   : > { %3485 = vmatprep.subr.bf16.mxu0 %v3696_v51 }
 0x3df   : > { %3454 = vmatmul.mubr.bf16.vlgmr.msra.gmra.mrb[32].mxu0 %v3832_v55  ;;  %v3841_v55 = vld [vmem:[%s4175_s12 + $0x50] sm:$0xff]  }
 0x3e0   : > { %3486 = vmatpush3.bf16.msra.mxu0 %v3696_v51  ;;  %3457 = vmatprep.mubr.bf16.mxu0 %v3833_v61 }
 0x3e1   : > { %3487 = vmatprep.subr.bf16.mxu0 %v3697_v35 }
 0x3e4   : > { %3488 = vmatpush3.bf16.msra.mxu0 %v3697_v35 }
 0x3e5   : > { %3489 = vmatprep.subr.bf16.mxu0 %v3698_v39 }
 0x3e7   : > { %3458 = vmatmul.mubr.bf16.gmra.mrb[36].mxu0 %v3834_v5 }
 0x3e8   : > { %3461 = vmatprep.mubr.bf16.mxu0 %v3835_v1  ;;  %3490 = vmatpush3.bf16.msra.mxu0 %v3698_v39 }
 0x3e9   : > { %3491 = vmatprep.subr.bf16.mxu0 %v3699_v62 }
 0x3ec   : > { %3492 = vmatpush3.bf16.msra.mxu0 %v3699_v62 }
 0x3ed   : > { %3493 = vmatprep.subr.bf16.mxu0 %v3700_v2 }
 0x3ef   : > { %3462 = vmatmul.mubr.bf16.gmra.mrb[40].mxu0 %v3836_v44 }
 0x3f0   : > { %3465 = vmatprep.mubr.bf16.mxu0 %v3837_v13  ;;  %3494 = vmatpush3.bf16.msra.mxu0 %v3700_v2  ;;  %v3843_v13 = vld [vmem:[%s4175_s12 + $0x60] sm:$0xff]  }
 0x3f1   : > { %3495 = vmatprep.subr.bf16.mxu0 %v3701_v7 }
 0x3f4   : > { %3496 = vmatpush3.bf16.msra.mxu0 %v3701_v7 }
 0x3f5   : > { %3497 = vmatprep.subr.bf16.mxu0 %v3702_v14 }
 0x3f7   : > { %3466 = vmatmul.mubr.bf16.gmra.mrb[44].mxu0 %v3838_v58 }
 0x3f8   : > { %3469 = vmatprep.mubr.bf16.mxu0 %v3839_v22  ;;  %3498 = vmatpush3.bf16.msra.mxu0 %v3702_v14 }
 0x3ff   : > { %3470 = vmatmul.mubr.bf16.gmra.mrb[48].mxu0 %v3840_v0 }
 0x400   : > { %3473 = vmatprep.mubr.bf16.mxu0 %v3841_v55 }
 0x427   : > { %v1608_v48 = vpop.xlane.xlu0 %1607 }
 0x428   : > { %3768 = vrcp.f32 %v1608_v48 }
 0x42b   : > { %v1614_v54 = vpop.xlane.xlu0 %1613  ;;  %v1611_v11 = vpop.xlane.xlu1 %1610 }
 0x42c   : > { %3770 = vrcp.f32 %v1611_v11 }
 0x42d   : > { %3772 = vrcp.f32 %v1614_v54 }
 0x42f   : > { %v1620_v20 = vpop.xlane.xlu0 %1619  ;;  %v1617_v28 = vpop.xlane.xlu1 %1616 }
 0x430   : > { %3774 = vrcp.f32 %v1617_v28 }
 0x431   : > { %3776 = vrcp.f32 %v1620_v20 }
 0x432   : > { %v3769_v21 = vpop.eup %3768 }
 0x433   : > { %v1626_v17 = vpop.xlane.xlu0 %1625  ;;  %v1623_v18 = vpop.xlane.xlu1 %1622  ;;  %v1734_v29 = vmul.f32 %v3769_v21, %v4480_v33 }
 0x434   : > { %3778 = vrcp.f32 %v1623_v18 }
 0x435   : > { %3780 = vrcp.f32 %v1626_v17 }
 0x436   : > { %v3771_v23 = vpop.eup %3770 }
 0x437   : > { %v1632_v37 = vpop.xlane.xlu0 %1631  ;;  %v1629_v27 = vpop.xlane.xlu1 %1628  ;;  %v1735_v32 = vmul.f32 %v3771_v23, %v4488_v31 }
 0x438   : > { %v3773_v36 = vpop.eup %3772  ;;  %3782 = vrcp.f32 %v1629_v27 }
 0x439   : > { %v1766_v46 = vpack.c.bf16 %v1735_v32, %v1734_v29  ;;  %3784 = vrcp.f32 %v1632_v37  ;;  %v1736_v61 = vmul.f32 %v3773_v36, %v4485_v42  ;;  %v3845_v29 = vld [vmem:[%s4175_s12 + $0x70] sm:$0xff]  }
 0x43a   : > { %v3775_v50 = vpop.eup %3774 }
 0x43b   : > { %v1638_v51 = vpop.xlane.xlu0 %1637  ;;  %v1635_v35 = vpop.xlane.xlu1 %1634  ;;  %v1737_v39 = vmul.f32 %v3775_v50, %v4495_v60  ;;  %3405 = vmatprep.mubr.msk.bf16.mxu1 %vm1413_vm0, %v1766_v46  ;;  %v3842_v60 = vld [vmem:[%s4175_s12 + $0x58] sm:$0xff]  }
 0x43c   : > { %v3777_v33 = vpop.eup %3776  ;;  %3786 = vrcp.f32 %v1635_v35  ;;  %3474 = vmatmul.mubr.bf16.gmra.mrb[52].mxu0 %v3842_v60 }
 0x43d   : > { %v1767_v31 = vpack.c.bf16 %v1737_v39, %v1736_v61  ;;  %3788 = vrcp.f32 %v1638_v51  ;;  %v1738_v2 = vmul.f32 %v3777_v33, %v4498_v63  ;;  %3477 = vmatprep.mubr.bf16.mxu0 %v3843_v13  ;;  %v3846_v39 = vld [vmem:[%s4175_s12 + $0x78] sm:$0xff]  }
 0x43e   : > { %v3779_v62 = vpop.eup %3778 }
 0x43f   : > { %v1644_v5 = vpop.xlane.xlu0 %1643  ;;  %v1641_v1 = vpop.xlane.xlu1 %1640  ;;  %3406 = vmatmul.mubr.msk.bf16.vlgmr.msra.gmra.mrb[64].mxu1 %vm1413_vm0, %v1767_v31  ;;  %v1739_v48 = vmul.f32 %v3779_v62, %v4505_v9 }
 0x440   : > { %v3781_v42 = vpop.eup %3780  ;;  %3790 = vrcp.f32 %v1641_v1 }
 0x441   : > { %v1768_v7 = vpack.c.bf16 %v1739_v48, %v1738_v2  ;;  %3792 = vrcp.f32 %v1644_v5  ;;  %v1740_v14 = vmul.f32 %v3781_v42, %v4508_v12  ;;  %v3844_v12 = vld [vmem:[%s4175_s12 + $0x68] sm:$0xff]   ;;  %s2746_s12 = sadd.s32 %s2989_s13, %s2988_s30  ;;  %s3881_s30 = sshll.u32 %s3980_s20, 4  ;;  %s3882_s30 = int_to_ptr.vmem [resolvable:$false] %s3881_s30 }
 0x442   : > { %v3783_v44 = vpop.eup %3782  ;;  %s2990_s21 = sshll.u32 %s2746_s12, 6  ;;  %s3883_s13 = scalar_lea.vmem %s3882_s30, 4096 }
 0x443   : > { %v1650_v54 = vpop.xlane.xlu0 %1649  ;;  %v1647_v11 = vpop.xlane.xlu1 %1646  ;;  %3409 = vmatprep.mubr.msk.bf16.mxu1 %vm1413_vm0, %v1768_v7  ;;  %v1741_v63 = vmul.f32 %v3783_v44, %v4515_v4  ;;  %p3884_p13 = scmp.lt.s32.totalorder %s4844_s10, %s3882_s30 }
 0x444   : > { %v3785_v20 = vpop.eup %3784  ;;  %3794 = vrcp.f32 %v1647_v11  ;;  %3478 = vmatmul.mubr.bf16.gmra.mrb[56].mxu0 %v3844_v12 }
 0x445   : > { %v1769_v9 = vpack.c.bf16 %v1741_v63, %v1740_v14  ;;  %3796 = vrcp.f32 %v1650_v54  ;;  %v1742_v18 = vmul.f32 %v3785_v20, %v4518_v25  ;;  %3481 = vmatprep.mubr.bf16.mxu0 %v3845_v29 }
 0x446   : > { %v3787_v28 = vpop.eup %3786 }
 0x447   : > { %v1656_v58 = vpop.xlane.xlu0 %1655  ;;  %v1653_v17 = vpop.xlane.xlu1 %1652  ;;  %3410 = vmatmul.mubr.msk.bf16.gmra.mrb[68].mxu1 %vm1413_vm0, %v1769_v9  ;;  %v1743_v22 = vmul.f32 %v3787_v28, %v4525_v30 }
 0x448   : > { %v3789_v21 = vpop.eup %3788  ;;  %3798 = vrcp.f32 %v1653_v17 }
 0x449   : > { %v1770_v23 = vpack.c.bf16 %v1743_v22, %v1742_v18  ;;  %3800 = vrcp.f32 %v1656_v58  ;;  %v1744_v32 = vmul.f32 %v3789_v21, %v4528_v41 }
 0x44a   : > { %v3791_v4 = vpop.eup %3790 }
 0x44b   : > { %v1662_v37 = vpop.xlane.xlu0 %1661  ;;  %v1659_v27 = vpop.xlane.xlu1 %1658  ;;  %3413 = vmatprep.mubr.msk.bf16.mxu1 %vm1413_vm0, %v1770_v23  ;;  %v1745_v25 = vmul.f32 %v3791_v4, %v4535_v49 }
 0x44c   : > { %v3793_v36 = vpop.eup %3792  ;;  %3802 = vrcp.f32 %v1659_v27  ;;  %3482 = vmatmul.mubr.bf16.gmra.mrb[60].mxu0 %v3846_v39 }
 0x44d   : > { %v1771_v30 = vpack.c.bf16 %v1745_v25, %v1744_v32  ;;  %3804 = vrcp.f32 %v1662_v37  ;;  %v1746_v51 = vmul.f32 %v3793_v36, %v4538_v34 }
 0x44e   : > { %v3795_v46 = vpop.eup %3794 }
 0x44f   : > { %v1668_v0 = vpop.xlane.xlu0 %1667  ;;  %v1665_v50 = vpop.xlane.xlu1 %1664  ;;  %3414 = vmatmul.mubr.msk.bf16.gmra.mrb[72].mxu1 %vm1413_vm0, %v1771_v30  ;;  %v1747_v35 = vmul.f32 %v3795_v46, %v4545_v45 }
 0x450   : > { %v3797_v55 = vpop.eup %3796  ;;  %3806 = vrcp.f32 %v1665_v50 }
 0x451   : > { %v1772_v61 = vpack.c.bf16 %v1747_v35, %v1746_v51  ;;  %3808 = vrcp.f32 %v1668_v0  ;;  %v1748_v31 = vmul.f32 %v3797_v55, %v4548_v3 }
 0x452   : > { %v3799_v41 = vpop.eup %3798 }
 0x453   : > { %v1674_v49 = vpop.xlane.xlu0 %1673  ;;  %v1671_v33 = vpop.xlane.xlu1 %1670  ;;  %3417 = vmatprep.mubr.msk.bf16.mxu1 %vm1413_vm0, %v1772_v61  ;;  %v1749_v62 = vmul.f32 %v3799_v41, %v4555_v47 }
 0x454   : > { %v3801_v5 = vpop.eup %3800  ;;  %3810 = vrcp.f32 %v1671_v33 }
 0x455   : > { %v1773_v34 = vpack.c.bf16 %v1749_v62, %v1748_v31  ;;  %3812 = vrcp.f32 %v1674_v49  ;;  %v1750_v48 = vmul.f32 %v3801_v5, %v4558_v16 }
 0x456   : > { %v3803_v1 = vpop.eup %3802 }
 0x457   : > { %v1680_v45 = vpop.xlane.xlu0 %1679  ;;  %v1677_v2 = vpop.xlane.xlu1 %1676  ;;  %3418 = vmatmul.mubr.msk.bf16.gmra.mrb[76].mxu1 %vm1413_vm0, %v1773_v34  ;;  %v1751_v42 = vmul.f32 %v3803_v1, %v4565_v57 }
 0x458   : > { %v3805_v7 = vpop.eup %3804  ;;  %3814 = vrcp.f32 %v1677_v2 }
 0x459   : > { %v1774_v60 = vpack.c.bf16 %v1751_v42, %v1750_v48  ;;  %3816 = vrcp.f32 %v1680_v45  ;;  %v1752_v54 = vmul.f32 %v3805_v7, %v4568_v38 }
 0x45a   : > { %v3807_v44 = vpop.eup %3806 }
 0x45b   : > { %v1686_v3 = vpop.xlane.xlu0 %1685  ;;  %v1683_v47 = vpop.xlane.xlu1 %1682  ;;  %3421 = vmatprep.mubr.msk.bf16.mxu1 %vm1413_vm0, %v1774_v60  ;;  %v1753_v11 = vmul.f32 %v3807_v44, %v4575_v59 }
 0x45c   : > { %v3809_v13 = vpop.eup %3808  ;;  %3818 = vrcp.f32 %v1683_v47 }
 0x45d   : > { %v1775_v14 = vpack.c.bf16 %v1753_v11, %v1752_v54  ;;  %3820 = vrcp.f32 %v1686_v3  ;;  %v1754_v20 = vmul.f32 %v3809_v13, %v4578_v43 }
 0x45e   : > { %v3811_v63 = vpop.eup %3810 }
 0x45f   : > { %v1692_v16 = vpop.xlane.xlu0 %1691  ;;  %v1689_v57 = vpop.xlane.xlu1 %1688  ;;  %3422 = vmatmul.mubr.msk.bf16.gmra.mrb[80].mxu1 %vm1413_vm0, %v1775_v14  ;;  %v1755_v9 = vmul.f32 %v3811_v63, %v4585_v6 }
 0x460   : > { %v3813_v28 = vpop.eup %3812  ;;  %3822 = vrcp.f32 %v1689_v57 }
 0x461   : > { %v1776_v58 = vpack.c.bf16 %v1755_v9, %v1754_v20  ;;  %3824 = vrcp.f32 %v1692_v16  ;;  %v1756_v18 = vmul.f32 %v3813_v28, %v4588_v40 }
 0x462   : > { %v3815_v17 = vpop.eup %3814 }
 0x463   : > { %v1698_v38 = vpop.xlane.xlu0 %1697  ;;  %v1695_v59 = vpop.xlane.xlu1 %1694  ;;  %3425 = vmatprep.mubr.msk.bf16.mxu1 %vm1413_vm0, %v1776_v58  ;;  %v1757_v22 = vmul.f32 %v3815_v17, %v4595_v8 }
 0x464   : > { %v3817_v21 = vpop.eup %3816  ;;  %3826 = vrcp.f32 %v1695_v59 }
 0x465   : > { %3828 = vrcp.f32 %v1698_v38  ;;  %v1777_v23 = vpack.c.bf16 %v1757_v22, %v1756_v18  ;;  %v1758_v6 = vmul.f32 %v3817_v21, %v4598_v10 }
 0x466   : > { %v3819_v43 = vpop.eup %3818 }
 0x467   : > { %v1701_v12 = vpop.xlane.xlu1 %1700  ;;  %3426 = vmatmul.mubr.msk.bf16.gmra.mrb[84].mxu1 %vm1413_vm0, %v1777_v23  ;;  %v1759_v4 = vmul.f32 %v3819_v43, %v4605_v15  ;;  %v3821_v37 = vpop.eup %3820 }
 0x468   : > { %3830 = vrcp.f32 %v1701_v12  ;;  %v1760_v40 = vmul.f32 %v3821_v37, %v4607_v53 }
 0x469   : > { %v1778_v27 = vpack.c.bf16 %v1759_v4, %v1758_v6 }
 0x46a   : > { %v3823_v29 = vpop.eup %3822 }
 0x46b   : > { %3429 = vmatprep.mubr.msk.bf16.mxu1 %vm1413_vm0, %v1778_v27  ;;  %v1761_v8 = vmul.f32 %v3823_v29, %v4613_v52  ;;  %v3825_v32 = vpop.eup %3824  ;;  %v3703_v52 = vld [vmem:[%s4934_s25 + $0x38] sm:$0xff]  }
 0x46c   : > { %v1762_v46 = vmul.f32 %v3825_v32, %v4615_v24  ;;  %3499 = vmatprep.subr.bf16.mxu0 %v3703_v52  ;;  %v4747_v24 = vld [vmem:[%s4935_s8] ss:$0 sm:$0xff]  ;;  %s4938_s8 = sld [smem:[#allocation16_spill]] }
 0x46d   : > { %v1779_v25 = vpack.c.bf16 %v1761_v8, %v1760_v40  ;;  %3500 = vmatpush3.bf16.msra.mxu0 %v3703_v52 }
 0x46e   : > { %v3827_v36 = vpop.eup %3826 }
 0x46f   : > { %v3829_v30 = vpop.eup %3828  ;;  %3430 = vmatmul.mubr.msk.bf16.gmra.mrb[88].mxu1 %vm1413_vm0, %v1779_v25  ;;  %v1763_v10 = vmul.f32 %v3827_v36, %v4621_v19 }
 0x470   : > { %v1764_v50 = vmul.f32 %v3829_v30, %v4623_v26 }
 0x471   : > { %v1780_v0 = vpack.c.bf16 %v1763_v10, %v1762_v46 }
 0x472   : > { %v3831_v15 = vpop.eup %3830  ;;  %s4842_s26 = scalar_lea.hbm %s4938_s8, %s2990_s21 }
 0x473   : > { %v1765_v51 = vmul.f32 %v3831_v15, %v4629_v56  ;;  %3433 = vmatprep.mubr.msk.bf16.mxu1 %vm1413_vm0, %v1780_v0 }
 0x475   : > { %v1781_v53 = vpack.c.bf16 %v1765_v51, %v1764_v50 }
 0x477   : > { %3434 = vmatmul.mubr.msk.bf16.gmra.mrb[92].mxu1 %vm1413_vm0, %v1781_v53 }
 0x512   : > { %v3407_v19 = vpop.f32.mrb[64].mxu1 }
 0x513   : > { %v1886_v26 = vadd.f32 %v3407_v19, %v4747_v24  ;;  %v1877_v56 = vpop.f32.mrb[65].mxu1 }
 0x514   : > { %v1878_v35 = vadd.f32 %v4747_v24, %v1877_v56  ;;  %v3408_v55 = vpop.f32.mrb[66].mxu1 }
 0x515   : > { %v1889_v61 = vadd.f32 %v3408_v55, %v4747_v24  ;;  %v1880_v39 = vpop.f32.mrb[67].mxu1  ;;  %v2006_v49 = vmax.f32 %v1886_v26, 0.0 }
 0x516   : > { %v1881_v41 = vadd.f32 %v4747_v24, %v1880_v39  ;;  %v2004_v31 = vmax.f32 %v1878_v35, 0.0 }
 0x517   : > { %v2007_v33 = vmax.f32 %v1889_v61, 0.0 }
 0x518   : > { %v2005_v62 = vmax.f32 %v1881_v41, 0.0 }
 0x519   : > { %v2037_v5 = vpack.c.bf16 %v2007_v33, %v2006_v49 }
 0x51a   : > { %v2036_v34 = vpack.c.bf16 %v2005_v62, %v2004_v31  ;;  %v3411_v1 = vpop.f32.mrb[68].mxu1 }
 0x51b   : > { %v1902_v45 = vadd.f32 %v3411_v1, %v4747_v24  ;;  %v1893_v2 = vpop.f32.mrb[69].mxu1 }
 0x51c   : > { %v1894_v48 = vadd.f32 %v4747_v24, %v1893_v2  ;;  %v3412_v42 = vpop.f32.mrb[70].mxu1  ;;  %3501 = vmatprep.mubr.bf16.mxu0 %v2036_v34 }
 0x51d   : > { %v1905_v7 = vadd.f32 %v3412_v42, %v4747_v24  ;;  %v1896_v60 = vpop.f32.mrb[71].mxu1  ;;  %3502 = vmatmul.mubr.bf16.vlgmr.msra.gmra.mrb[32].mxu0 %v2037_v5  ;;  %v2010_v3 = vmax.f32 %v1902_v45, 0.0 }
 0x51e   : > { %v1897_v44 = vadd.f32 %v4747_v24, %v1896_v60  ;;  %v2008_v54 = vmax.f32 %v1894_v48, 0.0 }
 0x51f   : > { %v2011_v47 = vmax.f32 %v1905_v7, 0.0 }
 0x520   : > { %v2009_v11 = vmax.f32 %v1897_v44, 0.0 }
 0x521   : > { %v2039_v13 = vpack.c.bf16 %v2011_v47, %v2010_v3 }
 0x522   : > { %v2038_v14 = vpack.c.bf16 %v2009_v11, %v2008_v54  ;;  %v3415_v63 = vpop.f32.mrb[72].mxu1 }
 0x523   : > { %v1918_v16 = vadd.f32 %v3415_v63, %v4747_v24  ;;  %v1909_v57 = vpop.f32.mrb[73].mxu1 }
 0x524   : > { %v1910_v20 = vadd.f32 %v4747_v24, %v1909_v57  ;;  %v3416_v9 = vpop.f32.mrb[74].mxu1  ;;  %3505 = vmatprep.mubr.bf16.mxu0 %v2038_v14 }
 0x525   : > { %v1921_v28 = vadd.f32 %v3416_v9, %v4747_v24  ;;  %v1912_v58 = vpop.f32.mrb[75].mxu1  ;;  %3506 = vmatmul.mubr.bf16.gmra.mrb[36].mxu0 %v2039_v13  ;;  %v2014_v38 = vmax.f32 %v1918_v16, 0.0 }
 0x526   : > { %v1913_v17 = vadd.f32 %v4747_v24, %v1912_v58  ;;  %v2012_v18 = vmax.f32 %v1910_v20, 0.0 }
 0x527   : > { %v2015_v59 = vmax.f32 %v1921_v28, 0.0 }
 0x528   : > { %v2013_v22 = vmax.f32 %v1913_v17, 0.0 }
 0x529   : > { %v2041_v21 = vpack.c.bf16 %v2015_v59, %v2014_v38 }
 0x52a   : > { %v2040_v23 = vpack.c.bf16 %v2013_v22, %v2012_v18  ;;  %v3419_v43 = vpop.f32.mrb[76].mxu1 }
 0x52b   : > { %v1934_v12 = vadd.f32 %v3419_v43, %v4747_v24  ;;  %v1925_v6 = vpop.f32.mrb[77].mxu1 }
 0x52c   : > { %v1926_v4 = vadd.f32 %v4747_v24, %v1925_v6  ;;  %v3420_v37 = vpop.f32.mrb[78].mxu1  ;;  %3509 = vmatprep.mubr.bf16.mxu0 %v2040_v23 }
 0x52d   : > { %v1937_v27 = vadd.f32 %v3420_v37, %v4747_v24  ;;  %v1928_v29 = vpop.f32.mrb[79].mxu1  ;;  %3510 = vmatmul.mubr.bf16.gmra.mrb[40].mxu0 %v2041_v21  ;;  %v2018_v8 = vmax.f32 %v1934_v12, 0.0 }
 0x52e   : > { %v1929_v40 = vadd.f32 %v4747_v24, %v1928_v29  ;;  %v2016_v25 = vmax.f32 %v1926_v4, 0.0 }
 0x52f   : > { %v2019_v32 = vmax.f32 %v1937_v27, 0.0 }
 0x530   : > { %v2017_v36 = vmax.f32 %v1929_v40, 0.0  ;;  %v4784_v40 = vld [vmem:[%s4936_s7] ss:$0 sm:$0xff]  ;;  %s3877_s7 = scalar_lea.vmem %s4844_s10, 2048 }
 0x531   : > { %v2043_v30 = vpack.c.bf16 %v2019_v32, %v2018_v8  ;;  %p3878_p9 = scmp.ne.s32.totalorder %s4844_s10, %s3877_s7  ;;  %p3885_p1 = scmp.lt.s32.totalorder %s3883_s13, %s3877_s7 }
 0x532   : > { %v2042_v46 = vpack.c.bf16 %v2017_v36, %v2016_v25  ;;  %v3423_v10 = vpop.f32.mrb[80].mxu1 }
 0x533   : > { %v1950_v15 = vadd.f32 %v3423_v10, %v4747_v24  ;;  %v1941_v0 = vpop.f32.mrb[81].mxu1  ;;  %p3879_p0 = pnand %p3878_p9, %p4939_p12  ;;  %p3886_p3 = por %p3885_p1, %p3884_p13 }
 0x534   : > { %v1942_v50 = vadd.f32 %v4747_v24, %v1941_v0  ;;  %v3424_v51 = vpop.f32.mrb[82].mxu1  ;;  %3513 = vmatprep.mubr.bf16.mxu0 %v2042_v46 }
 0x535   : > { %v1953_v53 = vadd.f32 %v3424_v51, %v4747_v24  ;;  %v1944_v52 = vpop.f32.mrb[83].mxu1  ;;  %3514 = vmatmul.mubr.bf16.gmra.mrb[44].mxu0 %v2043_v30  ;;  %v2022_v26 = vmax.f32 %v1950_v15, 0.0  ;;  %p3880_p11 = pneg %p3879_p0 }
 0x536   : > { %v1945_v19 = vadd.f32 %v4747_v24, %v1944_v52  ;;  %v2020_v35 = vmax.f32 %v1942_v50, 0.0 }
 0x537   : > { %v2023_v56 = vmax.f32 %v1953_v53, 0.0  ;;  %p3887_p5 = pnand %p3886_p3, %p3880_p11 }
 0x538   : > { %v2021_v55 = vmax.f32 %v1945_v19, 0.0 }
 0x539   : > { %v2045_v61 = vpack.c.bf16 %v2023_v56, %v2022_v26 }
 0x53a   : > { %v2044_v39 = vpack.c.bf16 %v2021_v55, %v2020_v35  ;;  %v3427_v41 = vpop.f32.mrb[84].mxu1 }
 0x53b   : > { %v1966_v49 = vadd.f32 %v3427_v41, %v4747_v24  ;;  %v1957_v33 = vpop.f32.mrb[85].mxu1 }
 0x53c   : > { %v1958_v31 = vadd.f32 %v4747_v24, %v1957_v33  ;;  %v3428_v62 = vpop.f32.mrb[86].mxu1  ;;  %3517 = vmatprep.mubr.bf16.mxu0 %v2044_v39 }
 0x53d   : > { %v1969_v5 = vadd.f32 %v3428_v62, %v4747_v24  ;;  %v1960_v34 = vpop.f32.mrb[87].mxu1  ;;  %3518 = vmatmul.mubr.bf16.gmra.mrb[48].mxu0 %v2045_v61  ;;  %v2026_v45 = vmax.f32 %v1966_v49, 0.0 }
 0x53e   : > { %v1961_v1 = vadd.f32 %v4747_v24, %v1960_v34  ;;  %v2024_v48 = vmax.f32 %v1958_v31, 0.0 }
 0x53f   : > { %v2027_v2 = vmax.f32 %v1969_v5, 0.0 }
 0x540   : > { %v2025_v42 = vmax.f32 %v1961_v1, 0.0 }
 0x541   : > { %v2047_v7 = vpack.c.bf16 %v2027_v2, %v2026_v45 }
 0x542   : > { %v2046_v60 = vpack.c.bf16 %v2025_v42, %v2024_v48  ;;  %v3431_v44 = vpop.f32.mrb[88].mxu1 }
 0x543   : > { %v1982_v3 = vadd.f32 %v3431_v44, %v4747_v24  ;;  %v1973_v47 = vpop.f32.mrb[89].mxu1 }
 0x544   : > { %v1974_v54 = vadd.f32 %v4747_v24, %v1973_v47  ;;  %v3432_v11 = vpop.f32.mrb[90].mxu1  ;;  %3521 = vmatprep.mubr.bf16.mxu0 %v2046_v60 }
 0x545   : > { %v1985_v13 = vadd.f32 %v3432_v11, %v4747_v24  ;;  %v1976_v14 = vpop.f32.mrb[91].mxu1  ;;  %3522 = vmatmul.mubr.bf16.gmra.mrb[52].mxu0 %v2047_v7  ;;  %v2030_v16 = vmax.f32 %v1982_v3, 0.0 }
 0x546   : > { %v1977_v63 = vadd.f32 %v4747_v24, %v1976_v14  ;;  %v2028_v20 = vmax.f32 %v1974_v54, 0.0 }
 0x547   : > { %v2031_v57 = vmax.f32 %v1985_v13, 0.0 }
 0x548   : > { %v2029_v9 = vmax.f32 %v1977_v63, 0.0 }
 0x549   : > { %v2049_v28 = vpack.c.bf16 %v2031_v57, %v2030_v16 }
 0x54a   : > { %v2048_v58 = vpack.c.bf16 %v2029_v9, %v2028_v20  ;;  %v3435_v17 = vpop.f32.mrb[92].mxu1 }
 0x54b   : > { %v1998_v38 = vadd.f32 %v3435_v17, %v4747_v24  ;;  %v1989_v59 = vpop.f32.mrb[93].mxu1 }
 0x54c   : > { %v1990_v18 = vadd.f32 %v4747_v24, %v1989_v59  ;;  %v3436_v22 = vpop.f32.mrb[94].mxu1  ;;  %3525 = vmatprep.mubr.bf16.mxu0 %v2048_v58 }
 0x54d   : > { %v2001_v21 = vadd.f32 %v3436_v22, %v4747_v24  ;;  %v1992_v23 = vpop.f32.mrb[95].mxu1  ;;  %3526 = vmatmul.mubr.bf16.gmra.mrb[56].mxu0 %v2049_v28  ;;  %v2034_v12 = vmax.f32 %v1998_v38, 0.0 }
 0x54e   : > { %v1993_v43 = vadd.f32 %v4747_v24, %v1992_v23  ;;  %v2032_v4 = vmax.f32 %v1990_v18, 0.0 }
 0x54f   : > { %v2035_v6 = vmax.f32 %v2001_v21, 0.0 }
 0x550   : > { %v2033_v37 = vmax.f32 %v1993_v43, 0.0 }
 0x551   : > { %v2051_v27 = vpack.c.bf16 %v2035_v6, %v2034_v12 }
 0x552   : > { %v2050_v29 = vpack.c.bf16 %v2033_v37, %v2032_v4 }
 0x554   : > { %3529 = vmatprep.mubr.bf16.mxu0 %v2050_v29 }
 0x555   : > { %3530 = vmatmul.mubr.bf16.gmra.mrb[60].mxu0 %v2051_v27 }
 0x5f0   : > { %v3503_v8 = vpop.f32.mrb[32].mxu0 }
 0x5f1   : > { %v2511_v32 = vadd.f32 %v3503_v8, %v4784_v40  ;;  %v2375_v25 = vpop.f32.mrb[33].mxu0 }
 0x5f2   : > { %v2509_v24 = vadd.f32 %v4784_v40, %v2375_v25  ;;  %v3504_v36 = vpop.f32.mrb[34].mxu0 }
 0x5f3   : > { %v2512_v30 = vadd.f32 %v3504_v36, %v4784_v40  ;;  %v2378_v46 = vpop.f32.mrb[35].mxu0  ;;  %v2543_v15 = vmax.f32 %v2511_v32, 0.0 }
 0x5f4   : > { %v2510_v10 = vadd.f32 %v4784_v40, %v2378_v46  ;;  %v2541_v50 = vmax.f32 %v2509_v24, 0.0 }
 0x5f5   : > { %v2544_v0 = vmax.f32 %v2512_v30, 0.0 }
 0x5f6   : > { %v2542_v51 = vmax.f32 %v2510_v10, 0.0 }
 0x5f7   : > { %v3035_v53 = vpack.c.bf16 %v2544_v0, %v2543_v15 }
 0x5f8   : > { %v3030_v52 = vpack.c.bf16 %v2542_v51, %v2541_v50  ;;  %v3507_v19 = vpop.f32.mrb[36].mxu0 }
 0x5f9   : > { %3107 = vst [vmem:[%s4792_s16 + $0x8] sm:$0xff] %v3035_v53   ;;  %v2515_v26 = vadd.f32 %v3507_v19, %v4784_v40  ;;  %v2391_v56 = vpop.f32.mrb[37].mxu0 }
 0x5fa   : > { %3031 = vst [vmem:[%s4792_s16] sm:$0xff] %v3030_v52   ;;  %v2513_v35 = vadd.f32 %v4784_v40, %v2391_v56  ;;  %v3508_v55 = vpop.f32.mrb[38].mxu0 }
 0x5fb   : > { %v2516_v61 = vadd.f32 %v3508_v55, %v4784_v40  ;;  %v2394_v39 = vpop.f32.mrb[39].mxu0  ;;  %v2547_v49 = vmax.f32 %v2515_v26, 0.0 }
 0x5fc   : > { %v2514_v41 = vadd.f32 %v4784_v40, %v2394_v39  ;;  %v2545_v31 = vmax.f32 %v2513_v35, 0.0 }
 0x5fd   : > { %v2548_v33 = vmax.f32 %v2516_v61, 0.0 }
 0x5fe   : > { %v2546_v62 = vmax.f32 %v2514_v41, 0.0 }
 0x5ff   : > { %v3045_v5 = vpack.c.bf16 %v2548_v33, %v2547_v49 }
 0x600   : > { %v3040_v34 = vpack.c.bf16 %v2546_v62, %v2545_v31  ;;  %v3511_v1 = vpop.f32.mrb[40].mxu0 }
 0x601   : > { %3109 = vst [vmem:[%s4792_s16 + $0x18] sm:$0xff] %v3045_v5   ;;  %v2519_v45 = vadd.f32 %v3511_v1, %v4784_v40  ;;  %v2407_v2 = vpop.f32.mrb[41].mxu0 }
 0x602   : > { %3108 = vst [vmem:[%s4792_s16 + $0x10] sm:$0xff] %v3040_v34   ;;  %v2517_v48 = vadd.f32 %v4784_v40, %v2407_v2  ;;  %v3512_v42 = vpop.f32.mrb[42].mxu0 }
 0x603   : > { %v2520_v7 = vadd.f32 %v3512_v42, %v4784_v40  ;;  %v2410_v60 = vpop.f32.mrb[43].mxu0  ;;  %v2551_v3 = vmax.f32 %v2519_v45, 0.0 }
 0x604   : > { %v2518_v44 = vadd.f32 %v4784_v40, %v2410_v60  ;;  %v2549_v54 = vmax.f32 %v2517_v48, 0.0 }
 0x605   : > { %v2552_v47 = vmax.f32 %v2520_v7, 0.0 }
 0x606   : > { %v2550_v11 = vmax.f32 %v2518_v44, 0.0 }
 0x607   : > { %v3055_v13 = vpack.c.bf16 %v2552_v47, %v2551_v3 }
 0x608   : > { %v3050_v14 = vpack.c.bf16 %v2550_v11, %v2549_v54  ;;  %v3515_v63 = vpop.f32.mrb[44].mxu0 }
 0x609   : > { %3111 = vst [vmem:[%s4792_s16 + $0x28] sm:$0xff] %v3055_v13   ;;  %v2523_v16 = vadd.f32 %v3515_v63, %v4784_v40  ;;  %v2423_v57 = vpop.f32.mrb[45].mxu0 }
 0x60a   : > { %3110 = vst [vmem:[%s4792_s16 + $0x20] sm:$0xff] %v3050_v14   ;;  %v2521_v20 = vadd.f32 %v4784_v40, %v2423_v57  ;;  %v3516_v9 = vpop.f32.mrb[46].mxu0 }
 0x60b   : > { %v2524_v28 = vadd.f32 %v3516_v9, %v4784_v40  ;;  %v2426_v58 = vpop.f32.mrb[47].mxu0  ;;  %v2555_v38 = vmax.f32 %v2523_v16, 0.0 }
 0x60c   : > { %v2522_v17 = vadd.f32 %v4784_v40, %v2426_v58  ;;  %v2553_v18 = vmax.f32 %v2521_v20, 0.0 }
 0x60d   : > { %v2556_v59 = vmax.f32 %v2524_v28, 0.0 }
 0x60e   : > { %v2554_v22 = vmax.f32 %v2522_v17, 0.0 }
 0x60f   : > { %v3065_v21 = vpack.c.bf16 %v2556_v59, %v2555_v38 }
 0x610   : > { %v3060_v23 = vpack.c.bf16 %v2554_v22, %v2553_v18  ;;  %v3519_v43 = vpop.f32.mrb[48].mxu0 }
 0x611   : > { %3113 = vst [vmem:[%s4792_s16 + $0x38] sm:$0xff] %v3065_v21   ;;  %v2527_v12 = vadd.f32 %v3519_v43, %v4784_v40  ;;  %v2439_v6 = vpop.f32.mrb[49].mxu0 }
 0x612   : > { %3112 = vst [vmem:[%s4792_s16 + $0x30] sm:$0xff] %v3060_v23   ;;  %v2525_v4 = vadd.f32 %v4784_v40, %v2439_v6  ;;  %v3520_v37 = vpop.f32.mrb[50].mxu0 }
 0x613   : > { %v2528_v27 = vadd.f32 %v3520_v37, %v4784_v40  ;;  %v2442_v29 = vpop.f32.mrb[51].mxu0  ;;  %v2559_v32 = vmax.f32 %v2527_v12, 0.0 }
 0x614   : > { %v2526_v8 = vadd.f32 %v4784_v40, %v2442_v29  ;;  %v2557_v24 = vmax.f32 %v2525_v4, 0.0 }
 0x615   : > { %v2560_v25 = vmax.f32 %v2528_v27, 0.0 }
 0x616   : > { %v2558_v36 = vmax.f32 %v2526_v8, 0.0 }
 0x617   : > { %v3075_v30 = vpack.c.bf16 %v2560_v25, %v2559_v32 }
 0x618   : > { %v3070_v46 = vpack.c.bf16 %v2558_v36, %v2557_v24  ;;  %v3523_v10 = vpop.f32.mrb[52].mxu0 }
 0x619   : > { %3115 = vst [vmem:[%s4792_s16 + $0x48] sm:$0xff] %v3075_v30   ;;  %v2531_v15 = vadd.f32 %v3523_v10, %v4784_v40  ;;  %v2455_v0 = vpop.f32.mrb[53].mxu0 }
 0x61a   : > { %3114 = vst [vmem:[%s4792_s16 + $0x40] sm:$0xff] %v3070_v46   ;;  %v2529_v50 = vadd.f32 %v4784_v40, %v2455_v0  ;;  %v3524_v51 = vpop.f32.mrb[54].mxu0 }
 0x61b   : > { %v2532_v53 = vadd.f32 %v3524_v51, %v4784_v40  ;;  %v2458_v52 = vpop.f32.mrb[55].mxu0  ;;  %v2563_v26 = vmax.f32 %v2531_v15, 0.0 }
 0x61c   : > { %v2530_v19 = vadd.f32 %v4784_v40, %v2458_v52  ;;  %v2561_v35 = vmax.f32 %v2529_v50, 0.0 }
 0x61d   : > { %v2564_v56 = vmax.f32 %v2532_v53, 0.0 }
 0x61e   : > { %v2562_v55 = vmax.f32 %v2530_v19, 0.0 }
 0x61f   : > { %v3085_v61 = vpack.c.bf16 %v2564_v56, %v2563_v26 }
 0x620   : > { %v3080_v39 = vpack.c.bf16 %v2562_v55, %v2561_v35  ;;  %v3527_v41 = vpop.f32.mrb[56].mxu0 }
 0x621   : > { %3117 = vst [vmem:[%s4792_s16 + $0x58] sm:$0xff] %v3085_v61   ;;  %v2535_v49 = vadd.f32 %v3527_v41, %v4784_v40  ;;  %v2471_v33 = vpop.f32.mrb[57].mxu0 }
 0x622   : > { %3116 = vst [vmem:[%s4792_s16 + $0x50] sm:$0xff] %v3080_v39   ;;  %v2533_v31 = vadd.f32 %v4784_v40, %v2471_v33  ;;  %v3528_v62 = vpop.f32.mrb[58].mxu0 }
 0x623   : > { %v2536_v5 = vadd.f32 %v3528_v62, %v4784_v40  ;;  %v2474_v34 = vpop.f32.mrb[59].mxu0  ;;  %v2567_v45 = vmax.f32 %v2535_v49, 0.0 }
 0x624   : > { %v2534_v1 = vadd.f32 %v4784_v40, %v2474_v34  ;;  %v2565_v48 = vmax.f32 %v2533_v31, 0.0 }
 0x625   : > { %v2568_v2 = vmax.f32 %v2536_v5, 0.0 }
 0x626   : > { %v2566_v42 = vmax.f32 %v2534_v1, 0.0 }
 0x627   : > { %v3095_v7 = vpack.c.bf16 %v2568_v2, %v2567_v45 }
 0x628   : > { %v3090_v60 = vpack.c.bf16 %v2566_v42, %v2565_v48  ;;  %v3531_v44 = vpop.f32.mrb[60].mxu0 }
 0x629   : > { %3119 = vst [vmem:[%s4792_s16 + $0x68] sm:$0xff] %v3095_v7   ;;  %v2539_v3 = vadd.f32 %v3531_v44, %v4784_v40  ;;  %v2487_v47 = vpop.f32.mrb[61].mxu0 }
 0x62a   : > { %3118 = vst [vmem:[%s4792_s16 + $0x60] sm:$0xff] %v3090_v60   ;;  %v2537_v54 = vadd.f32 %v4784_v40, %v2487_v47  ;;  %v3532_v11 = vpop.f32.mrb[62].mxu0 }
 0x62b   : > { %v2540_v13 = vadd.f32 %v3532_v11, %v4784_v40  ;;  %v2490_v14 = vpop.f32.mrb[63].mxu0  ;;  %v2571_v16 = vmax.f32 %v2539_v3, 0.0 }
 0x62c   : > { %v2538_v63 = vadd.f32 %v4784_v40, %v2490_v14  ;;  %v2569_v20 = vmax.f32 %v2537_v54, 0.0 }
 0x62d   : > { %v2572_v57 = vmax.f32 %v2540_v13, 0.0 }
 0x62e   : > { %v2570_v9 = vmax.f32 %v2538_v63, 0.0 }
 0x62f   : > { %v3105_v28 = vpack.c.bf16 %v2572_v57, %v2571_v16 }
 0x630   : > { %v3100_v58 = vpack.c.bf16 %v2570_v9, %v2569_v20 }
 0x631   : > { %3121 = vst [vmem:[%s4792_s16 + $0x78] sm:$0xff] %v3105_v28  }
 0x632   : > { %3120 = vst [vmem:[%s4792_s16 + $0x70] sm:$0xff] %v3100_v58  }
 0x633   : > { %3890 = shalt.err (!%p3887_p5)
}
 0x634   : > { %s3891_s16 = scalar_lea.hbm %s4842_s26, 2048  ;;  %s3895_s15 = scalar_lea.hbm %s4938_s8, 16384 }
 0x635   : > { %p3892_p6 = scmp.ne.s32.totalorder %s4842_s26, %s3891_s16  ;;  %p3896_p4 = scmp.lt.u32.totalorder %s4842_s26, %s4938_s8 }
 0x636   : > { %p3897_p10 = scmp.lt.u32.totalorder %s3895_s15, %s3891_s16  ;;  %p3899_p9 = scmp.lt.u32.totalorder %s3891_s16, %s4842_s26 }
 0x637   : > { %p3893_p7 = pnand %p3892_p6, %p4939_p12 }
 0x638   : > { %p3898_p8 = por %p3897_p10, %p3896_p4 }
 0x639   : > { %p3894_p2 = pneg %p3893_p7 }
 0x63a   : > { %p3900_p0 = por %p3899_p9, %p3898_p8 }
 0x63c   : > { %p3901_p11 = pnand %p3900_p0, %p3894_p2 }
 0x63e   : > { %3904 = shalt.err (!%p3901_p11)
}
 0x63f   : > { %s3981_s7 = smov 64   ;;  %s3982_s30 = smov 4  }
 0x640   : > { %3567 = dma.vmem_to_hbm [thread:$0]  (%p4939_p12), %s4844_s10, 2048, %s4842_s26, %s2734_s29, %s3981_s7, %s3981_s7, %s3982_s30  }
 0x641 PF: > { %s4940_s13 = sld [smem:[#allocation8_spill]]  ;;  %p3578_p13 = scmp.ge.s32.totalorder %s3975_s24, 2 }
 0x642   : > { %p4941_p1 = scmp.ne.s32.totalorder %s4931_s27, 0 }
 0x644   : > { %p3574_p3 = pnand %p3578_p13, %p4941_p1 }
 0x647   : > { %s2764_s12 = sand.u32 1, %s4940_s13  }
 0x648   : > { %s2765_s16 = scalar_lea.sflag [#allocation4], %s2764_s12 }
 0x649   : > { %3942 = dma.done.wait (!%p3574_p3), %s2765_s16, 2048  }
 0x64a   : > { %3944 = vsyncadd (!%p3574_p3), %s2765_s16, 4294965248  ;;  %s27_s24 = sadd.s32 1, %s3975_s24   ;;  %s4942_s21 = smov %s4121_s17 }
 0x64b   : > { %p24_p5 = scmp.ge.s32.totalorder %s27_s24, 10   ;;  %s4943_s14 = sld [smem:[#allocation10_spill]] }
 0x64c   : > { %s4944_s11 = sld [smem:[#allocation11_spill]]  ;;  %s4945_s17 = smov %s3951_s18 }
 0x64d   : > { %s4946_s18 = smov %s3955_s19  ;;  %s4947_s19 = smov %s4942_s21 }
 0x64e   : > { %s4948_s20 = smov %s3967_s22  ;;  %s4949_s21 = smov %s3971_s23 }
 0x64f   :  { %26 = sbr.rel (!%p24_p5) target bundleno = 13 (0xd), region = 115 }
 0x651   : > { %s4950_s22 = smov %s4943_s14 }
 0x652   : > { %s4951_s23 = smov %s4944_s11 }
 0x656   :  { %2770 = vsyncpa [#allocation3], 1 }
 0x657   :  { %2772 = vsyncpa [#allocation3 + $0x1], 1 }
 0x658   :  { %2773 = vsyncpa [#allocation4], 1 }
 0x659   :  { %2775 = vsyncpa [#allocation4 + $0x1], 1 }

</bundles_post_ra>
